<compile_context>
chip_gen: v5e
topology: v5e:2x2
jax: 0.10.0
libtpu: 0.0.40
codegen_flags: <defaults>
</compile_context>

<pallas_src>
import functools

import jax
import jax.numpy as jnp
from jax import lax
from jax.experimental import pallas as pl
from jax.experimental.pallas import tpu as pltpu


_PARAM_ORDER = ['ln1_a', 'ln1_b',
                'wq', 'bq', 'wk', 'bk', 'wv', 'bv',
                'wo', 'bo',
                'ln2_a', 'ln2_b',
                'w1', 'b1', 'w2', 'b2']


def _pick_block(requested, total, quantum):
    """Largest block <= requested that divides `total` and is quantum-aligned
    (or equals `total`)."""
    b = max(1, min(int(requested), int(total)))
    for cand in range(b, 0, -1):
        if total % cand == 0 and (cand % quantum == 0 or cand == total):
            return cand
    return int(total)


def _default_vmem_limit():
    """Per-generation VMEM budget: ~75% of physical, capped at 96 MiB
    (=> ~48 MiB on v7x's 64 MiB, 96 MiB on v5e/v6e's 128 MiB)."""
    try:
        cap = int(pltpu.get_tpu_info().vmem_capacity_bytes)
        return min(cap * 3 // 4, 96 * 1024 * 1024)
    except Exception:
        return 64 * 1024 * 1024          # known-safe fallback


def encoder_layer_kernel(x_ref, mask_ref,
                         ln1_a_ref, ln1_b_ref,
                         wq_ref, bq_ref, wk_ref, bk_ref, wv_ref, bv_ref,
                         wo_ref, bo_ref,
                         ln2_a_ref, ln2_b_ref,
                         w1_ref, b1_ref, w2_ref, b2_ref,
                         o_ref,
                         k_scr, v_scr, acc_ref,
                         *, num_heads, eps, block_s, approx_recip):
    S, D = x_ref.shape[1], x_ref.shape[2]
    d_k = D // num_heads
    cdt = wq_ref.dtype                       # MXU operand dtype (bf16 or f32)
    n_ff = w1_ref.shape[0]                   # number of Dff chunks
    qi = pl.program_id(1)                    # query-block index (grid axis 1)
    inv_nm1 = 1.0 / (D - 1)

    def layer_norm(z, a, b):
        mean = jnp.mean(z, axis=-1, keepdims=True)
        # torch.std: unbiased (N-1) denom; eps added to std (not var).
        var = jnp.sum((z - mean) ** 2, axis=-1, keepdims=True) * inv_nm1
        inv = pl.reciprocal(jnp.sqrt(var) + eps)        # exact 1/x
        return a * (z - mean) * inv + b

    ln1_a = ln1_a_ref[...]
    ln1_b = ln1_b_ref[...]

    # ---- once per batch row: K / V projections into head-major VMEM scratch ----
    @pl.when(qi == 0)
    def _():
        y_full = layer_norm(x_ref[0].astype(jnp.float32), ln1_a, ln1_b).astype(cdt)

        def kv_body(h, c):
            k_scr[h] = (jnp.dot(y_full, wk_ref[h],
                                preferred_element_type=jnp.float32)
                        + bk_ref[h]).astype(cdt)
            v_scr[h] = (jnp.dot(y_full, wv_ref[h],
                                preferred_element_type=jnp.float32)
                        + bv_ref[h]).astype(cdt)
            return c
        lax.fori_loop(0, num_heads, kv_body, 0)

    # ---- this grid step's query block ----
    q0 = pl.multiple_of(qi * block_s, block_s)
    x_blk = x_ref[0, pl.ds(q0, block_s), :].astype(jnp.float32)     # (tq, D)
    y_blk = layer_norm(x_blk, ln1_a, ln1_b).astype(cdt)

    mask_row = mask_ref[0]                                          # (1, S)
    # Hoisted: one compare + one broadcast, reused by every head.
    masked = jnp.broadcast_to(mask_row == 0.0, (block_s, S))
    scale = jnp.float32(1.0 / (d_k ** 0.5))
    neg_big = jnp.float32(-1e9)

    # ---- multi-head self-attention, fused per-head output projection ----
    acc_ref[...] = jnp.zeros_like(acc_ref)

    def head_body(h, c):
        q_h = (jnp.dot(y_blk, wq_ref[h], preferred_element_type=jnp.float32)
               + bq_ref[h]).astype(cdt)                             # (tq, d_k)
        # contract last axes of q_h and K[h] -- no transpose / XLU relayout
        s = lax.dot_general(q_h, k_scr[h], (((1,), (1,)), ((), ())),
                            preferred_element_type=jnp.float32)     # (tq, S)
        s = jnp.where(masked, neg_big, s * scale)                   # masked_fill
        m = jnp.max(s, axis=-1, keepdims=True)
        e = jnp.exp(s - m)
        denom = jnp.sum(e, axis=-1, keepdims=True)
        p = (e * pl.reciprocal(denom, approx=approx_recip)).astype(cdt)
        o_h = jnp.dot(p, v_scr[h], preferred_element_type=jnp.float32).astype(cdt)
        # fused output projection: lane-dense (tq, D) accumulate, no slab
        acc_ref[...] += jnp.dot(o_h, wo_ref[h], preferred_element_type=jnp.float32)
        return c
    lax.fori_loop(0, num_heads, head_body, 0)

    x1 = x_blk + acc_ref[...] + bo_ref[...]       # residual; dropout = identity

    # ---- position-wise feed-forward (Dff chunked), reuse acc_ref as accumulator ----
    y2 = layer_norm(x1, ln2_a_ref[...], ln2_b_ref[...]).astype(cdt)
    acc_ref[...] = jnp.zeros_like(acc_ref)

    def ffn_body(f, c):
        h1 = (jnp.dot(y2, w1_ref[f], preferred_element_type=jnp.float32)
              + b1_ref[f])
        h1 = jnp.maximum(h1, 0.0).astype(cdt)
        acc_ref[...] += jnp.dot(h1, w2_ref[f], preferred_element_type=jnp.float32)
        return c
    lax.fori_loop(0, n_ff, ffn_body, 0)

    o_ref[0] = (x1 + acc_ref[...] + b2_ref[...]).astype(o_ref.dtype)


def prepare_encoder_params(params, *, num_heads, compute_dtype=jnp.bfloat16,
                           block_dff=512):
    """One-time weight preparation (cache the result and reuse across calls):
    cast matmul weights to the compute dtype, split Q/K/V/O per head and
    chunk w1/b1/w2 along Dff so the kernel only does leading-axis indexing."""
    D = params['wq'].shape[0]
    Dff = params['w1'].shape[1]
    assert D % num_heads == 0, "num_heads must divide the model dim"
    d_k = D // num_heads
    bd = _pick_block(block_dff, Dff, 128)
    n_ff = Dff // bd
    cdt = jnp.dtype(compute_dtype)
    f32 = jnp.float32

    def split_cols(w):          # (D, D) -> (H, D, d_k): per-head output columns
        return jnp.asarray(w).reshape(D, num_heads, d_k).transpose(1, 0, 2).astype(cdt)

    def split_cols_bias(b):     # (1, D) -> (H, 1, d_k)
        return jnp.asarray(b).reshape(num_heads, 1, d_k).astype(f32)

    return {
        'ln1_a': jnp.asarray(params['ln1_a'], f32),
        'ln1_b': jnp.asarray(params['ln1_b'], f32),
        'wq': split_cols(params['wq']), 'bq': split_cols_bias(params['bq']),
        'wk': split_cols(params['wk']), 'bk': split_cols_bias(params['bk']),
        'wv': split_cols(params['wv']), 'bv': split_cols_bias(params['bv']),
        # output projection split along its rows -> fused per-head accumulation
        'wo': jnp.asarray(params['wo']).reshape(num_heads, d_k, D).astype(cdt),
        'bo': jnp.asarray(params['bo'], f32),
        'ln2_a': jnp.asarray(params['ln2_a'], f32),
        'ln2_b': jnp.asarray(params['ln2_b'], f32),
        'w1': jnp.asarray(params['w1']).reshape(D, n_ff, bd).transpose(1, 0, 2).astype(cdt),
        'b1': jnp.asarray(params['b1']).reshape(n_ff, 1, bd).astype(f32),
        'w2': jnp.asarray(params['w2']).reshape(n_ff, bd, D).astype(cdt),
        'b2': jnp.asarray(params['b2'], f32),
    }


def encoder_layer(x, mask, prepared, *, eps=1e-6, block_s=256,
                  approx_recip=None, vmem_limit_bytes=None,
                  single_buffer_weights=True):
    B, S, D = x.shape
    H, _, d_k = prepared['wq'].shape
    cdt = prepared['wq'].dtype
    n_ff, _, bd = prepared['w1'].shape
    Dff = n_ff * bd

    block_s = _pick_block(block_s, S, 8)
    n_qb = S // block_s

    if approx_recip is None:
        # approx softmax reciprocal only on the low-precision path
        approx_recip = jnp.dtype(cdt) == jnp.dtype(jnp.bfloat16)
    if vmem_limit_bytes is None:
        vmem_limit_bytes = _default_vmem_limit()

    args = [x, mask] + [prepared[name] for name in _PARAM_ORDER]

    def _param_spec(arr, single_buffer):
        nd = arr.ndim
        idx = lambda b, q, _nd=nd: (0,) * _nd          # same block every step
        if single_buffer:
            # weights never change across the grid -> one VMEM buffer is enough
            return pl.BlockSpec(arr.shape, idx, pipeline_mode=pl.Buffered(1))
        return pl.BlockSpec(arr.shape, idx)

    def _build(single_buffer):
        in_specs = [
            pl.BlockSpec((1, S, D), lambda b, q: (b, 0, 0)),   # x: full row per batch
            pl.BlockSpec((1, 1, S), lambda b, q: (b, 0, 0)),   # mask
        ] + [_param_spec(prepared[name], single_buffer) for name in _PARAM_ORDER]

        grid_spec = pltpu.PrefetchScalarGridSpec(
            num_scalar_prefetch=0,
            grid=(B, n_qb),
            in_specs=in_specs,
            out_specs=pl.BlockSpec((1, block_s, D), lambda b, q: (b, q, 0)),
            scratch_shapes=[
                pltpu.VMEM((H, S, d_k), cdt),          # K, head-major
                pltpu.VMEM((H, S, d_k), cdt),          # V, head-major
                pltpu.VMEM((block_s, D), jnp.float32), # attn-out / FFN accumulator
            ])

        kernel = functools.partial(encoder_layer_kernel,
                                   num_heads=H, eps=eps, block_s=block_s,
                                   approx_recip=bool(approx_recip))

        flops = 2 * B * S * (4 * D * D + 2 * S * D + 2 * D * Dff)
        transcendentals = B * (H * S * S + 8 * S)
        bytes_accessed = (2 * x.size * x.dtype.itemsize
                          + mask.size * mask.dtype.itemsize
                          + sum(int(v.size) * v.dtype.itemsize
                                for v in prepared.values()))

        return pl.pallas_call(
            kernel,
            out_shape=jax.ShapeDtypeStruct((B, S, D), x.dtype),
            grid_spec=grid_spec,
            compiler_params=pltpu.CompilerParams(
                dimension_semantics=("parallel", "arbitrary"),
                vmem_limit_bytes=int(vmem_limit_bytes)),
            cost_estimate=pl.CostEstimate(
                flops=int(flops),
                transcendentals=int(transcendentals),
                bytes_accessed=int(bytes_accessed)),
        )

    # Prefer single-buffered weights; fall back to default double-buffering if
    # this JAX/Mosaic build rejects pipeline_mode (eager-mode fallback only).
    if single_buffer_weights and hasattr(pl, "Buffered"):
        try:
            out = _build(True)(*args)
            return jax.block_until_ready(out)
        except Exception:
            pass
    return _build(False)(*args)


def reference_encoder_layer(x, mask, params, *, num_heads, eps=1e-6):
    """Pure-JAX mirror of the PyTorch forward, for correctness check."""
    B, S, D = x.shape
    d_k = D // num_heads

    def layer_norm(z, a, b):
        mean = jnp.mean(z, axis=-1, keepdims=True)
        var = jnp.sum((z - mean) ** 2, axis=-1, keepdims=True) / (D - 1)
        return a * (z - mean) / (jnp.sqrt(var) + eps) + b

    y = layer_norm(x, params['ln1_a'], params['ln1_b'])
    q = y @ params['wq'] + params['bq']
    k = y @ params['wk'] + params['bk']
    v = y @ params['wv'] + params['bv']

    def split(t):  # (B,S,D) -> (B,h,S,dk)
        return t.reshape(B, S, num_heads, d_k).transpose(0, 2, 1, 3)

    qh, kh, vh = split(q), split(k), split(v)
    scores = jnp.einsum('bhqd,bhkd->bhqk', qh, kh) / jnp.sqrt(jnp.float32(d_k))
    scores = jnp.where(mask[:, None, :, :] == 0, -1e9, scores)
    p = jax.nn.softmax(scores, axis=-1)
    attn = jnp.einsum('bhqk,bhkd->bhqd', p, vh).transpose(0, 2, 1, 3).reshape(B, S, D)
    attn = attn @ params['wo'] + params['bo']
    x1 = x + attn

    y2 = layer_norm(x1, params['ln2_a'], params['ln2_b'])
    ff = jnp.maximum(y2 @ params['w1'] + params['b1'], 0.0) @ params['w2'] + params['b2']
    return x1 + ff


def make_params(key, D, Dff):
    keys = jax.random.split(key, 8)
    scale = 0.1
    return {
        'ln1_a': jnp.ones((1, D), jnp.float32),
        'ln1_b': jnp.zeros((1, D), jnp.float32),
        'wq': scale * jax.random.normal(keys[0], (D, D), jnp.float32),
        'bq': scale * jax.random.normal(keys[1], (1, D), jnp.float32),
        'wk': scale * jax.random.normal(keys[2], (D, D), jnp.float32),
        'bk': jnp.zeros((1, D), jnp.float32),
        'wv': scale * jax.random.normal(keys[3], (D, D), jnp.float32),
        'bv': jnp.zeros((1, D), jnp.float32),
        'wo': scale * jax.random.normal(keys[4], (D, D), jnp.float32),
        'bo': jnp.zeros((1, D), jnp.float32),
        'ln2_a': jnp.ones((1, D), jnp.float32),
        'ln2_b': jnp.zeros((1, D), jnp.float32),
        'w1': scale * jax.random.normal(keys[5], (D, Dff), jnp.float32),
        'b1': scale * jax.random.normal(keys[6], (1, Dff), jnp.float32),
        'w2': scale * jax.random.normal(keys[7], (Dff, D), jnp.float32),
        'b2': jnp.zeros((1, D), jnp.float32),
    }


if __name__ == "__main__":
    # Small but lane-dense shapes (D multiple of 128); block_s / block_dff set so
    # the q-block grid axis, the head loop and the Dff loop all take >1 step.
    B, S, D, H, DFF = 2, 16, 128, 4, 256
    key = jax.random.PRNGKey(0)
    kx, kp = jax.random.split(key)

    x = jax.random.normal(kx, (B, S, D), jnp.float32)
    # mask out the last two key positions of batch element 1
    mask = jnp.ones((B, 1, S), jnp.float32)
    mask = mask.at[1, 0, S - 2:].set(0.0)

    params = make_params(kp, D, DFF)
    ref = reference_encoder_layer(x, mask, params, num_heads=H)

    # f32 compute path: tight semantic check
    prep_f32 = prepare_encoder_params(params, num_heads=H,
                                      compute_dtype=jnp.float32, block_dff=128)
    out_f32 = encoder_layer(x, mask, prep_f32, block_s=8)
    out_f32 = jax.block_until_ready(out_f32)
    assert out_f32.shape == (B, S, D)
    assert jnp.allclose(out_f32, ref, rtol=1e-3, atol=1e-3), "f32 mismatch vs reference"

    # bf16 compute path (MXU fast path): looser check
    prep_bf16 = prepare_encoder_params(params, num_heads=H,
                                       compute_dtype=jnp.bfloat16, block_dff=128)
    out_bf16 = encoder_layer(x, mask, prep_bf16, block_s=8)
    out_bf16 = jax.block_until_ready(out_bf16)
    assert out_bf16.shape == (B, S, D)
    assert jnp.allclose(out_bf16, ref, rtol=1e-1, atol=1e-1), "bf16 mismatch vs reference"

    print("KERNEL_OK")
</pallas_src>

<mosaic_0001>
module attributes {stable_mosaic.version = 11 : i64} {
  func.func @encoder_layer_kernel(%arg0: i32, %arg1: i32, %arg2: memref<1x16x128xf32, #tpu.memory_space<vmem>>, %arg3: memref<1x1x16xf32, #tpu.memory_space<vmem>>, %arg4: memref<1x128xf32, #tpu.memory_space<vmem>>, %arg5: memref<1x128xf32, #tpu.memory_space<vmem>>, %arg6: memref<4x128x32xf32, #tpu.memory_space<vmem>>, %arg7: memref<4x1x32xf32, #tpu.memory_space<vmem>>, %arg8: memref<4x128x32xf32, #tpu.memory_space<vmem>>, %arg9: memref<4x1x32xf32, #tpu.memory_space<vmem>>, %arg10: memref<4x128x32xf32, #tpu.memory_space<vmem>>, %arg11: memref<4x1x32xf32, #tpu.memory_space<vmem>>, %arg12: memref<4x32x128xf32, #tpu.memory_space<vmem>>, %arg13: memref<1x128xf32, #tpu.memory_space<vmem>>, %arg14: memref<1x128xf32, #tpu.memory_space<vmem>>, %arg15: memref<1x128xf32, #tpu.memory_space<vmem>>, %arg16: memref<2x128x128xf32, #tpu.memory_space<vmem>>, %arg17: memref<2x1x128xf32, #tpu.memory_space<vmem>>, %arg18: memref<2x128x128xf32, #tpu.memory_space<vmem>>, %arg19: memref<1x128xf32, #tpu.memory_space<vmem>>, %arg20: memref<1x8x128xf32, #tpu.memory_space<vmem>>, %arg21: memref<4x16x32xf32, #tpu.memory_space<vmem>>, %arg22: memref<4x16x32xf32, #tpu.memory_space<vmem>>, %arg23: memref<8x128xf32, #tpu.memory_space<vmem>>) attributes {dimension_semantics = [#tpu.dimension_semantics<parallel>, #tpu.dimension_semantics<arbitrary>], iteration_bounds = array<i64: 2, 2>, scalar_prefetch = 0 : i64, scratch_operands = 3 : i64, tpu.core_type = #tpu.core_type<tc>, window_params = [{transform_indices = @transform_0, window_bounds = array<i64: 1, 16, 128>}, {transform_indices = @transform_1, window_bounds = array<i64: 1, 1, 16>}, {pipeline_mode = #tpu.pipeline_mode<synchronous>, transform_indices = @transform_2, window_bounds = array<i64: 1, 128>}, {pipeline_mode = #tpu.pipeline_mode<synchronous>, transform_indices = @transform_3, window_bounds = array<i64: 1, 128>}, {pipeline_mode = #tpu.pipeline_mode<synchronous>, transform_indices = @transform_4, window_bounds = array<i64: 4, 128, 32>}, {pipeline_mode = #tpu.pipeline_mode<synchronous>, transform_indices = @transform_5, window_bounds = array<i64: 4, 1, 32>}, {pipeline_mode = #tpu.pipeline_mode<synchronous>, transform_indices = @transform_6, window_bounds = array<i64: 4, 128, 32>}, {pipeline_mode = #tpu.pipeline_mode<synchronous>, transform_indices = @transform_7, window_bounds = array<i64: 4, 1, 32>}, {pipeline_mode = #tpu.pipeline_mode<synchronous>, transform_indices = @transform_8, window_bounds = array<i64: 4, 128, 32>}, {pipeline_mode = #tpu.pipeline_mode<synchronous>, transform_indices = @transform_9, window_bounds = array<i64: 4, 1, 32>}, {pipeline_mode = #tpu.pipeline_mode<synchronous>, transform_indices = @transform_10, window_bounds = array<i64: 4, 32, 128>}, {pipeline_mode = #tpu.pipeline_mode<synchronous>, transform_indices = @transform_11, window_bounds = array<i64: 1, 128>}, {pipeline_mode = #tpu.pipeline_mode<synchronous>, transform_indices = @transform_12, window_bounds = array<i64: 1, 128>}, {pipeline_mode = #tpu.pipeline_mode<synchronous>, transform_indices = @transform_13, window_bounds = array<i64: 1, 128>}, {pipeline_mode = #tpu.pipeline_mode<synchronous>, transform_indices = @transform_14, window_bounds = array<i64: 2, 128, 128>}, {pipeline_mode = #tpu.pipeline_mode<synchronous>, transform_indices = @transform_15, window_bounds = array<i64: 2, 1, 128>}, {pipeline_mode = #tpu.pipeline_mode<synchronous>, transform_indices = @transform_16, window_bounds = array<i64: 2, 128, 128>}, {pipeline_mode = #tpu.pipeline_mode<synchronous>, transform_indices = @transform_17, window_bounds = array<i64: 1, 128>}, {transform_indices = @transform_18, window_bounds = array<i64: 1, 8, 128>}]} {
    %c0 = arith.constant 0 : index
    %c0_0 = arith.constant 0 : index
    %0 = vector.load %arg4[%c0, %c0_0] : memref<1x128xf32, #tpu.memory_space<vmem>>, vector<1x128xf32>
    %c0_1 = arith.constant 0 : index
    %c0_2 = arith.constant 0 : index
    %1 = vector.load %arg5[%c0_1, %c0_2] : memref<1x128xf32, #tpu.memory_space<vmem>>, vector<1x128xf32>
    %c0_i32 = arith.constant 0 : i32
    %2 = arith.cmpi eq, %arg1, %c0_i32 : i32
    %3 = arith.extui %2 : i1 to i32
    %c0_i32_3 = arith.constant 0 : i32
    %4 = arith.cmpi ne, %3, %c0_i32_3 : i32
    scf.if %4 {
      %c0_47 = arith.constant 0 : index
      %c0_48 = arith.constant 0 : index
      %c0_49 = arith.constant 0 : index
      %83 = vector.load %arg2[%c0_47, %c0_48, %c0_49] : memref<1x16x128xf32, #tpu.memory_space<vmem>>, vector<1x16x128xf32>
      %84 = vector.shape_cast %83 : vector<1x16x128xf32> to vector<16x128xf32>
      %cst_50 = arith.constant dense<0.000000e+00> : vector<16xf32>
      %85 = vector.multi_reduction <add>, %84, %cst_50 [1] : vector<16x128xf32> to vector<16xf32>
      %86 = vector.shape_cast %85 : vector<16xf32> to vector<16x1xf32>
      %cst_51 = arith.constant 1.280000e+02 : f32
      %87 = vector.broadcast %cst_51 : f32 to vector<16x1xf32>
      %88 = arith.divf %86, %87 : vector<16x1xf32>
      %89 = vector.broadcast %88 : vector<16x1xf32> to vector<16x128xf32>
      %90 = arith.subf %84, %89 : vector<16x128xf32>
      %91 = arith.mulf %90, %90 : vector<16x128xf32>
      %cst_52 = arith.constant dense<0.000000e+00> : vector<16xf32>
      %92 = vector.multi_reduction <add>, %91, %cst_52 [1] : vector<16x128xf32> to vector<16xf32>
      %93 = vector.shape_cast %92 : vector<16xf32> to vector<16x1xf32>
      %cst_53 = arith.constant 0.00787401571 : f32
      %94 = vector.broadcast %cst_53 : f32 to vector<16x1xf32>
      %95 = arith.mulf %93, %94 : vector<16x1xf32>
      %96 = math.sqrt %95 : vector<16x1xf32>
      %cst_54 = arith.constant 9.99999997E-7 : f32
      %97 = vector.broadcast %cst_54 : f32 to vector<16x1xf32>
      %98 = arith.addf %96, %97 : vector<16x1xf32>
      %99 = tpu.reciprocal %98 : vector<16x1xf32> -> vector<16x1xf32>
      %100 = vector.broadcast %88 : vector<16x1xf32> to vector<16x128xf32>
      %101 = arith.subf %84, %100 : vector<16x128xf32>
      %102 = vector.broadcast %0 : vector<1x128xf32> to vector<16x128xf32>
      %103 = arith.mulf %102, %101 : vector<16x128xf32>
      %104 = vector.broadcast %99 : vector<16x1xf32> to vector<16x128xf32>
      %105 = arith.mulf %103, %104 : vector<16x128xf32>
      %106 = vector.broadcast %1 : vector<1x128xf32> to vector<16x128xf32>
      %107 = arith.addf %105, %106 : vector<16x128xf32>
      %c0_i32_55 = arith.constant 0 : i32
      %c4_i32_56 = arith.constant 4 : i32
      %108 = arith.addi %c0_i32_55, %c4_i32_56 : i32
      %c1_i32_57 = arith.constant 1 : i32
      scf.for %arg24 = %c0_i32_55 to %108 step %c1_i32_57  : i32 {
        %109 = arith.index_cast %arg24 : i32 to index
        %c0_59 = arith.constant 0 : index
        %c0_60 = arith.constant 0 : index
        %110 = vector.load %arg8[%109, %c0_59, %c0_60] : memref<4x128x32xf32, #tpu.memory_space<vmem>>, vector<1x128x32xf32>
        %111 = vector.shape_cast %110 : vector<1x128x32xf32> to vector<128x32xf32>
        %cst_61 = arith.constant dense<0.000000e+00> : vector<16x32xf32>
        %112 = tpu.matmul %107, %111, %cst_61 {dimension_numbers = #tpu.dot_dimension_numbers<[1], [0], [0], [1], [0, 0, 1, 1], [], []>} : vector<16x128xf32>, vector<128x32xf32>, vector<16x32xf32> -> vector<16x32xf32>
        %113 = arith.index_cast %arg24 : i32 to index
        %c0_62 = arith.constant 0 : index
        %c0_63 = arith.constant 0 : index
        %114 = vector.load %arg9[%113, %c0_62, %c0_63] : memref<4x1x32xf32, #tpu.memory_space<vmem>>, vector<1x1x32xf32>
        %115 = vector.shape_cast %114 : vector<1x1x32xf32> to vector<1x32xf32>
        %116 = vector.broadcast %115 : vector<1x32xf32> to vector<16x32xf32>
        %117 = arith.addf %112, %116 : vector<16x32xf32>
        %118 = arith.index_cast %arg24 : i32 to index
        %c0_64 = arith.constant 0 : index
        %c0_65 = arith.constant 0 : index
        %119 = vector.load %arg21[%118, %c0_64, %c0_65] : memref<4x16x32xf32, #tpu.memory_space<vmem>>, vector<1x16x32xf32>
        %120 = vector.shape_cast %119 : vector<1x16x32xf32> to vector<16x32xf32>
        %121 = vector.shape_cast %117 : vector<16x32xf32> to vector<1x16x32xf32>
        tpu.vector_store %arg21[%118, %c0_64, %c0_65], %121 {strides = array<i32>} : memref<4x16x32xf32, #tpu.memory_space<vmem>>, vector<1x16x32xf32>,
        %122 = arith.index_cast %arg24 : i32 to index
        %c0_66 = arith.constant 0 : index
        %c0_67 = arith.constant 0 : index
        %123 = vector.load %arg10[%122, %c0_66, %c0_67] : memref<4x128x32xf32, #tpu.memory_space<vmem>>, vector<1x128x32xf32>
        %124 = vector.shape_cast %123 : vector<1x128x32xf32> to vector<128x32xf32>
        %cst_68 = arith.constant dense<0.000000e+00> : vector<16x32xf32>
        %125 = tpu.matmul %107, %124, %cst_68 {dimension_numbers = #tpu.dot_dimension_numbers<[1], [0], [0], [1], [0, 0, 1, 1], [], []>} : vector<16x128xf32>, vector<128x32xf32>, vector<16x32xf32> -> vector<16x32xf32>
        %126 = arith.index_cast %arg24 : i32 to index
        %c0_69 = arith.constant 0 : index
        %c0_70 = arith.constant 0 : index
        %127 = vector.load %arg11[%126, %c0_69, %c0_70] : memref<4x1x32xf32, #tpu.memory_space<vmem>>, vector<1x1x32xf32>
        %128 = vector.shape_cast %127 : vector<1x1x32xf32> to vector<1x32xf32>
        %129 = vector.broadcast %128 : vector<1x32xf32> to vector<16x32xf32>
        %130 = arith.addf %125, %129 : vector<16x32xf32>
        %131 = arith.index_cast %arg24 : i32 to index
        %c0_71 = arith.constant 0 : index
        %c0_72 = arith.constant 0 : index
        %132 = vector.load %arg22[%131, %c0_71, %c0_72] : memref<4x16x32xf32, #tpu.memory_space<vmem>>, vector<1x16x32xf32>
        %133 = vector.shape_cast %132 : vector<1x16x32xf32> to vector<16x32xf32>
        %134 = vector.shape_cast %130 : vector<16x32xf32> to vector<1x16x32xf32>
        tpu.vector_store %arg22[%131, %c0_71, %c0_72], %134 {strides = array<i32>} : memref<4x16x32xf32, #tpu.memory_space<vmem>>, vector<1x16x32xf32>,
      }
      %c4_i32_58 = arith.constant 4 : i32
    } else {
    }
    %c8_i32 = arith.constant 8 : i32
    %5 = arith.muli %arg1, %c8_i32 : i32
    %6 = tpu.assume_multiple %5, 8 : i32
    %c0_4 = arith.constant 0 : index
    %7 = arith.index_cast %6 : i32 to index
    %c0_5 = arith.constant 0 : index
    %8 = vector.load %arg2[%c0_4, %7, %c0_5] : memref<1x16x128xf32, #tpu.memory_space<vmem>>, vector<1x8x128xf32>
    %9 = vector.shape_cast %8 : vector<1x8x128xf32> to vector<8x128xf32>
    %cst = arith.constant dense<0.000000e+00> : vector<8xf32>
    %10 = vector.multi_reduction <add>, %9, %cst [1] : vector<8x128xf32> to vector<8xf32>
    %11 = vector.shape_cast %10 : vector<8xf32> to vector<8x1xf32>
    %cst_6 = arith.constant 1.280000e+02 : f32
    %12 = vector.broadcast %cst_6 : f32 to vector<8x1xf32>
    %13 = arith.divf %11, %12 : vector<8x1xf32>
    %14 = vector.broadcast %13 : vector<8x1xf32> to vector<8x128xf32>
    %15 = arith.subf %9, %14 : vector<8x128xf32>
    %16 = arith.mulf %15, %15 : vector<8x128xf32>
    %cst_7 = arith.constant dense<0.000000e+00> : vector<8xf32>
    %17 = vector.multi_reduction <add>, %16, %cst_7 [1] : vector<8x128xf32> to vector<8xf32>
    %18 = vector.shape_cast %17 : vector<8xf32> to vector<8x1xf32>
    %cst_8 = arith.constant 0.00787401571 : f32
    %19 = vector.broadcast %cst_8 : f32 to vector<8x1xf32>
    %20 = arith.mulf %18, %19 : vector<8x1xf32>
    %21 = math.sqrt %20 : vector<8x1xf32>
    %cst_9 = arith.constant 9.99999997E-7 : f32
    %22 = vector.broadcast %cst_9 : f32 to vector<8x1xf32>
    %23 = arith.addf %21, %22 : vector<8x1xf32>
    %24 = tpu.reciprocal %23 : vector<8x1xf32> -> vector<8x1xf32>
    %25 = vector.broadcast %13 : vector<8x1xf32> to vector<8x128xf32>
    %26 = arith.subf %9, %25 : vector<8x128xf32>
    %27 = vector.broadcast %0 : vector<1x128xf32> to vector<8x128xf32>
    %28 = arith.mulf %27, %26 : vector<8x128xf32>
    %29 = vector.broadcast %24 : vector<8x1xf32> to vector<8x128xf32>
    %30 = arith.mulf %28, %29 : vector<8x128xf32>
    %31 = vector.broadcast %1 : vector<1x128xf32> to vector<8x128xf32>
    %32 = arith.addf %30, %31 : vector<8x128xf32>
    %c0_10 = arith.constant 0 : index
    %c0_11 = arith.constant 0 : index
    %c0_12 = arith.constant 0 : index
    %33 = vector.load %arg3[%c0_10, %c0_11, %c0_12] : memref<1x1x16xf32, #tpu.memory_space<vmem>>, vector<1x1x16xf32>
    %34 = vector.shape_cast %33 : vector<1x1x16xf32> to vector<1x16xf32>
    %cst_13 = arith.constant 0.000000e+00 : f32
    %35 = vector.broadcast %cst_13 : f32 to vector<1x16xf32>
    %36 = arith.cmpf oeq, %34, %35 : vector<1x16xf32>
    %37 = vector.shape_cast %36 : vector<1x16xi1> to vector<1x16xi1>
    %38 = vector.broadcast %37 : vector<1x16xi1> to vector<8x16xi1>
    %cst_14 = arith.constant 0.000000e+00 : f32
    %39 = vector.broadcast %cst_14 : f32 to vector<8x128xf32>
    %c0_15 = arith.constant 0 : index
    %c0_16 = arith.constant 0 : index
    %40 = vector.load %arg23[%c0_15, %c0_16] : memref<8x128xf32, #tpu.memory_space<vmem>>, vector<8x128xf32>
    tpu.vector_store %arg23[%c0_15, %c0_16], %39 {strides = array<i32>} : memref<8x128xf32, #tpu.memory_space<vmem>>, vector<8x128xf32>,
    %cst_17 = arith.constant 0.176776692 : f32
    %cst_18 = arith.constant -1.000000e+09 : f32
    %c0_i32_19 = arith.constant 0 : i32
    %c4_i32 = arith.constant 4 : i32
    %41 = arith.addi %c0_i32_19, %c4_i32 : i32
    %c1_i32 = arith.constant 1 : i32
    scf.for %arg24 = %c0_i32_19 to %41 step %c1_i32  : i32 {
      %83 = arith.index_cast %arg24 : i32 to index
      %c0_47 = arith.constant 0 : index
      %c0_48 = arith.constant 0 : index
      %84 = vector.load %arg6[%83, %c0_47, %c0_48] : memref<4x128x32xf32, #tpu.memory_space<vmem>>, vector<1x128x32xf32>
      %85 = vector.shape_cast %84 : vector<1x128x32xf32> to vector<128x32xf32>
      %cst_49 = arith.constant dense<0.000000e+00> : vector<8x32xf32>
      %86 = tpu.matmul %32, %85, %cst_49 {dimension_numbers = #tpu.dot_dimension_numbers<[1], [0], [0], [1], [0, 0, 1, 1], [], []>} : vector<8x128xf32>, vector<128x32xf32>, vector<8x32xf32> -> vector<8x32xf32>
      %87 = arith.index_cast %arg24 : i32 to index
      %c0_50 = arith.constant 0 : index
      %c0_51 = arith.constant 0 : index
      %88 = vector.load %arg7[%87, %c0_50, %c0_51] : memref<4x1x32xf32, #tpu.memory_space<vmem>>, vector<1x1x32xf32>
      %89 = vector.shape_cast %88 : vector<1x1x32xf32> to vector<1x32xf32>
      %90 = vector.broadcast %89 : vector<1x32xf32> to vector<8x32xf32>
      %91 = arith.addf %86, %90 : vector<8x32xf32>
      %92 = arith.index_cast %arg24 : i32 to index
      %c0_52 = arith.constant 0 : index
      %c0_53 = arith.constant 0 : index
      %93 = vector.load %arg21[%92, %c0_52, %c0_53] : memref<4x16x32xf32, #tpu.memory_space<vmem>>, vector<1x16x32xf32>
      %94 = vector.shape_cast %93 : vector<1x16x32xf32> to vector<16x32xf32>
      %cst_54 = arith.constant dense<0.000000e+00> : vector<8x16xf32>
      %95 = tpu.matmul %91, %94, %cst_54 {dimension_numbers = #tpu.dot_dimension_numbers<[1], [1], [0], [0], [0, 0, 1, 0], [], []>} : vector<8x32xf32>, vector<16x32xf32>, vector<8x16xf32> -> vector<8x16xf32>
      %96 = vector.broadcast %cst_17 : f32 to vector<8x16xf32>
      %97 = arith.mulf %95, %96 : vector<8x16xf32>
      %98 = vector.broadcast %cst_18 : f32 to vector<8x16xf32>
      %99 = arith.select %38, %98, %97 : vector<8x16xi1>, vector<8x16xf32>
      %cst_55 = arith.constant dense<0xFF800000> : vector<8xf32>
      %100 = vector.multi_reduction <maximumf>, %99, %cst_55 [1] : vector<8x16xf32> to vector<8xf32>
      %101 = vector.shape_cast %100 : vector<8xf32> to vector<8x1xf32>
      %102 = vector.broadcast %101 : vector<8x1xf32> to vector<8x16xf32>
      %103 = arith.subf %99, %102 : vector<8x16xf32>
      %104 = math.exp %103 : vector<8x16xf32>
      %cst_56 = arith.constant dense<0.000000e+00> : vector<8xf32>
      %105 = vector.multi_reduction <add>, %104, %cst_56 [1] : vector<8x16xf32> to vector<8xf32>
      %106 = vector.shape_cast %105 : vector<8xf32> to vector<8x1xf32>
      %107 = tpu.reciprocal %106 : vector<8x1xf32> -> vector<8x1xf32>
      %108 = vector.broadcast %107 : vector<8x1xf32> to vector<8x16xf32>
      %109 = arith.mulf %104, %108 : vector<8x16xf32>
      %110 = arith.index_cast %arg24 : i32 to index
      %c0_57 = arith.constant 0 : index
      %c0_58 = arith.constant 0 : index
      %111 = vector.load %arg22[%110, %c0_57, %c0_58] : memref<4x16x32xf32, #tpu.memory_space<vmem>>, vector<1x16x32xf32>
      %112 = vector.shape_cast %111 : vector<1x16x32xf32> to vector<16x32xf32>
      %cst_59 = arith.constant dense<0.000000e+00> : vector<8x32xf32>
      %113 = tpu.matmul %109, %112, %cst_59 {dimension_numbers = #tpu.dot_dimension_numbers<[1], [0], [0], [1], [0, 0, 1, 1], [], []>} : vector<8x16xf32>, vector<16x32xf32>, vector<8x32xf32> -> vector<8x32xf32>
      %c0_60 = arith.constant 0 : index
      %c0_61 = arith.constant 0 : index
      %114 = vector.load %arg23[%c0_60, %c0_61] : memref<8x128xf32, #tpu.memory_space<vmem>>, vector<8x128xf32>
      %115 = arith.index_cast %arg24 : i32 to index
      %c0_62 = arith.constant 0 : index
      %c0_63 = arith.constant 0 : index
      %116 = vector.load %arg12[%115, %c0_62, %c0_63] : memref<4x32x128xf32, #tpu.memory_space<vmem>>, vector<1x32x128xf32>
      %117 = vector.shape_cast %116 : vector<1x32x128xf32> to vector<32x128xf32>
      %cst_64 = arith.constant dense<0.000000e+00> : vector<8x128xf32>
      %118 = tpu.matmul %113, %117, %cst_64 {dimension_numbers = #tpu.dot_dimension_numbers<[1], [0], [0], [1], [0, 0, 1, 1], [], []>} : vector<8x32xf32>, vector<32x128xf32>, vector<8x128xf32> -> vector<8x128xf32>
      %119 = arith.addf %114, %118 : vector<8x128xf32>
      %c0_65 = arith.constant 0 : index
      %c0_66 = arith.constant 0 : index
      %120 = vector.load %arg23[%c0_65, %c0_66] : memref<8x128xf32, #tpu.memory_space<vmem>>, vector<8x128xf32>
      tpu.vector_store %arg23[%c0_65, %c0_66], %119 {strides = array<i32>} : memref<8x128xf32, #tpu.memory_space<vmem>>, vector<8x128xf32>,
    }
    %c4_i32_20 = arith.constant 4 : i32
    %c0_21 = arith.constant 0 : index
    %c0_22 = arith.constant 0 : index
    %42 = vector.load %arg23[%c0_21, %c0_22] : memref<8x128xf32, #tpu.memory_space<vmem>>, vector<8x128xf32>
    %43 = arith.addf %9, %42 : vector<8x128xf32>
    %c0_23 = arith.constant 0 : index
    %c0_24 = arith.constant 0 : index
    %44 = vector.load %arg13[%c0_23, %c0_24] : memref<1x128xf32, #tpu.memory_space<vmem>>, vector<1x128xf32>
    %45 = vector.broadcast %44 : vector<1x128xf32> to vector<8x128xf32>
    %46 = arith.addf %43, %45 : vector<8x128xf32>
    %c0_25 = arith.constant 0 : index
    %c0_26 = arith.constant 0 : index
    %47 = vector.load %arg14[%c0_25, %c0_26] : memref<1x128xf32, #tpu.memory_space<vmem>>, vector<1x128xf32>
    %c0_27 = arith.constant 0 : index
    %c0_28 = arith.constant 0 : index
    %48 = vector.load %arg15[%c0_27, %c0_28] : memref<1x128xf32, #tpu.memory_space<vmem>>, vector<1x128xf32>
    %cst_29 = arith.constant dense<0.000000e+00> : vector<8xf32>
    %49 = vector.multi_reduction <add>, %46, %cst_29 [1] : vector<8x128xf32> to vector<8xf32>
    %50 = vector.shape_cast %49 : vector<8xf32> to vector<8x1xf32>
    %cst_30 = arith.constant 1.280000e+02 : f32
    %51 = vector.broadcast %cst_30 : f32 to vector<8x1xf32>
    %52 = arith.divf %50, %51 : vector<8x1xf32>
    %53 = vector.broadcast %52 : vector<8x1xf32> to vector<8x128xf32>
    %54 = arith.subf %46, %53 : vector<8x128xf32>
    %55 = arith.mulf %54, %54 : vector<8x128xf32>
    %cst_31 = arith.constant dense<0.000000e+00> : vector<8xf32>
    %56 = vector.multi_reduction <add>, %55, %cst_31 [1] : vector<8x128xf32> to vector<8xf32>
    %57 = vector.shape_cast %56 : vector<8xf32> to vector<8x1xf32>
    %cst_32 = arith.constant 0.00787401571 : f32
    %58 = vector.broadcast %cst_32 : f32 to vector<8x1xf32>
    %59 = arith.mulf %57, %58 : vector<8x1xf32>
    %60 = math.sqrt %59 : vector<8x1xf32>
    %cst_33 = arith.constant 9.99999997E-7 : f32
    %61 = vector.broadcast %cst_33 : f32 to vector<8x1xf32>
    %62 = arith.addf %60, %61 : vector<8x1xf32>
    %63 = tpu.reciprocal %62 : vector<8x1xf32> -> vector<8x1xf32>
    %64 = vector.broadcast %52 : vector<8x1xf32> to vector<8x128xf32>
    %65 = arith.subf %46, %64 : vector<8x128xf32>
    %66 = vector.broadcast %47 : vector<1x128xf32> to vector<8x128xf32>
    %67 = arith.mulf %66, %65 : vector<8x128xf32>
    %68 = vector.broadcast %63 : vector<8x1xf32> to vector<8x128xf32>
    %69 = arith.mulf %67, %68 : vector<8x128xf32>
    %70 = vector.broadcast %48 : vector<1x128xf32> to vector<8x128xf32>
    %71 = arith.addf %69, %70 : vector<8x128xf32>
    %cst_34 = arith.constant 0.000000e+00 : f32
    %72 = vector.broadcast %cst_34 : f32 to vector<8x128xf32>
    %c0_35 = arith.constant 0 : index
    %c0_36 = arith.constant 0 : index
    %73 = vector.load %arg23[%c0_35, %c0_36] : memref<8x128xf32, #tpu.memory_space<vmem>>, vector<8x128xf32>
    tpu.vector_store %arg23[%c0_35, %c0_36], %72 {strides = array<i32>} : memref<8x128xf32, #tpu.memory_space<vmem>>, vector<8x128xf32>,
    %c0_i32_37 = arith.constant 0 : i32
    %c2_i32 = arith.constant 2 : i32
    %74 = arith.addi %c0_i32_37, %c2_i32 : i32
    %c1_i32_38 = arith.constant 1 : i32
    scf.for %arg24 = %c0_i32_37 to %74 step %c1_i32_38  : i32 {
      %83 = arith.index_cast %arg24 : i32 to index
      %c0_47 = arith.constant 0 : index
      %c0_48 = arith.constant 0 : index
      %84 = vector.load %arg16[%83, %c0_47, %c0_48] : memref<2x128x128xf32, #tpu.memory_space<vmem>>, vector<1x128x128xf32>
      %85 = vector.shape_cast %84 : vector<1x128x128xf32> to vector<128x128xf32>
      %cst_49 = arith.constant dense<0.000000e+00> : vector<8x128xf32>
      %86 = tpu.matmul %71, %85, %cst_49 {dimension_numbers = #tpu.dot_dimension_numbers<[1], [0], [0], [1], [0, 0, 1, 1], [], []>} : vector<8x128xf32>, vector<128x128xf32>, vector<8x128xf32> -> vector<8x128xf32>
      %87 = arith.index_cast %arg24 : i32 to index
      %c0_50 = arith.constant 0 : index
      %c0_51 = arith.constant 0 : index
      %88 = vector.load %arg17[%87, %c0_50, %c0_51] : memref<2x1x128xf32, #tpu.memory_space<vmem>>, vector<1x1x128xf32>
      %89 = vector.shape_cast %88 : vector<1x1x128xf32> to vector<1x128xf32>
      %90 = vector.broadcast %89 : vector<1x128xf32> to vector<8x128xf32>
      %91 = arith.addf %86, %90 : vector<8x128xf32>
      %cst_52 = arith.constant 0.000000e+00 : f32
      %92 = vector.broadcast %cst_52 : f32 to vector<8x128xf32>
      %93 = arith.maximumf %91, %92 : vector<8x128xf32>
      %c0_53 = arith.constant 0 : index
      %c0_54 = arith.constant 0 : index
      %94 = vector.load %arg23[%c0_53, %c0_54] : memref<8x128xf32, #tpu.memory_space<vmem>>, vector<8x128xf32>
      %95 = arith.index_cast %arg24 : i32 to index
      %c0_55 = arith.constant 0 : index
      %c0_56 = arith.constant 0 : index
      %96 = vector.load %arg18[%95, %c0_55, %c0_56] : memref<2x128x128xf32, #tpu.memory_space<vmem>>, vector<1x128x128xf32>
      %97 = vector.shape_cast %96 : vector<1x128x128xf32> to vector<128x128xf32>
      %cst_57 = arith.constant dense<0.000000e+00> : vector<8x128xf32>
      %98 = tpu.matmul %93, %97, %cst_57 {dimension_numbers = #tpu.dot_dimension_numbers<[1], [0], [0], [1], [0, 0, 1, 1], [], []>} : vector<8x128xf32>, vector<128x128xf32>, vector<8x128xf32> -> vector<8x128xf32>
      %99 = arith.addf %94, %98 : vector<8x128xf32>
      %c0_58 = arith.constant 0 : index
      %c0_59 = arith.constant 0 : index
      %100 = vector.load %arg23[%c0_58, %c0_59] : memref<8x128xf32, #tpu.memory_space<vmem>>, vector<8x128xf32>
      tpu.vector_store %arg23[%c0_58, %c0_59], %99 {strides = array<i32>} : memref<8x128xf32, #tpu.memory_space<vmem>>, vector<8x128xf32>,
    }
    %c2_i32_39 = arith.constant 2 : i32
    %c0_40 = arith.constant 0 : index
    %c0_41 = arith.constant 0 : index
    %75 = vector.load %arg23[%c0_40, %c0_41] : memref<8x128xf32, #tpu.memory_space<vmem>>, vector<8x128xf32>
    %76 = arith.addf %46, %75 : vector<8x128xf32>
    %c0_42 = arith.constant 0 : index
    %c0_43 = arith.constant 0 : index
    %77 = vector.load %arg19[%c0_42, %c0_43] : memref<1x128xf32, #tpu.memory_space<vmem>>, vector<1x128xf32>
    %78 = vector.broadcast %77 : vector<1x128xf32> to vector<8x128xf32>
    %79 = arith.addf %76, %78 : vector<8x128xf32>
    %c0_44 = arith.constant 0 : index
    %c0_45 = arith.constant 0 : index
    %c0_46 = arith.constant 0 : index
    %80 = vector.load %arg20[%c0_44, %c0_45, %c0_46] : memref<1x8x128xf32, #tpu.memory_space<vmem>>, vector<1x8x128xf32>
    %81 = vector.shape_cast %80 : vector<1x8x128xf32> to vector<8x128xf32>
    %82 = vector.shape_cast %79 : vector<8x128xf32> to vector<1x8x128xf32>
    tpu.vector_store %arg20[%c0_44, %c0_45, %c0_46], %82 {strides = array<i32>} : memref<1x8x128xf32, #tpu.memory_space<vmem>>, vector<1x8x128xf32>,
    return
  }
  func.func @transform_0(%arg0: i32, %arg1: i32) -> (i32, i32, i32) {
    %c0_i32 = arith.constant 0 : i32
    %c0_i32_0 = arith.constant 0 : i32
    %c0_i32_1 = arith.constant 0 : i32
    return %arg0, %c0_i32, %c0_i32_0 : i32, i32, i32
  }
  func.func @transform_1(%arg0: i32, %arg1: i32) -> (i32, i32, i32) {
    %c0_i32 = arith.constant 0 : i32
    %c0_i32_0 = arith.constant 0 : i32
    %c0_i32_1 = arith.constant 0 : i32
    return %arg0, %c0_i32, %c0_i32_0 : i32, i32, i32
  }
  func.func @transform_2(%arg0: i32, %arg1: i32) -> (i32, i32) {
    %c0_i32 = arith.constant 0 : i32
    %c0_i32_0 = arith.constant 0 : i32
    %c0_i32_1 = arith.constant 0 : i32
    return %c0_i32, %c0_i32_0 : i32, i32
  }
  func.func @transform_3(%arg0: i32, %arg1: i32) -> (i32, i32) {
    %c0_i32 = arith.constant 0 : i32
    %c0_i32_0 = arith.constant 0 : i32
    %c0_i32_1 = arith.constant 0 : i32
    return %c0_i32, %c0_i32_0 : i32, i32
  }
  func.func @transform_4(%arg0: i32, %arg1: i32) -> (i32, i32, i32) {
    %c0_i32 = arith.constant 0 : i32
    %c0_i32_0 = arith.constant 0 : i32
    %c0_i32_1 = arith.constant 0 : i32
    %c0_i32_2 = arith.constant 0 : i32
    return %c0_i32, %c0_i32_0, %c0_i32_1 : i32, i32, i32
  }
  func.func @transform_5(%arg0: i32, %arg1: i32) -> (i32, i32, i32) {
    %c0_i32 = arith.constant 0 : i32
    %c0_i32_0 = arith.constant 0 : i32
    %c0_i32_1 = arith.constant 0 : i32
    %c0_i32_2 = arith.constant 0 : i32
    return %c0_i32, %c0_i32_0, %c0_i32_1 : i32, i32, i32
  }
  func.func @transform_6(%arg0: i32, %arg1: i32) -> (i32, i32, i32) {
    %c0_i32 = arith.constant 0 : i32
    %c0_i32_0 = arith.constant 0 : i32
    %c0_i32_1 = arith.constant 0 : i32
    %c0_i32_2 = arith.constant 0 : i32
    return %c0_i32, %c0_i32_0, %c0_i32_1 : i32, i32, i32
  }
  func.func @transform_7(%arg0: i32, %arg1: i32) -> (i32, i32, i32) {
    %c0_i32 = arith.constant 0 : i32
    %c0_i32_0 = arith.constant 0 : i32
    %c0_i32_1 = arith.constant 0 : i32
    %c0_i32_2 = arith.constant 0 : i32
    return %c0_i32, %c0_i32_0, %c0_i32_1 : i32, i32, i32
  }
  func.func @transform_8(%arg0: i32, %arg1: i32) -> (i32, i32, i32) {
    %c0_i32 = arith.constant 0 : i32
    %c0_i32_0 = arith.constant 0 : i32
    %c0_i32_1 = arith.constant 0 : i32
    %c0_i32_2 = arith.constant 0 : i32
    return %c0_i32, %c0_i32_0, %c0_i32_1 : i32, i32, i32
  }
  func.func @transform_9(%arg0: i32, %arg1: i32) -> (i32, i32, i32) {
    %c0_i32 = arith.constant 0 : i32
    %c0_i32_0 = arith.constant 0 : i32
    %c0_i32_1 = arith.constant 0 : i32
    %c0_i32_2 = arith.constant 0 : i32
    return %c0_i32, %c0_i32_0, %c0_i32_1 : i32, i32, i32
  }
  func.func @transform_10(%arg0: i32, %arg1: i32) -> (i32, i32, i32) {
    %c0_i32 = arith.constant 0 : i32
    %c0_i32_0 = arith.constant 0 : i32
    %c0_i32_1 = arith.constant 0 : i32
    %c0_i32_2 = arith.constant 0 : i32
    return %c0_i32, %c0_i32_0, %c0_i32_1 : i32, i32, i32
  }
  func.func @transform_11(%arg0: i32, %arg1: i32) -> (i32, i32) {
    %c0_i32 = arith.constant 0 : i32
    %c0_i32_0 = arith.constant 0 : i32
    %c0_i32_1 = arith.constant 0 : i32
    return %c0_i32, %c0_i32_0 : i32, i32
  }
  func.func @transform_12(%arg0: i32, %arg1: i32) -> (i32, i32) {
    %c0_i32 = arith.constant 0 : i32
    %c0_i32_0 = arith.constant 0 : i32
    %c0_i32_1 = arith.constant 0 : i32
    return %c0_i32, %c0_i32_0 : i32, i32
  }
  func.func @transform_13(%arg0: i32, %arg1: i32) -> (i32, i32) {
    %c0_i32 = arith.constant 0 : i32
    %c0_i32_0 = arith.constant 0 : i32
    %c0_i32_1 = arith.constant 0 : i32
    return %c0_i32, %c0_i32_0 : i32, i32
  }
  func.func @transform_14(%arg0: i32, %arg1: i32) -> (i32, i32, i32) {
    %c0_i32 = arith.constant 0 : i32
    %c0_i32_0 = arith.constant 0 : i32
    %c0_i32_1 = arith.constant 0 : i32
    %c0_i32_2 = arith.constant 0 : i32
    return %c0_i32, %c0_i32_0, %c0_i32_1 : i32, i32, i32
  }
  func.func @transform_15(%arg0: i32, %arg1: i32) -> (i32, i32, i32) {
    %c0_i32 = arith.constant 0 : i32
    %c0_i32_0 = arith.constant 0 : i32
    %c0_i32_1 = arith.constant 0 : i32
    %c0_i32_2 = arith.constant 0 : i32
    return %c0_i32, %c0_i32_0, %c0_i32_1 : i32, i32, i32
  }
  func.func @transform_16(%arg0: i32, %arg1: i32) -> (i32, i32, i32) {
    %c0_i32 = arith.constant 0 : i32
    %c0_i32_0 = arith.constant 0 : i32
    %c0_i32_1 = arith.constant 0 : i32
    %c0_i32_2 = arith.constant 0 : i32
    return %c0_i32, %c0_i32_0, %c0_i32_1 : i32, i32, i32
  }
  func.func @transform_17(%arg0: i32, %arg1: i32) -> (i32, i32) {
    %c0_i32 = arith.constant 0 : i32
    %c0_i32_0 = arith.constant 0 : i32
    %c0_i32_1 = arith.constant 0 : i32
    return %c0_i32, %c0_i32_0 : i32, i32
  }
  func.func @transform_18(%arg0: i32, %arg1: i32) -> (i32, i32, i32) {
    %c0_i32 = arith.constant 0 : i32
    %c0_i32_0 = arith.constant 0 : i32
    return %arg0, %arg1, %c0_i32 : i32, i32, i32
  }
}

module attributes {stable_mosaic.version = 11 : i64} {
  func.func @encoder_layer_kernel(%arg0: i32, %arg1: i32, %arg2: memref<1x16x128xf32, #tpu.memory_space<vmem>>, %arg3: memref<1x1x16xf32, #tpu.memory_space<vmem>>, %arg4: memref<1x128xf32, #tpu.memory_space<vmem>>, %arg5: memref<1x128xf32, #tpu.memory_space<vmem>>, %arg6: memref<4x128x32xf32, #tpu.memory_space<vmem>>, %arg7: memref<4x1x32xf32, #tpu.memory_space<vmem>>, %arg8: memref<4x128x32xf32, #tpu.memory_space<vmem>>, %arg9: memref<4x1x32xf32, #tpu.memory_space<vmem>>, %arg10: memref<4x128x32xf32, #tpu.memory_space<vmem>>, %arg11: memref<4x1x32xf32, #tpu.memory_space<vmem>>, %arg12: memref<4x32x128xf32, #tpu.memory_space<vmem>>, %arg13: memref<1x128xf32, #tpu.memory_space<vmem>>, %arg14: memref<1x128xf32, #tpu.memory_space<vmem>>, %arg15: memref<1x128xf32, #tpu.memory_space<vmem>>, %arg16: memref<2x128x128xf32, #tpu.memory_space<vmem>>, %arg17: memref<2x1x128xf32, #tpu.memory_space<vmem>>, %arg18: memref<2x128x128xf32, #tpu.memory_space<vmem>>, %arg19: memref<1x128xf32, #tpu.memory_space<vmem>>, %arg20: memref<1x8x128xf32, #tpu.memory_space<vmem>>, %arg21: memref<4x16x32xf32, #tpu.memory_space<vmem>>, %arg22: memref<4x16x32xf32, #tpu.memory_space<vmem>>, %arg23: memref<8x128xf32, #tpu.memory_space<vmem>>) attributes {dimension_semantics = [#tpu.dimension_semantics<parallel>, #tpu.dimension_semantics<arbitrary>], iteration_bounds = array<i64: 2, 2>, scalar_prefetch = 0 : i64, scratch_operands = 3 : i64, tpu.core_type = #tpu.core_type<tc>, window_params = [{transform_indices = @transform_0, window_bounds = array<i64: 1, 16, 128>}, {transform_indices = @transform_1, window_bounds = array<i64: 1, 1, 16>}, {pipeline_mode = #tpu.pipeline_mode<synchronous>, transform_indices = @transform_2, window_bounds = array<i64: 1, 128>}, {pipeline_mode = #tpu.pipeline_mode<synchronous>, transform_indices = @transform_3, window_bounds = array<i64: 1, 128>}, {pipeline_mode = #tpu.pipeline_mode<synchronous>, transform_indices = @transform_4, window_bounds = array<i64: 4, 128, 32>}, {pipeline_mode = #tpu.pipeline_mode<synchronous>, transform_indices = @transform_5, window_bounds = array<i64: 4, 1, 32>}, {pipeline_mode = #tpu.pipeline_mode<synchronous>, transform_indices = @transform_6, window_bounds = array<i64: 4, 128, 32>}, {pipeline_mode = #tpu.pipeline_mode<synchronous>, transform_indices = @transform_7, window_bounds = array<i64: 4, 1, 32>}, {pipeline_mode = #tpu.pipeline_mode<synchronous>, transform_indices = @transform_8, window_bounds = array<i64: 4, 128, 32>}, {pipeline_mode = #tpu.pipeline_mode<synchronous>, transform_indices = @transform_9, window_bounds = array<i64: 4, 1, 32>}, {pipeline_mode = #tpu.pipeline_mode<synchronous>, transform_indices = @transform_10, window_bounds = array<i64: 4, 32, 128>}, {pipeline_mode = #tpu.pipeline_mode<synchronous>, transform_indices = @transform_11, window_bounds = array<i64: 1, 128>}, {pipeline_mode = #tpu.pipeline_mode<synchronous>, transform_indices = @transform_12, window_bounds = array<i64: 1, 128>}, {pipeline_mode = #tpu.pipeline_mode<synchronous>, transform_indices = @transform_13, window_bounds = array<i64: 1, 128>}, {pipeline_mode = #tpu.pipeline_mode<synchronous>, transform_indices = @transform_14, window_bounds = array<i64: 2, 128, 128>}, {pipeline_mode = #tpu.pipeline_mode<synchronous>, transform_indices = @transform_15, window_bounds = array<i64: 2, 1, 128>}, {pipeline_mode = #tpu.pipeline_mode<synchronous>, transform_indices = @transform_16, window_bounds = array<i64: 2, 128, 128>}, {pipeline_mode = #tpu.pipeline_mode<synchronous>, transform_indices = @transform_17, window_bounds = array<i64: 1, 128>}, {transform_indices = @transform_18, window_bounds = array<i64: 1, 8, 128>}]} {
    %c0 = arith.constant 0 : index
    %c0_0 = arith.constant 0 : index
    %0 = vector.load %arg4[%c0, %c0_0] : memref<1x128xf32, #tpu.memory_space<vmem>>, vector<1x128xf32>
    %c0_1 = arith.constant 0 : index
    %c0_2 = arith.constant 0 : index
    %1 = vector.load %arg5[%c0_1, %c0_2] : memref<1x128xf32, #tpu.memory_space<vmem>>, vector<1x128xf32>
    %c0_i32 = arith.constant 0 : i32
    %2 = arith.cmpi eq, %arg1, %c0_i32 : i32
    %3 = arith.extui %2 : i1 to i32
    %c0_i32_3 = arith.constant 0 : i32
    %4 = arith.cmpi ne, %3, %c0_i32_3 : i32
    scf.if %4 {
      %c0_47 = arith.constant 0 : index
      %c0_48 = arith.constant 0 : index
      %c0_49 = arith.constant 0 : index
      %83 = vector.load %arg2[%c0_47, %c0_48, %c0_49] : memref<1x16x128xf32, #tpu.memory_space<vmem>>, vector<1x16x128xf32>
      %84 = vector.shape_cast %83 : vector<1x16x128xf32> to vector<16x128xf32>
      %cst_50 = arith.constant dense<0.000000e+00> : vector<16xf32>
      %85 = vector.multi_reduction <add>, %84, %cst_50 [1] : vector<16x128xf32> to vector<16xf32>
      %86 = vector.shape_cast %85 : vector<16xf32> to vector<16x1xf32>
      %cst_51 = arith.constant 1.280000e+02 : f32
      %87 = vector.broadcast %cst_51 : f32 to vector<16x1xf32>
      %88 = arith.divf %86, %87 : vector<16x1xf32>
      %89 = vector.broadcast %88 : vector<16x1xf32> to vector<16x128xf32>
      %90 = arith.subf %84, %89 : vector<16x128xf32>
      %91 = arith.mulf %90, %90 : vector<16x128xf32>
      %cst_52 = arith.constant dense<0.000000e+00> : vector<16xf32>
      %92 = vector.multi_reduction <add>, %91, %cst_52 [1] : vector<16x128xf32> to vector<16xf32>
      %93 = vector.shape_cast %92 : vector<16xf32> to vector<16x1xf32>
      %cst_53 = arith.constant 0.00787401571 : f32
      %94 = vector.broadcast %cst_53 : f32 to vector<16x1xf32>
      %95 = arith.mulf %93, %94 : vector<16x1xf32>
      %96 = math.sqrt %95 : vector<16x1xf32>
      %cst_54 = arith.constant 9.99999997E-7 : f32
      %97 = vector.broadcast %cst_54 : f32 to vector<16x1xf32>
      %98 = arith.addf %96, %97 : vector<16x1xf32>
      %99 = tpu.reciprocal %98 : vector<16x1xf32> -> vector<16x1xf32>
      %100 = vector.broadcast %88 : vector<16x1xf32> to vector<16x128xf32>
      %101 = arith.subf %84, %100 : vector<16x128xf32>
      %102 = vector.broadcast %0 : vector<1x128xf32> to vector<16x128xf32>
      %103 = arith.mulf %102, %101 : vector<16x128xf32>
      %104 = vector.broadcast %99 : vector<16x1xf32> to vector<16x128xf32>
      %105 = arith.mulf %103, %104 : vector<16x128xf32>
      %106 = vector.broadcast %1 : vector<1x128xf32> to vector<16x128xf32>
      %107 = arith.addf %105, %106 : vector<16x128xf32>
      %c0_i32_55 = arith.constant 0 : i32
      %c4_i32_56 = arith.constant 4 : i32
      %108 = arith.addi %c0_i32_55, %c4_i32_56 : i32
      %c1_i32_57 = arith.constant 1 : i32
      scf.for %arg24 = %c0_i32_55 to %108 step %c1_i32_57  : i32 {
        %109 = arith.index_cast %arg24 : i32 to index
        %c0_59 = arith.constant 0 : index
        %c0_60 = arith.constant 0 : index
        %110 = vector.load %arg8[%109, %c0_59, %c0_60] : memref<4x128x32xf32, #tpu.memory_space<vmem>>, vector<1x128x32xf32>
        %111 = vector.shape_cast %110 : vector<1x128x32xf32> to vector<128x32xf32>
        %cst_61 = arith.constant dense<0.000000e+00> : vector<16x32xf32>
        %112 = tpu.matmul %107, %111, %cst_61 {dimension_numbers = #tpu.dot_dimension_numbers<[1], [0], [0], [1], [0, 0, 1, 1], [], []>} : vector<16x128xf32>, vector<128x32xf32>, vector<16x32xf32> -> vector<16x32xf32>
        %113 = arith.index_cast %arg24 : i32 to index
        %c0_62 = arith.constant 0 : index
        %c0_63 = arith.constant 0 : index
        %114 = vector.load %arg9[%113, %c0_62, %c0_63] : memref<4x1x32xf32, #tpu.memory_space<vmem>>, vector<1x1x32xf32>
        %115 = vector.shape_cast %114 : vector<1x1x32xf32> to vector<1x32xf32>
        %116 = vector.broadcast %115 : vector<1x32xf32> to vector<16x32xf32>
        %117 = arith.addf %112, %116 : vector<16x32xf32>
        %118 = arith.index_cast %arg24 : i32 to index
        %c0_64 = arith.constant 0 : index
        %c0_65 = arith.constant 0 : index
        %119 = vector.load %arg21[%118, %c0_64, %c0_65] : memref<4x16x32xf32, #tpu.memory_space<vmem>>, vector<1x16x32xf32>
        %120 = vector.shape_cast %119 : vector<1x16x32xf32> to vector<16x32xf32>
        %121 = vector.shape_cast %117 : vector<16x32xf32> to vector<1x16x32xf32>
        tpu.vector_store %arg21[%118, %c0_64, %c0_65], %121 {strides = array<i32>} : memref<4x16x32xf32, #tpu.memory_space<vmem>>, vector<1x16x32xf32>,
        %122 = arith.index_cast %arg24 : i32 to index
        %c0_66 = arith.constant 0 : index
        %c0_67 = arith.constant 0 : index
        %123 = vector.load %arg10[%122, %c0_66, %c0_67] : memref<4x128x32xf32, #tpu.memory_space<vmem>>, vector<1x128x32xf32>
        %124 = vector.shape_cast %123 : vector<1x128x32xf32> to vector<128x32xf32>
        %cst_68 = arith.constant dense<0.000000e+00> : vector<16x32xf32>
        %125 = tpu.matmul %107, %124, %cst_68 {dimension_numbers = #tpu.dot_dimension_numbers<[1], [0], [0], [1], [0, 0, 1, 1], [], []>} : vector<16x128xf32>, vector<128x32xf32>, vector<16x32xf32> -> vector<16x32xf32>
        %126 = arith.index_cast %arg24 : i32 to index
        %c0_69 = arith.constant 0 : index
        %c0_70 = arith.constant 0 : index
        %127 = vector.load %arg11[%126, %c0_69, %c0_70] : memref<4x1x32xf32, #tpu.memory_space<vmem>>, vector<1x1x32xf32>
        %128 = vector.shape_cast %127 : vector<1x1x32xf32> to vector<1x32xf32>
        %129 = vector.broadcast %128 : vector<1x32xf32> to vector<16x32xf32>
        %130 = arith.addf %125, %129 : vector<16x32xf32>
        %131 = arith.index_cast %arg24 : i32 to index
        %c0_71 = arith.constant 0 : index
        %c0_72 = arith.constant 0 : index
        %132 = vector.load %arg22[%131, %c0_71, %c0_72] : memref<4x16x32xf32, #tpu.memory_space<vmem>>, vector<1x16x32xf32>
        %133 = vector.shape_cast %132 : vector<1x16x32xf32> to vector<16x32xf32>
        %134 = vector.shape_cast %130 : vector<16x32xf32> to vector<1x16x32xf32>
        tpu.vector_store %arg22[%131, %c0_71, %c0_72], %134 {strides = array<i32>} : memref<4x16x32xf32, #tpu.memory_space<vmem>>, vector<1x16x32xf32>,
      }
      %c4_i32_58 = arith.constant 4 : i32
    } else {
    }
    %c8_i32 = arith.constant 8 : i32
    %5 = arith.muli %arg1, %c8_i32 : i32
    %6 = tpu.assume_multiple %5, 8 : i32
    %c0_4 = arith.constant 0 : index
    %7 = arith.index_cast %6 : i32 to index
    %c0_5 = arith.constant 0 : index
    %8 = vector.load %arg2[%c0_4, %7, %c0_5] : memref<1x16x128xf32, #tpu.memory_space<vmem>>, vector<1x8x128xf32>
    %9 = vector.shape_cast %8 : vector<1x8x128xf32> to vector<8x128xf32>
    %cst = arith.constant dense<0.000000e+00> : vector<8xf32>
    %10 = vector.multi_reduction <add>, %9, %cst [1] : vector<8x128xf32> to vector<8xf32>
    %11 = vector.shape_cast %10 : vector<8xf32> to vector<8x1xf32>
    %cst_6 = arith.constant 1.280000e+02 : f32
    %12 = vector.broadcast %cst_6 : f32 to vector<8x1xf32>
    %13 = arith.divf %11, %12 : vector<8x1xf32>
    %14 = vector.broadcast %13 : vector<8x1xf32> to vector<8x128xf32>
    %15 = arith.subf %9, %14 : vector<8x128xf32>
    %16 = arith.mulf %15, %15 : vector<8x128xf32>
    %cst_7 = arith.constant dense<0.000000e+00> : vector<8xf32>
    %17 = vector.multi_reduction <add>, %16, %cst_7 [1] : vector<8x128xf32> to vector<8xf32>
    %18 = vector.shape_cast %17 : vector<8xf32> to vector<8x1xf32>
    %cst_8 = arith.constant 0.00787401571 : f32
    %19 = vector.broadcast %cst_8 : f32 to vector<8x1xf32>
    %20 = arith.mulf %18, %19 : vector<8x1xf32>
    %21 = math.sqrt %20 : vector<8x1xf32>
    %cst_9 = arith.constant 9.99999997E-7 : f32
    %22 = vector.broadcast %cst_9 : f32 to vector<8x1xf32>
    %23 = arith.addf %21, %22 : vector<8x1xf32>
    %24 = tpu.reciprocal %23 : vector<8x1xf32> -> vector<8x1xf32>
    %25 = vector.broadcast %13 : vector<8x1xf32> to vector<8x128xf32>
    %26 = arith.subf %9, %25 : vector<8x128xf32>
    %27 = vector.broadcast %0 : vector<1x128xf32> to vector<8x128xf32>
    %28 = arith.mulf %27, %26 : vector<8x128xf32>
    %29 = vector.broadcast %24 : vector<8x1xf32> to vector<8x128xf32>
    %30 = arith.mulf %28, %29 : vector<8x128xf32>
    %31 = vector.broadcast %1 : vector<1x128xf32> to vector<8x128xf32>
    %32 = arith.addf %30, %31 : vector<8x128xf32>
    %c0_10 = arith.constant 0 : index
    %c0_11 = arith.constant 0 : index
    %c0_12 = arith.constant 0 : index
    %33 = vector.load %arg3[%c0_10, %c0_11, %c0_12] : memref<1x1x16xf32, #tpu.memory_space<vmem>>, vector<1x1x16xf32>
    %34 = vector.shape_cast %33 : vector<1x1x16xf32> to vector<1x16xf32>
    %cst_13 = arith.constant 0.000000e+00 : f32
    %35 = vector.broadcast %cst_13 : f32 to vector<1x16xf32>
    %36 = arith.cmpf oeq, %34, %35 : vector<1x16xf32>
    %37 = vector.shape_cast %36 : vector<1x16xi1> to vector<1x16xi1>
    %38 = vector.broadcast %37 : vector<1x16xi1> to vector<8x16xi1>
    %cst_14 = arith.constant 0.000000e+00 : f32
    %39 = vector.broadcast %cst_14 : f32 to vector<8x128xf32>
    %c0_15 = arith.constant 0 : index
    %c0_16 = arith.constant 0 : index
    %40 = vector.load %arg23[%c0_15, %c0_16] : memref<8x128xf32, #tpu.memory_space<vmem>>, vector<8x128xf32>
    tpu.vector_store %arg23[%c0_15, %c0_16], %39 {strides = array<i32>} : memref<8x128xf32, #tpu.memory_space<vmem>>, vector<8x128xf32>,
    %cst_17 = arith.constant 0.176776692 : f32
    %cst_18 = arith.constant -1.000000e+09 : f32
    %c0_i32_19 = arith.constant 0 : i32
    %c4_i32 = arith.constant 4 : i32
    %41 = arith.addi %c0_i32_19, %c4_i32 : i32
    %c1_i32 = arith.constant 1 : i32
    scf.for %arg24 = %c0_i32_19 to %41 step %c1_i32  : i32 {
      %83 = arith.index_cast %arg24 : i32 to index
      %c0_47 = arith.constant 0 : index
      %c0_48 = arith.constant 0 : index
      %84 = vector.load %arg6[%83, %c0_47, %c0_48] : memref<4x128x32xf32, #tpu.memory_space<vmem>>, vector<1x128x32xf32>
      %85 = vector.shape_cast %84 : vector<1x128x32xf32> to vector<128x32xf32>
      %cst_49 = arith.constant dense<0.000000e+00> : vector<8x32xf32>
      %86 = tpu.matmul %32, %85, %cst_49 {dimension_numbers = #tpu.dot_dimension_numbers<[1], [0], [0], [1], [0, 0, 1, 1], [], []>} : vector<8x128xf32>, vector<128x32xf32>, vector<8x32xf32> -> vector<8x32xf32>
      %87 = arith.index_cast %arg24 : i32 to index
      %c0_50 = arith.constant 0 : index
      %c0_51 = arith.constant 0 : index
      %88 = vector.load %arg7[%87, %c0_50, %c0_51] : memref<4x1x32xf32, #tpu.memory_space<vmem>>, vector<1x1x32xf32>
      %89 = vector.shape_cast %88 : vector<1x1x32xf32> to vector<1x32xf32>
      %90 = vector.broadcast %89 : vector<1x32xf32> to vector<8x32xf32>
      %91 = arith.addf %86, %90 : vector<8x32xf32>
      %92 = arith.index_cast %arg24 : i32 to index
      %c0_52 = arith.constant 0 : index
      %c0_53 = arith.constant 0 : index
      %93 = vector.load %arg21[%92, %c0_52, %c0_53] : memref<4x16x32xf32, #tpu.memory_space<vmem>>, vector<1x16x32xf32>
      %94 = vector.shape_cast %93 : vector<1x16x32xf32> to vector<16x32xf32>
      %cst_54 = arith.constant dense<0.000000e+00> : vector<8x16xf32>
      %95 = tpu.matmul %91, %94, %cst_54 {dimension_numbers = #tpu.dot_dimension_numbers<[1], [1], [0], [0], [0, 0, 1, 0], [], []>} : vector<8x32xf32>, vector<16x32xf32>, vector<8x16xf32> -> vector<8x16xf32>
      %96 = vector.broadcast %cst_17 : f32 to vector<8x16xf32>
      %97 = arith.mulf %95, %96 : vector<8x16xf32>
      %98 = vector.broadcast %cst_18 : f32 to vector<8x16xf32>
      %99 = arith.select %38, %98, %97 : vector<8x16xi1>, vector<8x16xf32>
      %cst_55 = arith.constant dense<0xFF800000> : vector<8xf32>
      %100 = vector.multi_reduction <maximumf>, %99, %cst_55 [1] : vector<8x16xf32> to vector<8xf32>
      %101 = vector.shape_cast %100 : vector<8xf32> to vector<8x1xf32>
      %102 = vector.broadcast %101 : vector<8x1xf32> to vector<8x16xf32>
      %103 = arith.subf %99, %102 : vector<8x16xf32>
      %104 = math.exp %103 : vector<8x16xf32>
      %cst_56 = arith.constant dense<0.000000e+00> : vector<8xf32>
      %105 = vector.multi_reduction <add>, %104, %cst_56 [1] : vector<8x16xf32> to vector<8xf32>
      %106 = vector.shape_cast %105 : vector<8xf32> to vector<8x1xf32>
      %107 = tpu.reciprocal %106 : vector<8x1xf32> -> vector<8x1xf32>
      %108 = vector.broadcast %107 : vector<8x1xf32> to vector<8x16xf32>
      %109 = arith.mulf %104, %108 : vector<8x16xf32>
      %110 = arith.index_cast %arg24 : i32 to index
      %c0_57 = arith.constant 0 : index
      %c0_58 = arith.constant 0 : index
      %111 = vector.load %arg22[%110, %c0_57, %c0_58] : memref<4x16x32xf32, #tpu.memory_space<vmem>>, vector<1x16x32xf32>
      %112 = vector.shape_cast %111 : vector<1x16x32xf32> to vector<16x32xf32>
      %cst_59 = arith.constant dense<0.000000e+00> : vector<8x32xf32>
      %113 = tpu.matmul %109, %112, %cst_59 {dimension_numbers = #tpu.dot_dimension_numbers<[1], [0], [0], [1], [0, 0, 1, 1], [], []>} : vector<8x16xf32>, vector<16x32xf32>, vector<8x32xf32> -> vector<8x32xf32>
      %c0_60 = arith.constant 0 : index
      %c0_61 = arith.constant 0 : index
      %114 = vector.load %arg23[%c0_60, %c0_61] : memref<8x128xf32, #tpu.memory_space<vmem>>, vector<8x128xf32>
      %115 = arith.index_cast %arg24 : i32 to index
      %c0_62 = arith.constant 0 : index
      %c0_63 = arith.constant 0 : index
      %116 = vector.load %arg12[%115, %c0_62, %c0_63] : memref<4x32x128xf32, #tpu.memory_space<vmem>>, vector<1x32x128xf32>
      %117 = vector.shape_cast %116 : vector<1x32x128xf32> to vector<32x128xf32>
      %cst_64 = arith.constant dense<0.000000e+00> : vector<8x128xf32>
      %118 = tpu.matmul %113, %117, %cst_64 {dimension_numbers = #tpu.dot_dimension_numbers<[1], [0], [0], [1], [0, 0, 1, 1], [], []>} : vector<8x32xf32>, vector<32x128xf32>, vector<8x128xf32> -> vector<8x128xf32>
      %119 = arith.addf %114, %118 : vector<8x128xf32>
      %c0_65 = arith.constant 0 : index
      %c0_66 = arith.constant 0 : index
      %120 = vector.load %arg23[%c0_65, %c0_66] : memref<8x128xf32, #tpu.memory_space<vmem>>, vector<8x128xf32>
      tpu.vector_store %arg23[%c0_65, %c0_66], %119 {strides = array<i32>} : memref<8x128xf32, #tpu.memory_space<vmem>>, vector<8x128xf32>,
    }
    %c4_i32_20 = arith.constant 4 : i32
    %c0_21 = arith.constant 0 : index
    %c0_22 = arith.constant 0 : index
    %42 = vector.load %arg23[%c0_21, %c0_22] : memref<8x128xf32, #tpu.memory_space<vmem>>, vector<8x128xf32>
    %43 = arith.addf %9, %42 : vector<8x128xf32>
    %c0_23 = arith.constant 0 : index
    %c0_24 = arith.constant 0 : index
    %44 = vector.load %arg13[%c0_23, %c0_24] : memref<1x128xf32, #tpu.memory_space<vmem>>, vector<1x128xf32>
    %45 = vector.broadcast %44 : vector<1x128xf32> to vector<8x128xf32>
    %46 = arith.addf %43, %45 : vector<8x128xf32>
    %c0_25 = arith.constant 0 : index
    %c0_26 = arith.constant 0 : index
    %47 = vector.load %arg14[%c0_25, %c0_26] : memref<1x128xf32, #tpu.memory_space<vmem>>, vector<1x128xf32>
    %c0_27 = arith.constant 0 : index
    %c0_28 = arith.constant 0 : index
    %48 = vector.load %arg15[%c0_27, %c0_28] : memref<1x128xf32, #tpu.memory_space<vmem>>, vector<1x128xf32>
    %cst_29 = arith.constant dense<0.000000e+00> : vector<8xf32>
    %49 = vector.multi_reduction <add>, %46, %cst_29 [1] : vector<8x128xf32> to vector<8xf32>
    %50 = vector.shape_cast %49 : vector<8xf32> to vector<8x1xf32>
    %cst_30 = arith.constant 1.280000e+02 : f32
    %51 = vector.broadcast %cst_30 : f32 to vector<8x1xf32>
    %52 = arith.divf %50, %51 : vector<8x1xf32>
    %53 = vector.broadcast %52 : vector<8x1xf32> to vector<8x128xf32>
    %54 = arith.subf %46, %53 : vector<8x128xf32>
    %55 = arith.mulf %54, %54 : vector<8x128xf32>
    %cst_31 = arith.constant dense<0.000000e+00> : vector<8xf32>
    %56 = vector.multi_reduction <add>, %55, %cst_31 [1] : vector<8x128xf32> to vector<8xf32>
    %57 = vector.shape_cast %56 : vector<8xf32> to vector<8x1xf32>
    %cst_32 = arith.constant 0.00787401571 : f32
    %58 = vector.broadcast %cst_32 : f32 to vector<8x1xf32>
    %59 = arith.mulf %57, %58 : vector<8x1xf32>
    %60 = math.sqrt %59 : vector<8x1xf32>
    %cst_33 = arith.constant 9.99999997E-7 : f32
    %61 = vector.broadcast %cst_33 : f32 to vector<8x1xf32>
    %62 = arith.addf %60, %61 : vector<8x1xf32>
    %63 = tpu.reciprocal %62 : vector<8x1xf32> -> vector<8x1xf32>
    %64 = vector.broadcast %52 : vector<8x1xf32> to vector<8x128xf32>
    %65 = arith.subf %46, %64 : vector<8x128xf32>
    %66 = vector.broadcast %47 : vector<1x128xf32> to vector<8x128xf32>
    %67 = arith.mulf %66, %65 : vector<8x128xf32>
    %68 = vector.broadcast %63 : vector<8x1xf32> to vector<8x128xf32>
    %69 = arith.mulf %67, %68 : vector<8x128xf32>
    %70 = vector.broadcast %48 : vector<1x128xf32> to vector<8x128xf32>
    %71 = arith.addf %69, %70 : vector<8x128xf32>
    %cst_34 = arith.constant 0.000000e+00 : f32
    %72 = vector.broadcast %cst_34 : f32 to vector<8x128xf32>
    %c0_35 = arith.constant 0 : index
    %c0_36 = arith.constant 0 : index
    %73 = vector.load %arg23[%c0_35, %c0_36] : memref<8x128xf32, #tpu.memory_space<vmem>>, vector<8x128xf32>
    tpu.vector_store %arg23[%c0_35, %c0_36], %72 {strides = array<i32>} : memref<8x128xf32, #tpu.memory_space<vmem>>, vector<8x128xf32>,
    %c0_i32_37 = arith.constant 0 : i32
    %c2_i32 = arith.constant 2 : i32
    %74 = arith.addi %c0_i32_37, %c2_i32 : i32
    %c1_i32_38 = arith.constant 1 : i32
    scf.for %arg24 = %c0_i32_37 to %74 step %c1_i32_38  : i32 {
      %83 = arith.index_cast %arg24 : i32 to index
      %c0_47 = arith.constant 0 : index
      %c0_48 = arith.constant 0 : index
      %84 = vector.load %arg16[%83, %c0_47, %c0_48] : memref<2x128x128xf32, #tpu.memory_space<vmem>>, vector<1x128x128xf32>
      %85 = vector.shape_cast %84 : vector<1x128x128xf32> to vector<128x128xf32>
      %cst_49 = arith.constant dense<0.000000e+00> : vector<8x128xf32>
      %86 = tpu.matmul %71, %85, %cst_49 {dimension_numbers = #tpu.dot_dimension_numbers<[1], [0], [0], [1], [0, 0, 1, 1], [], []>} : vector<8x128xf32>, vector<128x128xf32>, vector<8x128xf32> -> vector<8x128xf32>
      %87 = arith.index_cast %arg24 : i32 to index
      %c0_50 = arith.constant 0 : index
      %c0_51 = arith.constant 0 : index
      %88 = vector.load %arg17[%87, %c0_50, %c0_51] : memref<2x1x128xf32, #tpu.memory_space<vmem>>, vector<1x1x128xf32>
      %89 = vector.shape_cast %88 : vector<1x1x128xf32> to vector<1x128xf32>
      %90 = vector.broadcast %89 : vector<1x128xf32> to vector<8x128xf32>
      %91 = arith.addf %86, %90 : vector<8x128xf32>
      %cst_52 = arith.constant 0.000000e+00 : f32
      %92 = vector.broadcast %cst_52 : f32 to vector<8x128xf32>
      %93 = arith.maximumf %91, %92 : vector<8x128xf32>
      %c0_53 = arith.constant 0 : index
      %c0_54 = arith.constant 0 : index
      %94 = vector.load %arg23[%c0_53, %c0_54] : memref<8x128xf32, #tpu.memory_space<vmem>>, vector<8x128xf32>
      %95 = arith.index_cast %arg24 : i32 to index
      %c0_55 = arith.constant 0 : index
      %c0_56 = arith.constant 0 : index
      %96 = vector.load %arg18[%95, %c0_55, %c0_56] : memref<2x128x128xf32, #tpu.memory_space<vmem>>, vector<1x128x128xf32>
      %97 = vector.shape_cast %96 : vector<1x128x128xf32> to vector<128x128xf32>
      %cst_57 = arith.constant dense<0.000000e+00> : vector<8x128xf32>
      %98 = tpu.matmul %93, %97, %cst_57 {dimension_numbers = #tpu.dot_dimension_numbers<[1], [0], [0], [1], [0, 0, 1, 1], [], []>} : vector<8x128xf32>, vector<128x128xf32>, vector<8x128xf32> -> vector<8x128xf32>
      %99 = arith.addf %94, %98 : vector<8x128xf32>
      %c0_58 = arith.constant 0 : index
      %c0_59 = arith.constant 0 : index
      %100 = vector.load %arg23[%c0_58, %c0_59] : memref<8x128xf32, #tpu.memory_space<vmem>>, vector<8x128xf32>
      tpu.vector_store %arg23[%c0_58, %c0_59], %99 {strides = array<i32>} : memref<8x128xf32, #tpu.memory_space<vmem>>, vector<8x128xf32>,
    }
    %c2_i32_39 = arith.constant 2 : i32
    %c0_40 = arith.constant 0 : index
    %c0_41 = arith.constant 0 : index
    %75 = vector.load %arg23[%c0_40, %c0_41] : memref<8x128xf32, #tpu.memory_space<vmem>>, vector<8x128xf32>
    %76 = arith.addf %46, %75 : vector<8x128xf32>
    %c0_42 = arith.constant 0 : index
    %c0_43 = arith.constant 0 : index
    %77 = vector.load %arg19[%c0_42, %c0_43] : memref<1x128xf32, #tpu.memory_space<vmem>>, vector<1x128xf32>
    %78 = vector.broadcast %77 : vector<1x128xf32> to vector<8x128xf32>
    %79 = arith.addf %76, %78 : vector<8x128xf32>
    %c0_44 = arith.constant 0 : index
    %c0_45 = arith.constant 0 : index
    %c0_46 = arith.constant 0 : index
    %80 = vector.load %arg20[%c0_44, %c0_45, %c0_46] : memref<1x8x128xf32, #tpu.memory_space<vmem>>, vector<1x8x128xf32>
    %81 = vector.shape_cast %80 : vector<1x8x128xf32> to vector<8x128xf32>
    %82 = vector.shape_cast %79 : vector<8x128xf32> to vector<1x8x128xf32>
    tpu.vector_store %arg20[%c0_44, %c0_45, %c0_46], %82 {strides = array<i32>} : memref<1x8x128xf32, #tpu.memory_space<vmem>>, vector<1x8x128xf32>,
    return
  }
  func.func @transform_0(%arg0: i32, %arg1: i32) -> (i32, i32, i32) {
    %c0_i32 = arith.constant 0 : i32
    %c0_i32_0 = arith.constant 0 : i32
    %c0_i32_1 = arith.constant 0 : i32
    return %arg0, %c0_i32, %c0_i32_0 : i32, i32, i32
  }
  func.func @transform_1(%arg0: i32, %arg1: i32) -> (i32, i32, i32) {
    %c0_i32 = arith.constant 0 : i32
    %c0_i32_0 = arith.constant 0 : i32
    %c0_i32_1 = arith.constant 0 : i32
    return %arg0, %c0_i32, %c0_i32_0 : i32, i32, i32
  }
  func.func @transform_2(%arg0: i32, %arg1: i32) -> (i32, i32) {
    %c0_i32 = arith.constant 0 : i32
    %c0_i32_0 = arith.constant 0 : i32
    %c0_i32_1 = arith.constant 0 : i32
    return %c0_i32, %c0_i32_0 : i32, i32
  }
  func.func @transform_3(%arg0: i32, %arg1: i32) -> (i32, i32) {
    %c0_i32 = arith.constant 0 : i32
    %c0_i32_0 = arith.constant 0 : i32
    %c0_i32_1 = arith.constant 0 : i32
    return %c0_i32, %c0_i32_0 : i32, i32
  }
  func.func @transform_4(%arg0: i32, %arg1: i32) -> (i32, i32, i32) {
    %c0_i32 = arith.constant 0 : i32
    %c0_i32_0 = arith.constant 0 : i32
    %c0_i32_1 = arith.constant 0 : i32
    %c0_i32_2 = arith.constant 0 : i32
    return %c0_i32, %c0_i32_0, %c0_i32_1 : i32, i32, i32
  }
  func.func @transform_5(%arg0: i32, %arg1: i32) -> (i32, i32, i32) {
    %c0_i32 = arith.constant 0 : i32
    %c0_i32_0 = arith.constant 0 : i32
    %c0_i32_1 = arith.constant 0 : i32
    %c0_i32_2 = arith.constant 0 : i32
    return %c0_i32, %c0_i32_0, %c0_i32_1 : i32, i32, i32
  }
  func.func @transform_6(%arg0: i32, %arg1: i32) -> (i32, i32, i32) {
    %c0_i32 = arith.constant 0 : i32
    %c0_i32_0 = arith.constant 0 : i32
    %c0_i32_1 = arith.constant 0 : i32
    %c0_i32_2 = arith.constant 0 : i32
    return %c0_i32, %c0_i32_0, %c0_i32_1 : i32, i32, i32
  }
  func.func @transform_7(%arg0: i32, %arg1: i32) -> (i32, i32, i32) {
    %c0_i32 = arith.constant 0 : i32
    %c0_i32_0 = arith.constant 0 : i32
    %c0_i32_1 = arith.constant 0 : i32
    %c0_i32_2 = arith.constant 0 : i32
    return %c0_i32, %c0_i32_0, %c0_i32_1 : i32, i32, i32
  }
  func.func @transform_8(%arg0: i32, %arg1: i32) -> (i32, i32, i32) {
    %c0_i32 = arith.constant 0 : i32
    %c0_i32_0 = arith.constant 0 : i32
    %c0_i32_1 = arith.constant 0 : i32
    %c0_i32_2 = arith.constant 0 : i32
    return %c0_i32, %c0_i32_0, %c0_i32_1 : i32, i32, i32
  }
  func.func @transform_9(%arg0: i32, %arg1: i32) -> (i32, i32, i32) {
    %c0_i32 = arith.constant 0 : i32
    %c0_i32_0 = arith.constant 0 : i32
    %c0_i32_1 = arith.constant 0 : i32
    %c0_i32_2 = arith.constant 0 : i32
    return %c0_i32, %c0_i32_0, %c0_i32_1 : i32, i32, i32
  }
  func.func @transform_10(%arg0: i32, %arg1: i32) -> (i32, i32, i32) {
    %c0_i32 = arith.constant 0 : i32
    %c0_i32_0 = arith.constant 0 : i32
    %c0_i32_1 = arith.constant 0 : i32
    %c0_i32_2 = arith.constant 0 : i32
    return %c0_i32, %c0_i32_0, %c0_i32_1 : i32, i32, i32
  }
  func.func @transform_11(%arg0: i32, %arg1: i32) -> (i32, i32) {
    %c0_i32 = arith.constant 0 : i32
    %c0_i32_0 = arith.constant 0 : i32
    %c0_i32_1 = arith.constant 0 : i32
    return %c0_i32, %c0_i32_0 : i32, i32
  }
  func.func @transform_12(%arg0: i32, %arg1: i32) -> (i32, i32) {
    %c0_i32 = arith.constant 0 : i32
    %c0_i32_0 = arith.constant 0 : i32
    %c0_i32_1 = arith.constant 0 : i32
    return %c0_i32, %c0_i32_0 : i32, i32
  }
  func.func @transform_13(%arg0: i32, %arg1: i32) -> (i32, i32) {
    %c0_i32 = arith.constant 0 : i32
    %c0_i32_0 = arith.constant 0 : i32
    %c0_i32_1 = arith.constant 0 : i32
    return %c0_i32, %c0_i32_0 : i32, i32
  }
  func.func @transform_14(%arg0: i32, %arg1: i32) -> (i32, i32, i32) {
    %c0_i32 = arith.constant 0 : i32
    %c0_i32_0 = arith.constant 0 : i32
    %c0_i32_1 = arith.constant 0 : i32
    %c0_i32_2 = arith.constant 0 : i32
    return %c0_i32, %c0_i32_0, %c0_i32_1 : i32, i32, i32
  }
  func.func @transform_15(%arg0: i32, %arg1: i32) -> (i32, i32, i32) {
    %c0_i32 = arith.constant 0 : i32
    %c0_i32_0 = arith.constant 0 : i32
    %c0_i32_1 = arith.constant 0 : i32
    %c0_i32_2 = arith.constant 0 : i32
    return %c0_i32, %c0_i32_0, %c0_i32_1 : i32, i32, i32
  }
  func.func @transform_16(%arg0: i32, %arg1: i32) -> (i32, i32, i32) {
    %c0_i32 = arith.constant 0 : i32
    %c0_i32_0 = arith.constant 0 : i32
    %c0_i32_1 = arith.constant 0 : i32
    %c0_i32_2 = arith.constant 0 : i32
    return %c0_i32, %c0_i32_0, %c0_i32_1 : i32, i32, i32
  }
  func.func @transform_17(%arg0: i32, %arg1: i32) -> (i32, i32) {
    %c0_i32 = arith.constant 0 : i32
    %c0_i32_0 = arith.constant 0 : i32
    %c0_i32_1 = arith.constant 0 : i32
    return %c0_i32, %c0_i32_0 : i32, i32
  }
  func.func @transform_18(%arg0: i32, %arg1: i32) -> (i32, i32, i32) {
    %c0_i32 = arith.constant 0 : i32
    %c0_i32_0 = arith.constant 0 : i32
    return %arg0, %arg1, %c0_i32 : i32, i32, i32
  }
}

</mosaic_0001>

<bundles_post_ra>
// kernel: tpu_custom_call.1
= control target key start
LH: loop header
LB: loop body
LE: loop exit
PB: predicated region body
PF: predicated region fallthrough
CT: control target
= control target key end

     0   :  { %s2130_s0 = inlined_call_operand.vmem [shape: f32[2,16,128], index: 0, kind: input, shape index: {}]   ;;  %s2131_s1 = inlined_call_operand.vmem [shape: f32[2,1,16], index: 1, kind: input, shape index: {}]   ;;  %s2132_s2 = inlined_call_operand.vmem [shape: f32[1,128], index: 2, kind: input, shape index: {}]   ;;  %s2133_s3 = inlined_call_operand.vmem [shape: f32[1,128], index: 3, kind: input, shape index: {}]   ;;  %s2134_s4 = inlined_call_operand.vmem [shape: f32[4,128,32], index: 4, kind: input, shape index: {}]   ;;  %s2135_s5 = inlined_call_operand.vmem [shape: f32[4,1,32], index: 5, kind: input, shape index: {}]   ;;  %s2136_s6 = inlined_call_operand.vmem [shape: f32[4,128,32], index: 6, kind: input, shape index: {}]   ;;  %s2137_s7 = inlined_call_operand.vmem [shape: f32[4,1,32], index: 7, kind: input, shape index: {}]   ;;  %s2138_s8 = inlined_call_operand.vmem [shape: f32[4,128,32], index: 8, kind: input, shape index: {}]   ;;  %s2139_s9 = inlined_call_operand.vmem [shape: f32[4,1,32], index: 9, kind: input, shape index: {}]   ;;  %s2140_s10 = inlined_call_operand.vmem [shape: f32[4,32,128], index: 10, kind: input, shape index: {}]   ;;  %s2141_s11 = inlined_call_operand.vmem [shape: f32[1,128], index: 11, kind: input, shape index: {}]   ;;  %s2142_s12 = inlined_call_operand.vmem [shape: f32[1,128], index: 12, kind: input, shape index: {}]   ;;  %s2143_s13 = inlined_call_operand.vmem [shape: f32[1,128], index: 13, kind: input, shape index: {}]   ;;  %s2144_s14 = inlined_call_operand.vmem [shape: f32[2,128,128], index: 14, kind: input, shape index: {}]   ;;  %s2145_s15 = inlined_call_operand.vmem [shape: f32[2,1,128], index: 15, kind: input, shape index: {}]   ;;  %s2146_s16 = inlined_call_operand.vmem [shape: f32[2,128,128], index: 16, kind: input, shape index: {}]   ;;  %s2147_s17 = inlined_call_operand.vmem [shape: f32[1,128], index: 17, kind: input, shape index: {}]   ;;  %s2148_s18 = inlined_call_operand.hbm [shape: f32[2,16,128], index: 18, kind: output, shape index: {}]  }
   0x1   :  { %2162 = sst [smem:[#allocation18_spill]] %s2130_s0 }
   0x2   :  { %2163 = sst [smem:[#allocation19_spill]] %s2131_s1 }
   0x3   :  { %2164 = sst [smem:[#allocation20_spill]] %s2132_s2 }
   0x4   :  { %2165 = sst [smem:[#allocation21_spill]] %s2133_s3 }
   0x5   :  { %2166 = sst [smem:[#allocation22_spill]] %s2134_s4 }
   0x6   :  { %2167 = sst [smem:[#allocation23_spill]] %s2135_s5 }
   0x7   :  { %2168 = sst [smem:[#allocation24_spill]] %s2147_s17 }
   0x8   :  { %2169 = sst [smem:[#allocation25_spill]] %s2148_s18 }
   0x9   :  { %23 = vsyncpa [#allocation6], 0 }
   0xa   :  { %25 = vsyncpa [#allocation6 + $0x1], 0  ;;  %s1733_s27 = smov 0   ;;  %s1735_s28 = smov 0  }
   0xb   :  { %s1737_s29 = smov 0   ;;  %s1739_s30 = smov 0  }
   0xc   :  { %s1741_s0 = smov 0   ;;  %s1743_s19 = smov 0  }
   0xd   :  { %s1745_s1 = smov 0   ;;  %s1747_s20 = smov 0  }
   0xe LB: > { %2170 = sst [smem:[#allocation8_spill]] %s1592_s27  ;;  %s1324_s21 = sadd.s32 4294967295, %s1620_s20   ;;  %s1620_s20 = sphi %s1747_s20, %s31_s20   ;;  %s1616_s1 = sphi %s1745_s1, %s2206_s1   ;;  %s1612_s19 = sphi %s1743_s19, %s2205_s19   ;;  %s1608_s0 = sphi %s1741_s0, %s2204_s0   ;;  %s1604_s30 = sphi %s1739_s30, %s2203_s30   ;;  %s1600_s29 = sphi %s1737_s29, %s2202_s29   ;;  %s1596_s28 = sphi %s1735_s28, %s2208_s28   ;;  %s1592_s27 = sphi %s1733_s27, %s2207_s27  }
   0xf   : > { %2171 = sst [smem:[#allocation9_spill]] %s1600_s29  ;;  %s1325_s22 = sadd.s32 4294967294, %s1620_s20  }
  0x10   : > { %2172 = sst [smem:[#allocation10_spill]] %s1612_s19  ;;  %s40_s2 = sadd.s32 1, %s1612_s19 }
  0x11   : > { %2173 = sst [smem:[#allocation11_spill]] %s1616_s1  ;;  %p41_p0 = scmp.ge.s32.totalorder %s40_s2, 2 }
  0x12   : > { %2174 = sst [smem:[#allocation12_spill]] %s1620_s20  ;;  %s43_s23 = sadd.s32 1, %s1616_s1 }
  0x13   : > { %p450_p1 = scmp.ne.s32.totalorder %s1600_s29, %s1596_s28  ;;  %p451_p2 = scmp.eq.s32.totalorder %s1324_s21, 3 }
  0x14   : > { %s2210_s2 = smov (%p41_p0, %s40_s2), 0  ;;  %s2212_s23 = smov (!%p41_p0, %s43_s23), %s1616_s1 }
  0x15   : > { %2175 = sst [smem:[#allocation13_spill]] %s2210_s2  ;;  %s436_s24 = ssub.s32 %s1612_s19, %s2210_s2 }
  0x16   : > { %p1784_p3 = por %p451_p2, %p450_p1  ;;  %p45_p4 = scmp.ge.s32.totalorder %s2212_s23, 2 }
  0x17   : > { %p456_p5 = scmp.ne.s32.totalorder %s1596_s28, %s1592_s27  ;;  %p457_p6 = scmp.eq.s32.totalorder %s1325_s22, 3 }
  0x18   : > { %s2176_s25 = scalar_select %p1784_p3, 1, 0 }
  0x19   : > { %p1328_p7 = scmp.ge.s32.totalorder %s1620_s20, 1  ;;  %s2214_s23 = smov (%p45_p4, %s2212_s23), 0 }
  0x1a   : > { %2177 = sst [smem:[#allocation14_spill]] %s2176_s25  ;;  %p1793_p8 = por %p457_p6, %p456_p5 }
  0x1b   : > { %2178 = sst [smem:[#allocation15_spill]] %s2214_s23  ;;  %p537_p9 = scmp.lt.s32.totalorder %s1620_s20, 5 }
  0x1c   : > { %s2179_s26 = scalar_select %p1793_p8, 1, 0 }
  0x1d   : > { %s435_s21 = ssub.s32 %s1616_s1, %s2214_s23  ;;  %s440_s18 = sadd.s32 1, %s1600_s29 }
  0x1e   : > { %2180 = sst [smem:[#allocation16_spill]] %s2179_s26  ;;  %s437_s17 = sor.u32 %s436_s24, %s435_s21 }
  0x1f   : > { %p538_p10 = pnand %p1328_p7, %p537_p9  ;;  %p438_p11 = scmp.eq.s32.totalorder %s437_s17, 0 }
  0x20   : > { %s2161_s22 = sand.u32 (!%p538_p10), 1, %s1596_s28   ;;  %p594_p12 = scmp.lt.s32.totalorder (!%p538_p10), %s1608_s0, 1 }
  0x21   : > { %s1802_s2 = scalar_select %p438_p11, %s1600_s29, %s440_s18  }
  0x22   : > { %541 = sbr.rel (%p538_p10) target bundleno = 2221 (0x8ad), region = 92  ;;  %s2182_s25 = sld [smem:[#allocation20_spill]] (!%p538_p10) }
  0x23   : > { %2181 = sst [smem:[#allocation17_spill]] %s1802_s2  ;;  %s1818_s17 = sshll.u32 (!%p538_p10), %s2161_s22, 3 }
  0x24   : > { %s2183_s3 = sld [smem:[#allocation21_spill]] (!%p538_p10)  ;;  %p1332_p13 = scmp.ne.s32.totalorder (!%p538_p10), %s1604_s30, 0 }
  0x25   : > { %s2185_s29 = sld [smem:[#allocation18_spill]] (!%p538_p10) }
  0x27   : > { %s1821_s18 = scalar_select %p594_p12, %s1608_s0, 1 }
  0x28   : > { %v1809_v0 = vld [vmem:[%s2182_s25] sm:$0x1]  ;;  %607 = sbr.rel (%p1332_p13) target bundleno = 507 (0x1fb), region = 96 }
  0x29   : > { %s1350_s24 = sshll.u32 %s1821_s18, 4 }
  0x2a   : > { %v1814_v1 = vld [vmem:[%s2183_s3] sm:$0x1] }
  0x2b   : > { %s1831_s20 = scalar_lea.vmem %s2185_s29, %s1350_s24  ;;  %s1848_s29 = smov (!%p1332_p13), 0  }
  0x2d   : > { %v608_v2 = vld [vmem:[%s1831_s20] sm:$0xff]  ;;  %v609_v3 = vld [vmem:[%s1831_s20 + $0x8] sm:$0xff]  ;;  %v1634_v4 = vmov 128.0   ;;  %v688_v49 = vperm.slane %v1809_v0, 0  ;;  %v695_v56 = vperm.slane %v1814_v1, 0 }
  0x2e   : > { %610 = vadd.xlane.f32.xlu0 %v608_v2  ;;  %1482 = vrcp.f32 %v1634_v4 }
  0x34   : > { %v1483_v5 = vpop.eup %1482 }
  0x35   : > { %v615_v6 = vmul.f32 128.0, %v1483_v5  ;;  %vm619_vm0 = vweird.f32 %v1483_v5 }
  0x36   : > { %612 = vadd.xlane.f32.xlu0 %v609_v3 }
  0x37   : > { %v616_v7 = vsub.f32 1.0, %v615_v6 }
  0x39   : > { %v617_v8 = vmul.f32 %v1483_v5, %v616_v7 }
  0x3b   : > { %v618_v9 = vadd.f32 %v1483_v5, %v617_v8 }
  0x3d   : > { %v620_v10 = vsel %vm619_vm0, %v1483_v5, %v618_v9 }
  0xa1   : > { %v611_v11 = vpop.xlane.xlu0 %610 }
  0xa2   : > { %v621_v12 = vmul.f32 %v620_v10, %v611_v11 }
  0xa4   : > { %v623_v13 = vsub.f32 %v608_v2, %v621_v12 }
  0xa6   : > { %v625_v14 = vmul.f32 %v623_v13, %v623_v13  ;;  %v690_v55 = vmul.f32 %v688_v49, %v623_v13 }
  0xa8   : > { %627 = vadd.xlane.f32.xlu1 %v625_v14 }
  0xa9   : > { %v613_v15 = vpop.xlane.xlu0 %612 }
  0xaa   : > { %v622_v16 = vmul.f32 %v620_v10, %v613_v15 }
  0xac   : > { %v1837_v17 = vsub.f32 %v609_v3, %v622_v16 }
  0xae   : > { %v626_v18 = vmul.f32 %v1837_v17, %v1837_v17  ;;  %v691_v6 = vmul.f32 %v688_v49, %v1837_v17 }
  0xb0   : > { %629 = vadd.xlane.f32.xlu1 %v626_v18 }
 0x11b   : > { %v628_v19 = vpop.xlane.xlu1 %627 }
 0x11c   : > { %v631_v20 = vmul.f32 0.007874016, %v628_v19 }
 0x11e   : > { %1484 = vrsqrt.f32 %v631_v20  ;;  %vm640_vm1 = vcmp.eq.f32.partialorder %v631_v20, inf  ;;  %v643_v33 = vand.u32 2147483648, %v631_v20  ;;  %vm642_vm2 = vcmp.eq.f32.partialorder %v631_v20, 0.0 }
 0x123   : > { %v630_v21 = vpop.xlane.xlu1 %629 }
 0x124   : > { %v1485_v22 = vpop.eup %1484  ;;  %v632_v23 = vmul.f32 0.007874016, %v630_v21 }
 0x125   : > { %v634_v24 = vmul.f32 %v1485_v22, %v631_v20 }
 0x126   : > { %1486 = vrsqrt.f32 %v632_v23  ;;  %vm652_vm3 = vcmp.eq.f32.partialorder %v632_v23, inf  ;;  %v655_v41 = vand.u32 2147483648, %v632_v23  ;;  %vm654_vm4 = vcmp.eq.f32.partialorder %v632_v23, 0.0 }
 0x127   : > { %v635_v25 = vmul.f32 %v1485_v22, %v634_v24 }
 0x129   : > { %v636_v26 = vmul.f32 0.5, %v635_v25 }
 0x12b   : > { %v637_v27 = vsub.f32 1.5, %v636_v26 }
 0x12c   : > { %v1487_v28 = vpop.eup %1486 }
 0x12d   : > { %v638_v29 = vmul.f32 %v1485_v22, %v637_v27  ;;  %v646_v30 = vmul.f32 %v1487_v28, %v632_v23 }
 0x12f   : > { %v639_v31 = vmul.f32 %v638_v29, %v631_v20  ;;  %v647_v32 = vmul.f32 %v1487_v28, %v646_v30 }
 0x131   : > { %v641_v34 = vsel %vm640_vm1, %v631_v20, %v639_v31  ;;  %v648_v35 = vmul.f32 0.5, %v647_v32 }
 0x132   : > { %v644_v36 = vsel %vm642_vm2, %v643_v33, %v641_v34 }
 0x133   : > { %v657_v37 = vadd.f32 1e-06, %v644_v36  ;;  %v649_v38 = vsub.f32 1.5, %v648_v35 }
 0x135   : > { %1488 = vrcp.f32 %v657_v37  ;;  %v650_v39 = vmul.f32 %v1487_v28, %v649_v38  ;;  %v670_v48 = vand.u32 2147483648, %v657_v37  ;;  %v668_v51 = vand.u32 2147483647, %v657_v37 }
 0x136   : > { %vm664_vm6 = vweird.f32 %v657_v37 }
 0x137   : > { %v651_v40 = vmul.f32 %v650_v39, %v632_v23  ;;  %v671_v53 = vor.u32 1.1754944e-38, %v670_v48  ;;  %vm669_vm8 = vcmp.eq.f32.partialorder %v668_v51, 8.507059e+37 }
 0x139   : > { %v653_v42 = vsel %vm652_vm3, %v632_v23, %v651_v40 }
 0x13a   : > { %v656_v44 = vsel %vm654_vm4, %v655_v41, %v653_v42 }
 0x13b   : > { %v1489_v43 = vpop.eup %1488  ;;  %v658_v46 = vadd.f32 1e-06, %v656_v44 }
 0x13c   : > { %v660_v45 = vmul.f32 %v1489_v43, %v657_v37  ;;  %vm665_vm5 = vweird.f32 %v1489_v43 }
 0x13d   : > { %1490 = vrcp.f32 %v658_v46  ;;  %vm666_vm7 = vmor %vm664_vm6, %vm665_vm5  ;;  %v684_v63 = vand.u32 2147483648, %v658_v46  ;;  %v682_v3 = vand.u32 2147483647, %v658_v46  ;;  %vm678_vm10 = vweird.f32 %v658_v46 }
 0x13e   : > { %v661_v47 = vsub.f32 1.0, %v660_v45 }
 0x13f   : > { %v685_v5 = vor.u32 1.1754944e-38, %v684_v63  ;;  %vm683_vm12 = vcmp.eq.f32.partialorder %v682_v3, 8.507059e+37 }
 0x140   : > { %v662_v50 = vmul.f32 %v1489_v43, %v661_v47 }
 0x142   : > { %v663_v52 = vadd.f32 %v1489_v43, %v662_v50 }
 0x143   : > { %v1491_v54 = vpop.eup %1490 }
 0x144   : > { %v667_v57 = vsel %vm666_vm7, %v1489_v43, %v663_v52  ;;  %v674_v59 = vmul.f32 %v1491_v54, %v658_v46  ;;  %vm679_vm9 = vweird.f32 %v1491_v54 }
 0x145   : > { %v672_v58 = vsel %vm669_vm8, %v671_v53, %v667_v57  ;;  %vm680_vm11 = vmor %vm678_vm10, %vm679_vm9 }
 0x146   : > { %v692_v60 = vmul.f32 %v690_v55, %v672_v58  ;;  %v675_v61 = vsub.f32 1.0, %v674_v59 }
 0x148   : > { %v1843_v62 = vadd.f32 %v695_v56, %v692_v60  ;;  %v676_v2 = vmul.f32 %v1491_v54, %v675_v61 }
 0x14a   : > { %v677_v4 = vadd.f32 %v1491_v54, %v676_v2 }
 0x14c   : > { %v681_v7 = vsel %vm680_vm11, %v1491_v54, %v677_v4 }
 0x14d   : > { %v686_v8 = vsel %vm683_vm12, %v685_v5, %v681_v7 }
 0x14e   : > { %v693_v9 = vmul.f32 %v691_v6, %v686_v8 }
 0x150   : > { %v1846_v10 = vadd.f32 %v695_v56, %v693_v9 }
 0x151 LB: >> { %s1333_s1 = sshll.u32 %s1624_s29, 7  ;;  %s723_s24 = scalar_lea.vmem %s2137_s7, %s1624_s29  ;;  %vm753_vm13 = vcmask 261120   ;;  %s1624_s29 = sphi %s1848_s29, %s704_s29  }
 0x152   : >> { %s1861_s25 = scalar_lea.vmem %s2136_s6, %s1333_s1  ;;  %s1866_s27 = scalar_lea.vmem %s2138_s8, %s1333_s1  ;;  %v1492_v43 = vld [vmem:[%s723_s24] ss:$0 sm:$0xff] }
 0x153   : >> { %v722_v11 = vld [vmem:[%s1861_s25 + $0x78] sm:$0xff]  ;;  %v721_v13 = vld [vmem:[%s1861_s25 + $0x70] sm:$0xff]  ;;  %v720_v15 = vld [vmem:[%s1861_s25 + $0x68] sm:$0xff]  ;;  %s1334_s26 = sshll.u32 %s1624_s29, 4 }
 0x154   : >> { %v772_v12 = vld [vmem:[%s1866_s27 + $0x78] sm:$0xff]  ;;  %1351 = vmatpush.msra.mxu2 %v722_v11  ;;  %v771_v14 = vld [vmem:[%s1866_s27 + $0x70] sm:$0xff]  ;;  %v770_v16 = vld [vmem:[%s1866_s27 + $0x68] sm:$0xff]  ;;  %728 = vmatpush.msra.mxu0 %v722_v11  ;;  %s752_s21 = scalar_lea.vmem [#allocation2], %s1334_s26  ;;  %s801_s19 = scalar_lea.vmem [#allocation3], %s1334_s26 }
 0x155   : >> { %1367 = vmatpush.msra.mxu3 %v772_v12  ;;  %778 = vmatpush.msra.mxu1 %v772_v12  ;;  %v719_v17 = vld [vmem:[%s1861_s25 + $0x60] sm:$0xff]  ;;  %v718_v19 = vld [vmem:[%s1861_s25 + $0x58] sm:$0xff]  ;;  %v717_v21 = vld [vmem:[%s1861_s25 + $0x50] sm:$0xff] }
 0x156   : >> { %1352 = vmatpush.msra.mxu2 %v721_v13  ;;  %v769_v18 = vld [vmem:[%s1866_s27 + $0x60] sm:$0xff]  ;;  %729 = vmatpush.msra.mxu0 %v721_v13  ;;  %v768_v20 = vld [vmem:[%s1866_s27 + $0x58] sm:$0xff]  ;;  %v767_v22 = vld [vmem:[%s1866_s27 + $0x50] sm:$0xff] }
 0x157   : >> { %1368 = vmatpush.msra.mxu3 %v771_v14  ;;  %779 = vmatpush.msra.mxu1 %v771_v14  ;;  %v716_v23 = vld [vmem:[%s1861_s25 + $0x48] sm:$0xff]  ;;  %v715_v25 = vld [vmem:[%s1861_s25 + $0x40] sm:$0xff]  ;;  %v714_v27 = vld [vmem:[%s1861_s25 + $0x38] sm:$0xff] }
 0x158   : >> { %1353 = vmatpush.msra.mxu2 %v720_v15  ;;  %730 = vmatpush.msra.mxu0 %v720_v15  ;;  %v766_v24 = vld [vmem:[%s1866_s27 + $0x48] sm:$0xff]  ;;  %v765_v26 = vld [vmem:[%s1866_s27 + $0x40] sm:$0xff]  ;;  %v764_v28 = vld [vmem:[%s1866_s27 + $0x38] sm:$0xff] }
 0x159   : >> { %1369 = vmatpush.msra.mxu3 %v770_v16  ;;  %780 = vmatpush.msra.mxu1 %v770_v16  ;;  %v713_v29 = vld [vmem:[%s1861_s25 + $0x30] sm:$0xff]  ;;  %v712_v31 = vld [vmem:[%s1861_s25 + $0x28] sm:$0xff]  ;;  %v711_v33 = vld [vmem:[%s1861_s25 + $0x20] sm:$0xff] }
 0x15a   : >> { %1354 = vmatpush.msra.mxu2 %v719_v17  ;;  %731 = vmatpush.msra.mxu0 %v719_v17  ;;  %v763_v30 = vld [vmem:[%s1866_s27 + $0x30] sm:$0xff]  ;;  %v762_v32 = vld [vmem:[%s1866_s27 + $0x28] sm:$0xff]  ;;  %v761_v34 = vld [vmem:[%s1866_s27 + $0x20] sm:$0xff] }
 0x15b   : >> { %1370 = vmatpush.msra.mxu3 %v769_v18  ;;  %781 = vmatpush.msra.mxu1 %v769_v18  ;;  %v710_v35 = vld [vmem:[%s1861_s25 + $0x18] sm:$0xff]  ;;  %v709_v37 = vld [vmem:[%s1861_s25 + $0x10] sm:$0xff]  ;;  %v708_v39 = vld [vmem:[%s1861_s25 + $0x8] sm:$0xff] }
 0x15c   : >> { %1355 = vmatpush.msra.mxu2 %v718_v19  ;;  %732 = vmatpush.msra.mxu0 %v718_v19  ;;  %v760_v36 = vld [vmem:[%s1866_s27 + $0x18] sm:$0xff]  ;;  %v759_v38 = vld [vmem:[%s1866_s27 + $0x10] sm:$0xff]  ;;  %v758_v40 = vld [vmem:[%s1866_s27 + $0x8] sm:$0xff] }
 0x15d   : >> { %1371 = vmatpush.msra.mxu3 %v768_v20  ;;  %782 = vmatpush.msra.mxu1 %v768_v20  ;;  %v707_v41 = vld [vmem:[%s1861_s25] sm:$0xff] }
 0x15e   : >> { %1356 = vmatpush.msra.mxu2 %v717_v21  ;;  %733 = vmatpush.msra.mxu0 %v717_v21  ;;  %v757_v42 = vld [vmem:[%s1866_s27] sm:$0xff]  ;;  %s773_s27 = scalar_lea.vmem %s2139_s9, %s1624_s29  ;;  %s704_s29 = sadd.s32 1, %s1624_s29  }
 0x15f   : >> { %1372 = vmatpush.msra.mxu3 %v767_v22  ;;  %783 = vmatpush.msra.mxu1 %v767_v22  ;;  %v1493_v44 = vld [vmem:[%s773_s27] ss:$0 sm:$0xff]  ;;  %p701_p0 = scmp.ge.s32.totalorder %s704_s29, 4  }
 0x160   : >> { %1357 = vmatpush.msra.mxu2 %v716_v23  ;;  %734 = vmatpush.msra.mxu0 %v716_v23 }
 0x161   : >> { %1373 = vmatpush.msra.mxu3 %v766_v24  ;;  %784 = vmatpush.msra.mxu1 %v766_v24 }
 0x162   : >> { %1358 = vmatpush.msra.mxu2 %v715_v25  ;;  %735 = vmatpush.msra.mxu0 %v715_v25 }
 0x163   : >> { %1374 = vmatpush.msra.mxu3 %v765_v26  ;;  %785 = vmatpush.msra.mxu1 %v765_v26 }
 0x164   : >> { %1359 = vmatpush.msra.mxu2 %v714_v27  ;;  %736 = vmatpush.msra.mxu0 %v714_v27 }
 0x165   : >> { %1375 = vmatpush.msra.mxu3 %v764_v28  ;;  %786 = vmatpush.msra.mxu1 %v764_v28 }
 0x166   : >> { %1360 = vmatpush.msra.mxu2 %v713_v29  ;;  %737 = vmatpush.msra.mxu0 %v713_v29 }
 0x167   : >> { %1376 = vmatpush.msra.mxu3 %v763_v30  ;;  %787 = vmatpush.msra.mxu1 %v763_v30 }
 0x168   : >> { %1361 = vmatpush.msra.mxu2 %v712_v31  ;;  %738 = vmatpush.msra.mxu0 %v712_v31 }
 0x169   : >> { %1377 = vmatpush.msra.mxu3 %v762_v32  ;;  %788 = vmatpush.msra.mxu1 %v762_v32 }
 0x16a   : >> { %1362 = vmatpush.msra.mxu2 %v711_v33  ;;  %739 = vmatpush.msra.mxu0 %v711_v33 }
 0x16b   : >> { %1378 = vmatpush.msra.mxu3 %v761_v34  ;;  %789 = vmatpush.msra.mxu1 %v761_v34 }
 0x16c   : >> { %1363 = vmatpush.msra.mxu2 %v710_v35  ;;  %740 = vmatpush.msra.mxu0 %v710_v35 }
 0x16d   : >> { %1379 = vmatpush.msra.mxu3 %v760_v36  ;;  %790 = vmatpush.msra.mxu1 %v760_v36 }
 0x16e   : >> { %1364 = vmatpush.msra.mxu2 %v709_v37  ;;  %741 = vmatpush.msra.mxu0 %v709_v37 }
 0x16f   : >> { %1380 = vmatpush.msra.mxu3 %v759_v38  ;;  %791 = vmatpush.msra.mxu1 %v759_v38 }
 0x170   : >> { %1365 = vmatpush.msra.mxu2 %v708_v39  ;;  %742 = vmatpush.msra.mxu0 %v708_v39 }
 0x171   : >> { %1381 = vmatpush.msra.mxu3 %v758_v40  ;;  %792 = vmatpush.msra.mxu1 %v758_v40 }
 0x172   : >> { %1366 = vmatpush.msra.mxu2 %v707_v41  ;;  %743 = vmatpush.msra.mxu0 %v707_v41 }
 0x173   : >> { %1382 = vmatpush.msra.mxu3 %v757_v42  ;;  %747 = vmatmul.f32.vlgmr.msra.gmra.mxu2 %v1846_v10 }
 0x174   : >> { %797 = vmatmul.f32.vlgmr.msra.gmra.mxu3 %v1846_v10  ;;  %793 = vmatpush.msra.mxu1 %v757_v42 }
 0x175   : >> { %744 = vmatmul.f32.vlgmr.msra.gmra.mxu0 %v1843_v62  ;;  %794 = vmatmul.f32.vlgmr.msra.gmra.mxu1 %v1843_v62 }
 0x1f2   : >> { %v745_v45 = vpop.f32.mrf.mxu0  ;;  %v795_v46 = vpop.f32.mrf.mxu1 }
 0x1f3   : >> { %v746_v47 = vadd.f32 %v1492_v43, %v745_v45  ;;  %v796_v48 = vadd.f32 %v1493_v44, %v795_v46 }
 0x1f5   : >> { %754 = vst.msk [vmem:[%s752_s21] sm:$0xff] %vm753_vm13, %v746_v47 }
 0x1f6   : >> { %v748_v49 = vpop.f32.mrf.mxu2  ;;  %802 = vst.msk [vmem:[%s801_s19] sm:$0xff] %vm753_vm13, %v796_v48  ;;  %703 = sbr.rel (!%p701_p0) target bundleno = 337 (0x151), region = 170 }
 0x1f7   : >> { %v798_v50 = vpop.f32.mrf.mxu3  ;;  %v749_v51 = vadd.f32 %v1492_v43, %v748_v49 }
 0x1f8   : >> { %v799_v52 = vadd.f32 %v1493_v44, %v798_v50 }
 0x1f9   : >> { %755 = vst.msk [vmem:[%s752_s21 + $0x8] sm:$0xff] %vm753_vm13, %v749_v51 }
 0x1fa   : >> { %803 = vst.msk [vmem:[%s801_s19 + $0x8] sm:$0xff] %vm753_vm13, %v799_v52 }
 0x1fb PF: > { %s1335_s24 = sshll.u32 %s1604_s30, 3  ;;  %v1635_v54 = vmov 128.0   ;;  %s2186_s22 = sld [smem:[#allocation19_spill]]  ;;  %v1636_v8 = vmov 0   ;;  %v1637_v13 = vmov 0.0   ;;  %v850_v26 = vperm.slane %v1809_v0, 0 }
 0x1fc   : > { %s805_s25 = scalar_lea.vmem %s1831_s20, %s1335_s24  ;;  %1494 = vrcp.f32 %v1635_v54  ;;  %863 = vst [vmem:[#allocation4] sm:$0xff] %v1637_v13  ;;  %v855_v32 = vperm.slane %v1814_v1, 0 }
 0x1fd   : > { %v1919_v53 = vld [vmem:[%s805_s25] sm:$0xff] }
 0x1fe   : > { %807 = vadd.xlane.f32.xlu0 %v1919_v53 }
 0x201   : > { %s2187_s23 = scalar_lea.vmem %s2186_s22, %s1821_s18  ;;  %s1940_s18 = smov 0  }
 0x202   : > { %v1495_v55 = vpop.eup %1494  ;;  %v858_v5 = vld [vmem:[%s2187_s23] sm:$0x1] }
 0x203   : > { %v810_v56 = vmul.f32 128.0, %v1495_v55  ;;  %vm814_vm14 = vweird.f32 %v1495_v55  ;;  %vm859_vm15 = vcmp.eq.f32.partialorder %v858_v5, 0.0 }
 0x204   : > { %v860_v9 = vsel %vm859_vm15, 1, %v1636_v8 }
 0x205   : > { %v811_v57 = vsub.f32 1.0, %v810_v56  ;;  %v861_v10 = vperm.slane %v860_v9, 0 }
 0x207   : > { %v812_v58 = vmul.f32 %v1495_v55, %v811_v57  ;;  %vm1931_vm0 = vcmp.eq.s32.totalorder %v861_v10, 1 }
 0x209   : > { %v813_v59 = vadd.f32 %v1495_v55, %v812_v58 }
 0x20b   : > { %v1922_v60 = vsel %vm814_vm14, %v1495_v55, %v813_v59 }
 0x271   : > { %v808_v61 = vpop.xlane.xlu0 %807 }
 0x272   : > { %v816_v62 = vmul.f32 %v1922_v60, %v808_v61 }
 0x274   : > { %v817_v63 = vsub.f32 %v1919_v53, %v816_v62 }
 0x276   : > { %v818_v2 = vmul.f32 %v817_v63, %v817_v63  ;;  %v852_v31 = vmul.f32 %v850_v26, %v817_v63 }
 0x278   : > { %819 = vadd.xlane.f32.xlu0 %v818_v2 }
 0x2eb   : > { %v820_v3 = vpop.xlane.xlu0 %819 }
 0x2ec   : > { %v821_v4 = vmul.f32 0.007874016, %v820_v3 }
 0x2ee   : > { %1496 = vrsqrt.f32 %v821_v4  ;;  %vm829_vm1 = vcmp.eq.f32.partialorder %v821_v4, inf  ;;  %v832_v18 = vand.u32 2147483648, %v821_v4  ;;  %vm831_vm2 = vcmp.eq.f32.partialorder %v821_v4, 0.0 }
 0x2f4   : > { %v1497_v6 = vpop.eup %1496 }
 0x2f5   : > { %v823_v7 = vmul.f32 %v1497_v6, %v821_v4 }
 0x2f7   : > { %v824_v11 = vmul.f32 %v1497_v6, %v823_v7 }
 0x2f9   : > { %v825_v14 = vmul.f32 0.5, %v824_v11 }
 0x2fb   : > { %v826_v15 = vsub.f32 1.5, %v825_v14 }
 0x2fd   : > { %v827_v16 = vmul.f32 %v1497_v6, %v826_v15 }
 0x2ff   : > { %v828_v17 = vmul.f32 %v827_v16, %v821_v4 }
 0x301   : > { %v830_v19 = vsel %vm829_vm1, %v821_v4, %v828_v17 }
 0x302   : > { %v833_v20 = vsel %vm831_vm2, %v832_v18, %v830_v19 }
 0x303   : > { %v834_v21 = vadd.f32 1e-06, %v833_v20 }
 0x305   : > { %1498 = vrcp.f32 %v834_v21  ;;  %v846_v25 = vand.u32 2147483648, %v834_v21  ;;  %v844_v28 = vand.u32 2147483647, %v834_v21  ;;  %vm840_vm4 = vweird.f32 %v834_v21 }
 0x307   : > { %v847_v30 = vor.u32 1.1754944e-38, %v846_v25  ;;  %vm845_vm6 = vcmp.eq.f32.partialorder %v844_v28, 8.507059e+37 }
 0x30b   : > { %v1499_v22 = vpop.eup %1498 }
 0x30c   : > { %v836_v23 = vmul.f32 %v1499_v22, %v834_v21  ;;  %vm841_vm3 = vweird.f32 %v1499_v22 }
 0x30d   : > { %vm842_vm5 = vmor %vm840_vm4, %vm841_vm3 }
 0x30e   : > { %v837_v24 = vsub.f32 1.0, %v836_v23 }
 0x310   : > { %v838_v27 = vmul.f32 %v1499_v22, %v837_v24 }
 0x312   : > { %v839_v29 = vadd.f32 %v1499_v22, %v838_v27 }
 0x314   : > { %v843_v33 = vsel %vm842_vm5, %v1499_v22, %v839_v29 }
 0x315   : > { %v848_v34 = vsel %vm845_vm6, %v847_v30, %v843_v33 }
 0x316   : > { %v853_v35 = vmul.f32 %v852_v31, %v848_v34 }
 0x318   : > { %v1938_v36 = vadd.f32 %v855_v32, %v853_v35 }
 0x319 LB: >> { %s1336_s27 = sshll.u32 %s1628_s18, 7  ;;  %s2190_s4 = sld [smem:[#allocation22_spill]]  ;;  %vm917_vm7 = vcmask 261120   ;;  %vm949_vm8 = vcmask 130048   ;;  %v1000_v26 = vld [vmem:[#allocation4] sm:$0xff]  ;;  %s1628_s18 = sphi %s1940_s18, %s869_s18  }
 0x31a   : >> { %s1337_s21 = sshll.u32 %s1628_s18, 4  ;;  %s2191_s5 = sld [smem:[#allocation23_spill]] }
 0x31b   : >> { %s914_s20 = scalar_lea.vmem [#allocation2], %s1337_s21  ;;  %s974_s23 = scalar_lea.vmem [#allocation3], %s1337_s21 }
 0x31c   : >> { %v916_v39 = vld [vmem:[%s914_s20 + $0x8] sm:$0xff]  ;;  %v915_v52 = vld [vmem:[%s914_s20] sm:$0xff] }
 0x31d   : >> { %1338 = vmatpush.xpose.msk.msra.mxu1 %vm917_vm7, %v916_v39  ;;  %v976_v5 = vld [vmem:[%s974_s23 + $0x8] sm:$0xff]  ;;  %v975_v6 = vld [vmem:[%s974_s23] sm:$0xff] }
 0x31e   : >> { %994 = vmatpush.msra.mxu2 %v976_v5 }
 0x31f   : >> { %s1949_s26 = scalar_lea.vmem %s2190_s4, %s1336_s27  ;;  %s1342_s27 = sshll.u32 %s1628_s18, 5 }
 0x320   : >> { %v887_v0 = vld [vmem:[%s1949_s26 + $0x78] sm:$0xff]  ;;  %v886_v1 = vld [vmem:[%s1949_s26 + $0x70] sm:$0xff]  ;;  %v885_v37 = vld [vmem:[%s1949_s26 + $0x68] sm:$0xff]  ;;  %s888_s25 = scalar_lea.vmem %s2191_s5, %s1628_s18  ;;  %995 = vmatpush.msra.mxu2 %v975_v6  ;;  %s869_s18 = sadd.s32 1, %s1628_s18  }
 0x321   : >> { %893 = vmatpush.msra.mxu0 %v887_v0  ;;  %v884_v38 = vld [vmem:[%s1949_s26 + $0x60] sm:$0xff]  ;;  %v883_v40 = vld [vmem:[%s1949_s26 + $0x58] sm:$0xff]  ;;  %v882_v41 = vld [vmem:[%s1949_s26 + $0x50] sm:$0xff]  ;;  %1339 = vmatpush.xpose.msk.msra.mxu1 %vm917_vm7, %v915_v52  ;;  %p866_p1 = scmp.ge.s32.totalorder %s869_s18, 4  }
 0x322   : >> { %v881_v42 = vld [vmem:[%s1949_s26 + $0x48] sm:$0xff]  ;;  %v880_v43 = vld [vmem:[%s1949_s26 + $0x40] sm:$0xff]  ;;  %v879_v44 = vld [vmem:[%s1949_s26 + $0x38] sm:$0xff]  ;;  %s2016_s29 = smov (%p866_p1), 0  }
 0x323   : >> { %894 = vmatpush.msra.mxu0 %v886_v1  ;;  %v878_v45 = vld [vmem:[%s1949_s26 + $0x30] sm:$0xff]  ;;  %v877_v46 = vld [vmem:[%s1949_s26 + $0x28] sm:$0xff]  ;;  %v876_v47 = vld [vmem:[%s1949_s26 + $0x20] sm:$0xff] }
 0x324   : >> { %v875_v48 = vld [vmem:[%s1949_s26 + $0x18] sm:$0xff]  ;;  %v874_v49 = vld [vmem:[%s1949_s26 + $0x10] sm:$0xff]  ;;  %v873_v50 = vld [vmem:[%s1949_s26 + $0x8] sm:$0xff] }
 0x325   : >> { %895 = vmatpush.msra.mxu0 %v885_v37  ;;  %v872_v51 = vld [vmem:[%s1949_s26] sm:$0xff]  ;;  %s1002_s26 = scalar_lea.vmem %s2140_s10, %s1342_s27 }
 0x326   : >> { %v1500_v54 = vld [vmem:[%s888_s25] ss:$0 sm:$0xff]  ;;  %v1006_v7 = vld [vmem:[%s1002_s26 + $0x18] sm:$0xff]  ;;  %v1005_v8 = vld [vmem:[%s1002_s26 + $0x10] sm:$0xff] }
 0x327   : >> { %896 = vmatpush.msra.mxu0 %v884_v38  ;;  %1022 = vmatpush.msra.mxu3 %v1006_v7  ;;  %v1004_v9 = vld [vmem:[%s1002_s26 + $0x8] sm:$0xff]  ;;  %v1003_v24 = vld [vmem:[%s1002_s26] sm:$0xff] }
 0x328   : > { %v1505_v30 = vld [vmem:[%s2141_s11] ss:$0 sm:$0xff] (%p866_p1) }
 0x329   : >> { %897 = vmatpush.msra.mxu0 %v883_v40  ;;  %1023 = vmatpush.msra.mxu3 %v1005_v8 }
 0x32b   : >> { %898 = vmatpush.msra.mxu0 %v882_v41  ;;  %1024 = vmatpush.msra.mxu3 %v1004_v9 }
 0x32d   : >> { %899 = vmatpush.msra.mxu0 %v881_v42  ;;  %1025 = vmatpush.msra.mxu3 %v1003_v24 }
 0x32f   : >> { %900 = vmatpush.msra.mxu0 %v880_v43 }
 0x331   : >> { %901 = vmatpush.msra.mxu0 %v879_v44 }
 0x333   : >> { %902 = vmatpush.msra.mxu0 %v878_v45 }
 0x335   : >> { %903 = vmatpush.msra.mxu0 %v877_v46 }
 0x337   : >> { %904 = vmatpush.msra.mxu0 %v876_v47 }
 0x339   : >> { %905 = vmatpush.msra.mxu0 %v875_v48  ;;  %v1506_v48 = vld [vmem:[%s2142_s12] ss:$0 sm:$0xff] (%p866_p1) }
 0x33b   : >> { %906 = vmatpush.msra.mxu0 %v874_v49 }
 0x33d   : >> { %907 = vmatpush.msra.mxu0 %v873_v50 }
 0x33f   : >> { %908 = vmatpush.msra.mxu0 %v872_v51 }
 0x340   : >> { %909 = vmatmul.f32.vlgmr.msra.gmra.mxu0 %v1938_v36 }
 0x3bd   : >> { %v910_v55 = vpop.f32.mrf.mxu0 }
 0x3be   : >> { %v911_v56 = vadd.f32 %v1500_v54, %v910_v55  ;;  %v1507_v55 = vld [vmem:[%s2143_s13] ss:$0 sm:$0xff] (%p866_p1) }
 0x3c0   : >> { %1340 = vmatmul.msk.f32.vlgmr.msra.gmra.mxu1 %vm917_vm7, %v911_v56 }
 0x43d   : >> { %v944_v57 = vpop.f32.mrf.mxu1 }
 0x43e   : >> { %v947_v58 = vmul.f32 0.17677669, %v944_v57 }
 0x440   : >> { %v948_v59 = vsel %vm1931_vm0, -1e+09, %v947_v58 }
 0x441   : >> { %v950_v61 = vsel %vm949_vm8, %v948_v59, -inf }
 0x442   : >> { %951 = vmax.xlane.f32.xlu0 %v950_v61 }
 0x4b5   : >> { %v952_v62 = vpop.xlane.xlu0 %951 }
 0x4b6   : >> { %v953_v63 = vsub.f32 %v948_v59, %v952_v62 }
 0x4b8   : >> { %v954_v2 = vmul.f32 1.442695, %v953_v63 }
 0x4ba   : >> { %1501 = vpow2.f32 %v954_v2 }
 0x4c0   : >> { %v1502_v3 = vpop.eup %1501 }
 0x4c1   : >> { %v956_v4 = vsel %vm949_vm8, %v1502_v3, 0.0 }
 0x4c2   : >> { %957 = vadd.xlane.f32.xlu0 %v956_v4 }
 0x535   : >> { %v958_v10 = vpop.xlane.xlu0 %957 }
 0x536   : >> { %1503 = vrcp.f32 %v958_v10  ;;  %v970_v16 = vand.u32 2147483648, %v958_v10  ;;  %v968_v18 = vand.u32 2147483647, %v958_v10  ;;  %vm964_vm10 = vweird.f32 %v958_v10 }
 0x538   : >> { %v971_v20 = vor.u32 1.1754944e-38, %v970_v16  ;;  %vm969_vm12 = vcmp.eq.f32.partialorder %v968_v18, 8.507059e+37 }
 0x53c   : >> { %v1504_v11 = vpop.eup %1503 }
 0x53d   : >> { %v960_v14 = vmul.f32 %v1504_v11, %v958_v10  ;;  %vm965_vm9 = vweird.f32 %v1504_v11 }
 0x53e   : >> { %vm966_vm11 = vmor %vm964_vm10, %vm965_vm9 }
 0x53f   : >> { %v961_v15 = vsub.f32 1.0, %v960_v14 }
 0x541   : >> { %v962_v17 = vmul.f32 %v1504_v11, %v961_v15 }
 0x543   : >> { %v963_v19 = vadd.f32 %v1504_v11, %v962_v17 }
 0x545   : >> { %v967_v21 = vsel %vm966_vm11, %v1504_v11, %v963_v19 }
 0x546   : >> { %v972_v22 = vsel %vm969_vm12, %v971_v20, %v967_v21 }
 0x547   : >> { %v973_v23 = vmul.f32 %v1502_v3, %v972_v22 }
 0x549   : >> { %1341 = vmatmul.msk.f32.vlgmr.msra.gmra.mxu2 %vm949_vm8, %v973_v23 }
 0x5cc   : >> { %v997_v25 = vpop.f32.mrf.mxu2 }
 0x5cd   : >> { %1343 = vmatmul.msk.f32.vlgmr.msra.gmra.mxu3 %vm917_vm7, %v997_v25 }
 0x64f   : > { %868 = sbr.rel (!%p866_p1) target bundleno = 793 (0x319), region = 181 }
 0x650   : >> { %v1027_v27 = vpop.f32.mrf.mxu3 }
 0x651   : >> { %v1030_v28 = vadd.f32 %v1027_v27, %v1000_v26 }
 0x653   : >> { %1031 = vst [vmem:[#allocation4] sm:$0xff] %v1030_v28 }
 0x65a   : > { %v1032_v29 = vld [vmem:[#allocation4] sm:$0xff] }
 0x65b   : > { %v1033_v31 = vadd.f32 %v1032_v29, %v1919_v53  ;;  %1085 = vst [vmem:[#allocation4] sm:$0xff] %v1637_v13 }
 0x65d   : > { %v2003_v32 = vadd.f32 %v1505_v30, %v1033_v31 }
 0x65f   : > { %1041 = vadd.xlane.f32.xlu0 %v2003_v32 }
 0x6d2   : > { %v1042_v33 = vpop.xlane.xlu0 %1041 }
 0x6d3   : > { %v1043_v34 = vmul.f32 %v1042_v33, %v1922_v60 }
 0x6d5   : > { %v1044_v35 = vsub.f32 %v2003_v32, %v1043_v34 }
 0x6d7   : > { %v1045_v0 = vmul.f32 %v1044_v35, %v1044_v35  ;;  %v1079_v54 = vmul.f32 %v1506_v48, %v1044_v35 }
 0x6d9   : > { %1046 = vadd.xlane.f32.xlu0 %v1045_v0 }
 0x74c   : > { %v1047_v12 = vpop.xlane.xlu0 %1046 }
 0x74d   : > { %v1048_v36 = vmul.f32 0.007874016, %v1047_v12 }
 0x74f   : > { %1508 = vrsqrt.f32 %v1048_v36  ;;  %vm1056_vm13 = vcmp.eq.f32.partialorder %v1048_v36, inf  ;;  %v1059_v41 = vand.u32 2147483648, %v1048_v36  ;;  %vm1058_vm14 = vcmp.eq.f32.partialorder %v1048_v36, 0.0 }
 0x755   : > { %v1509_v1 = vpop.eup %1508 }
 0x756   : > { %v1050_v37 = vmul.f32 %v1509_v1, %v1048_v36 }
 0x758   : > { %v1051_v38 = vmul.f32 %v1509_v1, %v1050_v37 }
 0x75a   : > { %v1052_v53 = vmul.f32 0.5, %v1051_v38 }
 0x75c   : > { %v1053_v39 = vsub.f32 1.5, %v1052_v53 }
 0x75e   : > { %v1054_v13 = vmul.f32 %v1509_v1, %v1053_v39 }
 0x760   : > { %v1055_v40 = vmul.f32 %v1054_v13, %v1048_v36 }
 0x762   : > { %v1057_v42 = vsel %vm1056_vm13, %v1048_v36, %v1055_v40 }
 0x763   : > { %v1060_v43 = vsel %vm1058_vm14, %v1059_v41, %v1057_v42 }
 0x764   : > { %v1061_v60 = vadd.f32 1e-06, %v1060_v43 }
 0x766   : > { %1510 = vrcp.f32 %v1061_v60  ;;  %v1073_v47 = vand.u32 2147483648, %v1061_v60  ;;  %v1071_v50 = vand.u32 2147483647, %v1061_v60  ;;  %vm1067_vm0 = vweird.f32 %v1061_v60 }
 0x768   : > { %v1074_v52 = vor.u32 1.1754944e-38, %v1073_v47  ;;  %vm1072_vm2 = vcmp.eq.f32.partialorder %v1071_v50, 8.507059e+37 }
 0x76c   : > { %v1511_v44 = vpop.eup %1510 }
 0x76d   : > { %v1063_v45 = vmul.f32 %v1511_v44, %v1061_v60  ;;  %vm1068_vm15 = vweird.f32 %v1511_v44 }
 0x76e   : > { %vm1069_vm1 = vmor %vm1067_vm0, %vm1068_vm15 }
 0x76f   : > { %v1064_v46 = vsub.f32 1.0, %v1063_v45 }
 0x771   : > { %v1065_v49 = vmul.f32 %v1511_v44, %v1064_v46 }
 0x773   : > { %v1066_v51 = vadd.f32 %v1511_v44, %v1065_v49 }
 0x775   : > { %v1070_v56 = vsel %vm1069_vm1, %v1511_v44, %v1066_v51 }
 0x776   : > { %v1075_v57 = vsel %vm1072_vm2, %v1074_v52, %v1070_v56 }
 0x777   : > { %v1080_v58 = vmul.f32 %v1079_v54, %v1075_v57 }
 0x779   : > { %v2014_v59 = vadd.f32 %v1507_v55, %v1080_v58 }
 0x77a LB: >> { %s1344_s22 = sshll.u32 %s1632_s29, 7  ;;  %s1110_s1 = scalar_lea.vmem %s2145_s15, %s1632_s29  ;;  %v1136_v36 = vld [vmem:[#allocation4] sm:$0xff]  ;;  %s1632_s29 = sphi %s2016_s29, %s1091_s29  }
 0x77b   : >> { %s2029_s21 = scalar_lea.vmem %s2144_s14, %s1344_s22  ;;  %s2037_s24 = scalar_lea.vmem %s2146_s16, %s1344_s22  ;;  %v1512_v34 = vld [vmem:[%s1110_s1] ss:$0 sm:$0xff] }
 0x77c   : >> { %v1109_v61 = vld [vmem:[%s2029_s21 + $0x78] sm:$0xff]  ;;  %v1108_v62 = vld [vmem:[%s2029_s21 + $0x70] sm:$0xff]  ;;  %v1107_v63 = vld [vmem:[%s2029_s21 + $0x68] sm:$0xff]  ;;  %s1091_s29 = sadd.s32 1, %s1632_s29  }
 0x77d   : >> { %1115 = vmatpush.msra.mxu0 %v1109_v61  ;;  %v1106_v2 = vld [vmem:[%s2029_s21 + $0x60] sm:$0xff]  ;;  %v1153_v3 = vld [vmem:[%s2037_s24 + $0x78] sm:$0xff]  ;;  %v1152_v4 = vld [vmem:[%s2037_s24 + $0x70] sm:$0xff]  ;;  %p1088_p2 = scmp.ge.s32.totalorder %s1091_s29, 2  }
 0x77e   : >> { %v1105_v5 = vld [vmem:[%s2029_s21 + $0x58] sm:$0xff]  ;;  %1154 = vmatpush.msra.mxu1 %v1153_v3  ;;  %v1151_v6 = vld [vmem:[%s2037_s24 + $0x68] sm:$0xff]  ;;  %v1104_v7 = vld [vmem:[%s2029_s21 + $0x50] sm:$0xff]  ;;  %s2192_s27 = sld [smem:[#allocation24_spill]] (%p1088_p2)  ;;  %s1346_s2 = sshll.u32 (%p1088_p2), %s1608_s0, 1 }
 0x77f   : >> { %1116 = vmatpush.msra.mxu0 %v1108_v62  ;;  %v1150_v8 = vld [vmem:[%s2037_s24 + $0x60] sm:$0xff]  ;;  %v1103_v9 = vld [vmem:[%s2029_s21 + $0x48] sm:$0xff]  ;;  %v1149_v10 = vld [vmem:[%s2037_s24 + $0x58] sm:$0xff]  ;;  %s2194_s26 = scalar_lea.vmem (%p1088_p2), [#allocation5], %s1818_s17  ;;  %s1195_s19 = sadd.s32 (%p1088_p2), %s1604_s30, %s1346_s2 }
 0x780   : >> { %1155 = vmatpush.msra.mxu1 %v1152_v4  ;;  %v1102_v11 = vld [vmem:[%s2029_s21 + $0x40] sm:$0xff]  ;;  %v1148_v14 = vld [vmem:[%s2037_s24 + $0x50] sm:$0xff]  ;;  %v1101_v15 = vld [vmem:[%s2029_s21 + $0x38] sm:$0xff]  ;;  %s1347_s29 = sshll.u32 (%p1088_p2), %s1195_s19, 3  ;;  %s2195_s25 = sld [smem:[#allocation25_spill]] (%p1088_p2) }
 0x781   : >> { %1117 = vmatpush.msra.mxu0 %v1107_v63  ;;  %v1147_v16 = vld [vmem:[%s2037_s24 + $0x48] sm:$0xff]  ;;  %v1100_v17 = vld [vmem:[%s2029_s21 + $0x30] sm:$0xff]  ;;  %v1146_v18 = vld [vmem:[%s2037_s24 + $0x40] sm:$0xff]  ;;  %s2196_s22 = smov (%p1088_p2), %s2194_s26  ;;  %s2197_s3 = sand.u32 (%p1088_p2), 1, %s1596_s28  }
 0x782   : >> { %1156 = vmatpush.msra.mxu1 %v1151_v6  ;;  %v1099_v19 = vld [vmem:[%s2029_s21 + $0x28] sm:$0xff]  ;;  %v1145_v20 = vld [vmem:[%s2037_s24 + $0x38] sm:$0xff]  ;;  %v1098_v21 = vld [vmem:[%s2029_s21 + $0x20] sm:$0xff] }
 0x783   : >> { %1118 = vmatpush.msra.mxu0 %v1106_v2  ;;  %v1144_v22 = vld [vmem:[%s2037_s24 + $0x30] sm:$0xff]  ;;  %v1097_v23 = vld [vmem:[%s2029_s21 + $0x18] sm:$0xff]  ;;  %v1143_v24 = vld [vmem:[%s2037_s24 + $0x28] sm:$0xff] }
 0x784   : >> { %1157 = vmatpush.msra.mxu1 %v1150_v8  ;;  %v1096_v25 = vld [vmem:[%s2029_s21 + $0x10] sm:$0xff]  ;;  %v1142_v26 = vld [vmem:[%s2037_s24 + $0x20] sm:$0xff]  ;;  %v1095_v27 = vld [vmem:[%s2029_s21 + $0x8] sm:$0xff] }
 0x785   : >> { %1119 = vmatpush.msra.mxu0 %v1105_v5  ;;  %v1141_v28 = vld [vmem:[%s2037_s24 + $0x18] sm:$0xff]  ;;  %v1094_v29 = vld [vmem:[%s2029_s21] sm:$0xff]  ;;  %v1140_v30 = vld [vmem:[%s2037_s24 + $0x10] sm:$0xff]  ;;  %s1199_s21 = sshll.u32 (%p1088_p2), %s2194_s26, 4  ;;  %s1200_s21 = int_to_ptr.vmem [resolvable:$true] %s1199_s21 }
 0x786   : >> { %1158 = vmatpush.msra.mxu1 %v1149_v10  ;;  %v1139_v31 = vld [vmem:[%s2037_s24 + $0x8] sm:$0xff]  ;;  %v1138_v33 = vld [vmem:[%s2037_s24] sm:$0xff]  ;;  %s1197_s20 = scalar_lea.hbm (%p1088_p2), %s2195_s25, %s1347_s29  ;;  %s1534_s2 = scalar_lea.hbm (%p1088_p2), %s2195_s25, 32 }
 0x787   : >> { %1120 = vmatpush.msra.mxu0 %v1104_v7  ;;  %v1513_v53 = vld [vmem:[%s2192_s27] ss:$0 sm:$0xff] (%p1088_p2)  ;;  %s1201_s23 = sshll.u32 (%p1088_p2), %s1197_s20, 4  ;;  %s1185_s27 = scalar_lea.sflag (%p1088_p2), [#allocation6], %s2197_s3  ;;  %s1202_s23 = int_to_ptr.hbm [resolvable:$true] %s1201_s23 }
 0x788   : >> { %1159 = vmatpush.msra.mxu1 %v1148_v14  ;;  %s1528_s4 = sshra.s32 (%p1088_p2), %s1202_s23, 4  ;;  %s1529_s4 = int_to_ptr.hbm [resolvable:$true] %s1528_s4 }
 0x789   : >> { %1121 = vmatpush.msra.mxu0 %v1103_v9  ;;  %s1530_s5 = scalar_lea.hbm (%p1088_p2), %s1529_s4, 8  ;;  %p1535_p7 = scmp.lt.s32.totalorder (%p1088_p2), %s1529_s4, %s2195_s25 }
 0x78a   : >> { %1160 = vmatpush.msra.mxu1 %v1147_v16  ;;  %p1531_p4 = scmp.ne.s32.totalorder (%p1088_p2), %s1529_s4, %s1530_s5  ;;  %p1536_p9 = scmp.lt.s32.totalorder (%p1088_p2), %s1534_s2, %s1530_s5 }
 0x78b   : >> { %1122 = vmatpush.msra.mxu0 %v1102_v11 }
 0x78c   : >> { %1161 = vmatpush.msra.mxu1 %v1146_v18  ;;  %p1532_p5 = pnand (%p1088_p2), %p1531_p4, %p1784_p3  ;;  %p1537_p10 = por (%p1088_p2), %p1536_p9, %p1535_p7 }
 0x78d   : >> { %1123 = vmatpush.msra.mxu0 %v1101_v15 }
 0x78e   : >> { %1162 = vmatpush.msra.mxu1 %v1145_v20  ;;  %p1533_p6 = pneg (%p1088_p2), %p1532_p5 }
 0x78f   : >> { %1124 = vmatpush.msra.mxu0 %v1100_v17 }
 0x790   : >> { %1163 = vmatpush.msra.mxu1 %v1144_v22  ;;  %p1538_p11 = pnand (%p1088_p2), %p1537_p10, %p1533_p6 }
 0x791   : >> { %1125 = vmatpush.msra.mxu0 %v1099_v19 }
 0x792   : >> { %1164 = vmatpush.msra.mxu1 %v1143_v24 }
 0x793   : >> { %1126 = vmatpush.msra.mxu0 %v1098_v21 }
 0x794   : >> { %1165 = vmatpush.msra.mxu1 %v1142_v26 }
 0x795   : >> { %1127 = vmatpush.msra.mxu0 %v1097_v23 }
 0x796   : >> { %1166 = vmatpush.msra.mxu1 %v1141_v28 }
 0x797   : >> { %1128 = vmatpush.msra.mxu0 %v1096_v25 }
 0x798   : >> { %1167 = vmatpush.msra.mxu1 %v1140_v30 }
 0x799   : >> { %1129 = vmatpush.msra.mxu0 %v1095_v27 }
 0x79a   : >> { %1168 = vmatpush.msra.mxu1 %v1139_v31 }
 0x79b   : >> { %1130 = vmatpush.msra.mxu0 %v1094_v29 }
 0x79c   : >> { %1131 = vmatmul.f32.vlgmr.msra.gmra.mxu0 %v2014_v59  ;;  %1169 = vmatpush.msra.mxu1 %v1138_v33 }
 0x819   : >> { %v1132_v35 = vpop.f32.mrf.mxu0 }
 0x81a   : >> { %v1133_v0 = vadd.f32 %v1512_v34, %v1132_v35 }
 0x81c   : >> { %v1135_v12 = vmax.f32 %v1133_v0, 0.0 }
 0x81e   : >> { %1170 = vmatmul.f32.vlgmr.msra.gmra.mxu1 %v1135_v12 }
 0x89a   : > { %1090 = sbr.rel (!%p1088_p2) target bundleno = 1914 (0x77a), region = 192 }
 0x89b   : >> { %v1171_v1 = vpop.f32.mrf.mxu1 }
 0x89c   : >> { %v1174_v37 = vadd.f32 %v1171_v1, %v1136_v36 }
 0x89e   : >> { %1175 = vst [vmem:[#allocation4] sm:$0xff] %v1174_v37 }
 0x8a5   : > { %v1176_v38 = vld [vmem:[#allocation4] sm:$0xff] }
 0x8a6   : > { %v1177_v39 = vadd.f32 %v1176_v38, %v2003_v32 }
 0x8a8   : > { %v1182_v13 = vadd.f32 %v1513_v53, %v1177_v39 }
 0x8aa   : > { %1183 = vst [vmem:[%s2196_s22] sm:$0xff] %v1182_v13 }
 0x8ab   : > { %1541 = shalt.err (!%p1538_p11)
}
 0x8ac   : > { %1383 = dma.vmem_to_hbm [thread:$0]  (%p1784_p3), %s1200_s21, 128, %s1202_s23, %s1185_s27  }
 0x8ad PF: > { %s2198_s3 = sld [smem:[#allocation12_spill]] }
 0x8ae   : > { %s2199_s17 = sld [smem:[#allocation8_spill]] }
 0x8b3   : > { %p1389_p12 = scmp.ge.s32.totalorder %s2198_s3, 2 }
 0x8b4   : > { %s1213_s18 = sand.u32 1, %s2199_s17  }
 0x8b5   : > { %p1386_p13 = pnand %p1389_p12, %p1793_p8  ;;  %s1214_s24 = scalar_lea.sflag [#allocation6], %s1213_s18 }
 0x8b7   : > { %p1387_p0 = pneg %p1386_p13 }
 0x8b9   : > { %1587 = dma.done.wait (%p1387_p0), %s1214_s24, 128  }
 0x8ba   : > { %1589 = vsyncadd (%p1387_p0), %s1214_s24, 4294967168  ;;  %s31_s20 = sadd.s32 1, %s2198_s3   ;;  %s2201_s4 = sld [smem:[#allocation9_spill]] }
 0x8bb   : > { %p28_p1 = scmp.ge.s32.totalorder %s31_s20, 6   ;;  %s2202_s29 = sld [smem:[#allocation17_spill]] }
 0x8bc   : > { %s2203_s30 = sld [smem:[#allocation10_spill]]  ;;  %s2207_s27 = smov %s1596_s28 }
 0x8bd   : > { %s2204_s0 = sld [smem:[#allocation11_spill]]  ;;  %30 = sbr.rel (!%p28_p1) target bundleno = 14 (0xe), region = 203 }
 0x8be   : > { %s2205_s19 = sld [smem:[#allocation13_spill]] }
 0x8bf   : > { %s2206_s1 = sld [smem:[#allocation15_spill]] }
 0x8c0   : > { %s2208_s28 = smov %s2201_s4 }
 0x8c2   :  { %1220 = vsyncpa [#allocation6], 1 }
 0x8c3   :  { %1222 = vsyncpa [#allocation6 + $0x1], 1 }

// kernel: tpu_custom_call.1
= control target key start
LH: loop header
LB: loop body
LE: loop exit
PB: predicated region body
PF: predicated region fallthrough
CT: control target
= control target key end

     0   :  { %s2130_s0 = inlined_call_operand.vmem [shape: f32[2,16,128], index: 0, kind: input, shape index: {}]   ;;  %s2131_s1 = inlined_call_operand.vmem [shape: f32[2,1,16], index: 1, kind: input, shape index: {}]   ;;  %s2132_s2 = inlined_call_operand.vmem [shape: f32[1,128], index: 2, kind: input, shape index: {}]   ;;  %s2133_s3 = inlined_call_operand.vmem [shape: f32[1,128], index: 3, kind: input, shape index: {}]   ;;  %s2134_s4 = inlined_call_operand.vmem [shape: f32[4,128,32], index: 4, kind: input, shape index: {}]   ;;  %s2135_s5 = inlined_call_operand.vmem [shape: f32[4,1,32], index: 5, kind: input, shape index: {}]   ;;  %s2136_s6 = inlined_call_operand.vmem [shape: f32[4,128,32], index: 6, kind: input, shape index: {}]   ;;  %s2137_s7 = inlined_call_operand.vmem [shape: f32[4,1,32], index: 7, kind: input, shape index: {}]   ;;  %s2138_s8 = inlined_call_operand.vmem [shape: f32[4,128,32], index: 8, kind: input, shape index: {}]   ;;  %s2139_s9 = inlined_call_operand.vmem [shape: f32[4,1,32], index: 9, kind: input, shape index: {}]   ;;  %s2140_s10 = inlined_call_operand.vmem [shape: f32[4,32,128], index: 10, kind: input, shape index: {}]   ;;  %s2141_s11 = inlined_call_operand.vmem [shape: f32[1,128], index: 11, kind: input, shape index: {}]   ;;  %s2142_s12 = inlined_call_operand.vmem [shape: f32[1,128], index: 12, kind: input, shape index: {}]   ;;  %s2143_s13 = inlined_call_operand.vmem [shape: f32[1,128], index: 13, kind: input, shape index: {}]   ;;  %s2144_s14 = inlined_call_operand.vmem [shape: f32[2,128,128], index: 14, kind: input, shape index: {}]   ;;  %s2145_s15 = inlined_call_operand.vmem [shape: f32[2,1,128], index: 15, kind: input, shape index: {}]   ;;  %s2146_s16 = inlined_call_operand.vmem [shape: f32[2,128,128], index: 16, kind: input, shape index: {}]   ;;  %s2147_s17 = inlined_call_operand.vmem [shape: f32[1,128], index: 17, kind: input, shape index: {}]   ;;  %s2148_s18 = inlined_call_operand.hbm [shape: f32[2,16,128], index: 18, kind: output, shape index: {}]  }
   0x1   :  { %2162 = sst [smem:[#allocation18_spill]] %s2130_s0 }
   0x2   :  { %2163 = sst [smem:[#allocation19_spill]] %s2131_s1 }
   0x3   :  { %2164 = sst [smem:[#allocation20_spill]] %s2132_s2 }
   0x4   :  { %2165 = sst [smem:[#allocation21_spill]] %s2133_s3 }
   0x5   :  { %2166 = sst [smem:[#allocation22_spill]] %s2134_s4 }
   0x6   :  { %2167 = sst [smem:[#allocation23_spill]] %s2135_s5 }
   0x7   :  { %2168 = sst [smem:[#allocation24_spill]] %s2147_s17 }
   0x8   :  { %2169 = sst [smem:[#allocation25_spill]] %s2148_s18 }
   0x9   :  { %23 = vsyncpa [#allocation6], 0 }
   0xa   :  { %25 = vsyncpa [#allocation6 + $0x1], 0  ;;  %s1733_s27 = smov 0   ;;  %s1735_s28 = smov 0  }
   0xb   :  { %s1737_s29 = smov 0   ;;  %s1739_s30 = smov 0  }
   0xc   :  { %s1741_s0 = smov 0   ;;  %s1743_s19 = smov 0  }
   0xd   :  { %s1745_s1 = smov 0   ;;  %s1747_s20 = smov 0  }
   0xe LB: > { %2170 = sst [smem:[#allocation8_spill]] %s1592_s27  ;;  %s1324_s21 = sadd.s32 4294967295, %s1620_s20   ;;  %s1620_s20 = sphi %s1747_s20, %s31_s20   ;;  %s1616_s1 = sphi %s1745_s1, %s2206_s1   ;;  %s1612_s19 = sphi %s1743_s19, %s2205_s19   ;;  %s1608_s0 = sphi %s1741_s0, %s2204_s0   ;;  %s1604_s30 = sphi %s1739_s30, %s2203_s30   ;;  %s1600_s29 = sphi %s1737_s29, %s2202_s29   ;;  %s1596_s28 = sphi %s1735_s28, %s2208_s28   ;;  %s1592_s27 = sphi %s1733_s27, %s2207_s27  }
   0xf   : > { %2171 = sst [smem:[#allocation9_spill]] %s1600_s29  ;;  %s1325_s22 = sadd.s32 4294967294, %s1620_s20  }
  0x10   : > { %2172 = sst [smem:[#allocation10_spill]] %s1612_s19  ;;  %s40_s2 = sadd.s32 1, %s1612_s19 }
  0x11   : > { %2173 = sst [smem:[#allocation11_spill]] %s1616_s1  ;;  %p41_p0 = scmp.ge.s32.totalorder %s40_s2, 2 }
  0x12   : > { %2174 = sst [smem:[#allocation12_spill]] %s1620_s20  ;;  %s43_s23 = sadd.s32 1, %s1616_s1 }
  0x13   : > { %p450_p1 = scmp.ne.s32.totalorder %s1600_s29, %s1596_s28  ;;  %p451_p2 = scmp.eq.s32.totalorder %s1324_s21, 3 }
  0x14   : > { %s2210_s2 = smov (%p41_p0, %s40_s2), 0  ;;  %s2212_s23 = smov (!%p41_p0, %s43_s23), %s1616_s1 }
  0x15   : > { %2175 = sst [smem:[#allocation13_spill]] %s2210_s2  ;;  %s436_s24 = ssub.s32 %s1612_s19, %s2210_s2 }
  0x16   : > { %p1784_p3 = por %p451_p2, %p450_p1  ;;  %p45_p4 = scmp.ge.s32.totalorder %s2212_s23, 2 }
  0x17   : > { %p456_p5 = scmp.ne.s32.totalorder %s1596_s28, %s1592_s27  ;;  %p457_p6 = scmp.eq.s32.totalorder %s1325_s22, 3 }
  0x18   : > { %s2176_s25 = scalar_select %p1784_p3, 1, 0 }
  0x19   : > { %p1328_p7 = scmp.ge.s32.totalorder %s1620_s20, 1  ;;  %s2214_s23 = smov (%p45_p4, %s2212_s23), 0 }
  0x1a   : > { %2177 = sst [smem:[#allocation14_spill]] %s2176_s25  ;;  %p1793_p8 = por %p457_p6, %p456_p5 }
  0x1b   : > { %2178 = sst [smem:[#allocation15_spill]] %s2214_s23  ;;  %p537_p9 = scmp.lt.s32.totalorder %s1620_s20, 5 }
  0x1c   : > { %s2179_s26 = scalar_select %p1793_p8, 1, 0 }
  0x1d   : > { %s435_s21 = ssub.s32 %s1616_s1, %s2214_s23  ;;  %s440_s18 = sadd.s32 1, %s1600_s29 }
  0x1e   : > { %2180 = sst [smem:[#allocation16_spill]] %s2179_s26  ;;  %s437_s17 = sor.u32 %s436_s24, %s435_s21 }
  0x1f   : > { %p538_p10 = pnand %p1328_p7, %p537_p9  ;;  %p438_p11 = scmp.eq.s32.totalorder %s437_s17, 0 }
  0x20   : > { %s2161_s22 = sand.u32 (!%p538_p10), 1, %s1596_s28   ;;  %p594_p12 = scmp.lt.s32.totalorder (!%p538_p10), %s1608_s0, 1 }
  0x21   : > { %s1802_s2 = scalar_select %p438_p11, %s1600_s29, %s440_s18  }
  0x22   : > { %541 = sbr.rel (%p538_p10) target bundleno = 2221 (0x8ad), region = 92  ;;  %s2182_s25 = sld [smem:[#allocation20_spill]] (!%p538_p10) }
  0x23   : > { %2181 = sst [smem:[#allocation17_spill]] %s1802_s2  ;;  %s1818_s17 = sshll.u32 (!%p538_p10), %s2161_s22, 3 }
  0x24   : > { %s2183_s3 = sld [smem:[#allocation21_spill]] (!%p538_p10)  ;;  %p1332_p13 = scmp.ne.s32.totalorder (!%p538_p10), %s1604_s30, 0 }
  0x25   : > { %s2185_s29 = sld [smem:[#allocation18_spill]] (!%p538_p10) }
  0x27   : > { %s1821_s18 = scalar_select %p594_p12, %s1608_s0, 1 }
  0x28   : > { %v1809_v0 = vld [vmem:[%s2182_s25] sm:$0x1]  ;;  %607 = sbr.rel (%p1332_p13) target bundleno = 507 (0x1fb), region = 96 }
  0x29   : > { %s1350_s24 = sshll.u32 %s1821_s18, 4 }
  0x2a   : > { %v1814_v1 = vld [vmem:[%s2183_s3] sm:$0x1] }
  0x2b   : > { %s1831_s20 = scalar_lea.vmem %s2185_s29, %s1350_s24  ;;  %s1848_s29 = smov (!%p1332_p13), 0  }
  0x2d   : > { %v608_v2 = vld [vmem:[%s1831_s20] sm:$0xff]  ;;  %v609_v3 = vld [vmem:[%s1831_s20 + $0x8] sm:$0xff]  ;;  %v1634_v4 = vmov 128.0   ;;  %v688_v49 = vperm.slane %v1809_v0, 0  ;;  %v695_v56 = vperm.slane %v1814_v1, 0 }
  0x2e   : > { %610 = vadd.xlane.f32.xlu0 %v608_v2  ;;  %1482 = vrcp.f32 %v1634_v4 }
  0x34   : > { %v1483_v5 = vpop.eup %1482 }
  0x35   : > { %v615_v6 = vmul.f32 128.0, %v1483_v5  ;;  %vm619_vm0 = vweird.f32 %v1483_v5 }
  0x36   : > { %612 = vadd.xlane.f32.xlu0 %v609_v3 }
  0x37   : > { %v616_v7 = vsub.f32 1.0, %v615_v6 }
  0x39   : > { %v617_v8 = vmul.f32 %v1483_v5, %v616_v7 }
  0x3b   : > { %v618_v9 = vadd.f32 %v1483_v5, %v617_v8 }
  0x3d   : > { %v620_v10 = vsel %vm619_vm0, %v1483_v5, %v618_v9 }
  0xa1   : > { %v611_v11 = vpop.xlane.xlu0 %610 }
  0xa2   : > { %v621_v12 = vmul.f32 %v620_v10, %v611_v11 }
  0xa4   : > { %v623_v13 = vsub.f32 %v608_v2, %v621_v12 }
  0xa6   : > { %v625_v14 = vmul.f32 %v623_v13, %v623_v13  ;;  %v690_v55 = vmul.f32 %v688_v49, %v623_v13 }
  0xa8   : > { %627 = vadd.xlane.f32.xlu1 %v625_v14 }
  0xa9   : > { %v613_v15 = vpop.xlane.xlu0 %612 }
  0xaa   : > { %v622_v16 = vmul.f32 %v620_v10, %v613_v15 }
  0xac   : > { %v1837_v17 = vsub.f32 %v609_v3, %v622_v16 }
  0xae   : > { %v626_v18 = vmul.f32 %v1837_v17, %v1837_v17  ;;  %v691_v6 = vmul.f32 %v688_v49, %v1837_v17 }
  0xb0   : > { %629 = vadd.xlane.f32.xlu1 %v626_v18 }
 0x11b   : > { %v628_v19 = vpop.xlane.xlu1 %627 }
 0x11c   : > { %v631_v20 = vmul.f32 0.007874016, %v628_v19 }
 0x11e   : > { %1484 = vrsqrt.f32 %v631_v20  ;;  %vm640_vm1 = vcmp.eq.f32.partialorder %v631_v20, inf  ;;  %v643_v33 = vand.u32 2147483648, %v631_v20  ;;  %vm642_vm2 = vcmp.eq.f32.partialorder %v631_v20, 0.0 }
 0x123   : > { %v630_v21 = vpop.xlane.xlu1 %629 }
 0x124   : > { %v1485_v22 = vpop.eup %1484  ;;  %v632_v23 = vmul.f32 0.007874016, %v630_v21 }
 0x125   : > { %v634_v24 = vmul.f32 %v1485_v22, %v631_v20 }
 0x126   : > { %1486 = vrsqrt.f32 %v632_v23  ;;  %vm652_vm3 = vcmp.eq.f32.partialorder %v632_v23, inf  ;;  %v655_v41 = vand.u32 2147483648, %v632_v23  ;;  %vm654_vm4 = vcmp.eq.f32.partialorder %v632_v23, 0.0 }
 0x127   : > { %v635_v25 = vmul.f32 %v1485_v22, %v634_v24 }
 0x129   : > { %v636_v26 = vmul.f32 0.5, %v635_v25 }
 0x12b   : > { %v637_v27 = vsub.f32 1.5, %v636_v26 }
 0x12c   : > { %v1487_v28 = vpop.eup %1486 }
 0x12d   : > { %v638_v29 = vmul.f32 %v1485_v22, %v637_v27  ;;  %v646_v30 = vmul.f32 %v1487_v28, %v632_v23 }
 0x12f   : > { %v639_v31 = vmul.f32 %v638_v29, %v631_v20  ;;  %v647_v32 = vmul.f32 %v1487_v28, %v646_v30 }
 0x131   : > { %v641_v34 = vsel %vm640_vm1, %v631_v20, %v639_v31  ;;  %v648_v35 = vmul.f32 0.5, %v647_v32 }
 0x132   : > { %v644_v36 = vsel %vm642_vm2, %v643_v33, %v641_v34 }
 0x133   : > { %v657_v37 = vadd.f32 1e-06, %v644_v36  ;;  %v649_v38 = vsub.f32 1.5, %v648_v35 }
 0x135   : > { %1488 = vrcp.f32 %v657_v37  ;;  %v650_v39 = vmul.f32 %v1487_v28, %v649_v38  ;;  %v670_v48 = vand.u32 2147483648, %v657_v37  ;;  %v668_v51 = vand.u32 2147483647, %v657_v37 }
 0x136   : > { %vm664_vm6 = vweird.f32 %v657_v37 }
 0x137   : > { %v651_v40 = vmul.f32 %v650_v39, %v632_v23  ;;  %v671_v53 = vor.u32 1.1754944e-38, %v670_v48  ;;  %vm669_vm8 = vcmp.eq.f32.partialorder %v668_v51, 8.507059e+37 }
 0x139   : > { %v653_v42 = vsel %vm652_vm3, %v632_v23, %v651_v40 }
 0x13a   : > { %v656_v44 = vsel %vm654_vm4, %v655_v41, %v653_v42 }
 0x13b   : > { %v1489_v43 = vpop.eup %1488  ;;  %v658_v46 = vadd.f32 1e-06, %v656_v44 }
 0x13c   : > { %v660_v45 = vmul.f32 %v1489_v43, %v657_v37  ;;  %vm665_vm5 = vweird.f32 %v1489_v43 }
 0x13d   : > { %1490 = vrcp.f32 %v658_v46  ;;  %vm666_vm7 = vmor %vm664_vm6, %vm665_vm5  ;;  %v684_v63 = vand.u32 2147483648, %v658_v46  ;;  %v682_v3 = vand.u32 2147483647, %v658_v46  ;;  %vm678_vm10 = vweird.f32 %v658_v46 }
 0x13e   : > { %v661_v47 = vsub.f32 1.0, %v660_v45 }
 0x13f   : > { %v685_v5 = vor.u32 1.1754944e-38, %v684_v63  ;;  %vm683_vm12 = vcmp.eq.f32.partialorder %v682_v3, 8.507059e+37 }
 0x140   : > { %v662_v50 = vmul.f32 %v1489_v43, %v661_v47 }
 0x142   : > { %v663_v52 = vadd.f32 %v1489_v43, %v662_v50 }
 0x143   : > { %v1491_v54 = vpop.eup %1490 }
 0x144   : > { %v667_v57 = vsel %vm666_vm7, %v1489_v43, %v663_v52  ;;  %v674_v59 = vmul.f32 %v1491_v54, %v658_v46  ;;  %vm679_vm9 = vweird.f32 %v1491_v54 }
 0x145   : > { %v672_v58 = vsel %vm669_vm8, %v671_v53, %v667_v57  ;;  %vm680_vm11 = vmor %vm678_vm10, %vm679_vm9 }
 0x146   : > { %v692_v60 = vmul.f32 %v690_v55, %v672_v58  ;;  %v675_v61 = vsub.f32 1.0, %v674_v59 }
 0x148   : > { %v1843_v62 = vadd.f32 %v695_v56, %v692_v60  ;;  %v676_v2 = vmul.f32 %v1491_v54, %v675_v61 }
 0x14a   : > { %v677_v4 = vadd.f32 %v1491_v54, %v676_v2 }
 0x14c   : > { %v681_v7 = vsel %vm680_vm11, %v1491_v54, %v677_v4 }
 0x14d   : > { %v686_v8 = vsel %vm683_vm12, %v685_v5, %v681_v7 }
 0x14e   : > { %v693_v9 = vmul.f32 %v691_v6, %v686_v8 }
 0x150   : > { %v1846_v10 = vadd.f32 %v695_v56, %v693_v9 }
 0x151 LB: >> { %s1333_s1 = sshll.u32 %s1624_s29, 7  ;;  %s723_s24 = scalar_lea.vmem %s2137_s7, %s1624_s29  ;;  %vm753_vm13 = vcmask 261120   ;;  %s1624_s29 = sphi %s1848_s29, %s704_s29  }
 0x152   : >> { %s1861_s25 = scalar_lea.vmem %s2136_s6, %s1333_s1  ;;  %s1866_s27 = scalar_lea.vmem %s2138_s8, %s1333_s1  ;;  %v1492_v43 = vld [vmem:[%s723_s24] ss:$0 sm:$0xff] }
 0x153   : >> { %v722_v11 = vld [vmem:[%s1861_s25 + $0x78] sm:$0xff]  ;;  %v721_v13 = vld [vmem:[%s1861_s25 + $0x70] sm:$0xff]  ;;  %v720_v15 = vld [vmem:[%s1861_s25 + $0x68] sm:$0xff]  ;;  %s1334_s26 = sshll.u32 %s1624_s29, 4 }
 0x154   : >> { %v772_v12 = vld [vmem:[%s1866_s27 + $0x78] sm:$0xff]  ;;  %1351 = vmatpush.msra.mxu2 %v722_v11  ;;  %v771_v14 = vld [vmem:[%s1866_s27 + $0x70] sm:$0xff]  ;;  %v770_v16 = vld [vmem:[%s1866_s27 + $0x68] sm:$0xff]  ;;  %728 = vmatpush.msra.mxu0 %v722_v11  ;;  %s752_s21 = scalar_lea.vmem [#allocation2], %s1334_s26  ;;  %s801_s19 = scalar_lea.vmem [#allocation3], %s1334_s26 }
 0x155   : >> { %1367 = vmatpush.msra.mxu3 %v772_v12  ;;  %778 = vmatpush.msra.mxu1 %v772_v12  ;;  %v719_v17 = vld [vmem:[%s1861_s25 + $0x60] sm:$0xff]  ;;  %v718_v19 = vld [vmem:[%s1861_s25 + $0x58] sm:$0xff]  ;;  %v717_v21 = vld [vmem:[%s1861_s25 + $0x50] sm:$0xff] }
 0x156   : >> { %1352 = vmatpush.msra.mxu2 %v721_v13  ;;  %v769_v18 = vld [vmem:[%s1866_s27 + $0x60] sm:$0xff]  ;;  %729 = vmatpush.msra.mxu0 %v721_v13  ;;  %v768_v20 = vld [vmem:[%s1866_s27 + $0x58] sm:$0xff]  ;;  %v767_v22 = vld [vmem:[%s1866_s27 + $0x50] sm:$0xff] }
 0x157   : >> { %1368 = vmatpush.msra.mxu3 %v771_v14  ;;  %779 = vmatpush.msra.mxu1 %v771_v14  ;;  %v716_v23 = vld [vmem:[%s1861_s25 + $0x48] sm:$0xff]  ;;  %v715_v25 = vld [vmem:[%s1861_s25 + $0x40] sm:$0xff]  ;;  %v714_v27 = vld [vmem:[%s1861_s25 + $0x38] sm:$0xff] }
 0x158   : >> { %1353 = vmatpush.msra.mxu2 %v720_v15  ;;  %730 = vmatpush.msra.mxu0 %v720_v15  ;;  %v766_v24 = vld [vmem:[%s1866_s27 + $0x48] sm:$0xff]  ;;  %v765_v26 = vld [vmem:[%s1866_s27 + $0x40] sm:$0xff]  ;;  %v764_v28 = vld [vmem:[%s1866_s27 + $0x38] sm:$0xff] }
 0x159   : >> { %1369 = vmatpush.msra.mxu3 %v770_v16  ;;  %780 = vmatpush.msra.mxu1 %v770_v16  ;;  %v713_v29 = vld [vmem:[%s1861_s25 + $0x30] sm:$0xff]  ;;  %v712_v31 = vld [vmem:[%s1861_s25 + $0x28] sm:$0xff]  ;;  %v711_v33 = vld [vmem:[%s1861_s25 + $0x20] sm:$0xff] }
 0x15a   : >> { %1354 = vmatpush.msra.mxu2 %v719_v17  ;;  %731 = vmatpush.msra.mxu0 %v719_v17  ;;  %v763_v30 = vld [vmem:[%s1866_s27 + $0x30] sm:$0xff]  ;;  %v762_v32 = vld [vmem:[%s1866_s27 + $0x28] sm:$0xff]  ;;  %v761_v34 = vld [vmem:[%s1866_s27 + $0x20] sm:$0xff] }
 0x15b   : >> { %1370 = vmatpush.msra.mxu3 %v769_v18  ;;  %781 = vmatpush.msra.mxu1 %v769_v18  ;;  %v710_v35 = vld [vmem:[%s1861_s25 + $0x18] sm:$0xff]  ;;  %v709_v37 = vld [vmem:[%s1861_s25 + $0x10] sm:$0xff]  ;;  %v708_v39 = vld [vmem:[%s1861_s25 + $0x8] sm:$0xff] }
 0x15c   : >> { %1355 = vmatpush.msra.mxu2 %v718_v19  ;;  %732 = vmatpush.msra.mxu0 %v718_v19  ;;  %v760_v36 = vld [vmem:[%s1866_s27 + $0x18] sm:$0xff]  ;;  %v759_v38 = vld [vmem:[%s1866_s27 + $0x10] sm:$0xff]  ;;  %v758_v40 = vld [vmem:[%s1866_s27 + $0x8] sm:$0xff] }
 0x15d   : >> { %1371 = vmatpush.msra.mxu3 %v768_v20  ;;  %782 = vmatpush.msra.mxu1 %v768_v20  ;;  %v707_v41 = vld [vmem:[%s1861_s25] sm:$0xff] }
 0x15e   : >> { %1356 = vmatpush.msra.mxu2 %v717_v21  ;;  %733 = vmatpush.msra.mxu0 %v717_v21  ;;  %v757_v42 = vld [vmem:[%s1866_s27] sm:$0xff]  ;;  %s773_s27 = scalar_lea.vmem %s2139_s9, %s1624_s29  ;;  %s704_s29 = sadd.s32 1, %s1624_s29  }
 0x15f   : >> { %1372 = vmatpush.msra.mxu3 %v767_v22  ;;  %783 = vmatpush.msra.mxu1 %v767_v22  ;;  %v1493_v44 = vld [vmem:[%s773_s27] ss:$0 sm:$0xff]  ;;  %p701_p0 = scmp.ge.s32.totalorder %s704_s29, 4  }
 0x160   : >> { %1357 = vmatpush.msra.mxu2 %v716_v23  ;;  %734 = vmatpush.msra.mxu0 %v716_v23 }
 0x161   : >> { %1373 = vmatpush.msra.mxu3 %v766_v24  ;;  %784 = vmatpush.msra.mxu1 %v766_v24 }
 0x162   : >> { %1358 = vmatpush.msra.mxu2 %v715_v25  ;;  %735 = vmatpush.msra.mxu0 %v715_v25 }
 0x163   : >> { %1374 = vmatpush.msra.mxu3 %v765_v26  ;;  %785 = vmatpush.msra.mxu1 %v765_v26 }
 0x164   : >> { %1359 = vmatpush.msra.mxu2 %v714_v27  ;;  %736 = vmatpush.msra.mxu0 %v714_v27 }
 0x165   : >> { %1375 = vmatpush.msra.mxu3 %v764_v28  ;;  %786 = vmatpush.msra.mxu1 %v764_v28 }
 0x166   : >> { %1360 = vmatpush.msra.mxu2 %v713_v29  ;;  %737 = vmatpush.msra.mxu0 %v713_v29 }
 0x167   : >> { %1376 = vmatpush.msra.mxu3 %v763_v30  ;;  %787 = vmatpush.msra.mxu1 %v763_v30 }
 0x168   : >> { %1361 = vmatpush.msra.mxu2 %v712_v31  ;;  %738 = vmatpush.msra.mxu0 %v712_v31 }
 0x169   : >> { %1377 = vmatpush.msra.mxu3 %v762_v32  ;;  %788 = vmatpush.msra.mxu1 %v762_v32 }
 0x16a   : >> { %1362 = vmatpush.msra.mxu2 %v711_v33  ;;  %739 = vmatpush.msra.mxu0 %v711_v33 }
 0x16b   : >> { %1378 = vmatpush.msra.mxu3 %v761_v34  ;;  %789 = vmatpush.msra.mxu1 %v761_v34 }
 0x16c   : >> { %1363 = vmatpush.msra.mxu2 %v710_v35  ;;  %740 = vmatpush.msra.mxu0 %v710_v35 }
 0x16d   : >> { %1379 = vmatpush.msra.mxu3 %v760_v36  ;;  %790 = vmatpush.msra.mxu1 %v760_v36 }
 0x16e   : >> { %1364 = vmatpush.msra.mxu2 %v709_v37  ;;  %741 = vmatpush.msra.mxu0 %v709_v37 }
 0x16f   : >> { %1380 = vmatpush.msra.mxu3 %v759_v38  ;;  %791 = vmatpush.msra.mxu1 %v759_v38 }
 0x170   : >> { %1365 = vmatpush.msra.mxu2 %v708_v39  ;;  %742 = vmatpush.msra.mxu0 %v708_v39 }
 0x171   : >> { %1381 = vmatpush.msra.mxu3 %v758_v40  ;;  %792 = vmatpush.msra.mxu1 %v758_v40 }
 0x172   : >> { %1366 = vmatpush.msra.mxu2 %v707_v41  ;;  %743 = vmatpush.msra.mxu0 %v707_v41 }
 0x173   : >> { %1382 = vmatpush.msra.mxu3 %v757_v42  ;;  %747 = vmatmul.f32.vlgmr.msra.gmra.mxu2 %v1846_v10 }
 0x174   : >> { %797 = vmatmul.f32.vlgmr.msra.gmra.mxu3 %v1846_v10  ;;  %793 = vmatpush.msra.mxu1 %v757_v42 }
 0x175   : >> { %744 = vmatmul.f32.vlgmr.msra.gmra.mxu0 %v1843_v62  ;;  %794 = vmatmul.f32.vlgmr.msra.gmra.mxu1 %v1843_v62 }
 0x1f2   : >> { %v745_v45 = vpop.f32.mrf.mxu0  ;;  %v795_v46 = vpop.f32.mrf.mxu1 }
 0x1f3   : >> { %v746_v47 = vadd.f32 %v1492_v43, %v745_v45  ;;  %v796_v48 = vadd.f32 %v1493_v44, %v795_v46 }
 0x1f5   : >> { %754 = vst.msk [vmem:[%s752_s21] sm:$0xff] %vm753_vm13, %v746_v47 }
 0x1f6   : >> { %v748_v49 = vpop.f32.mrf.mxu2  ;;  %802 = vst.msk [vmem:[%s801_s19] sm:$0xff] %vm753_vm13, %v796_v48  ;;  %703 = sbr.rel (!%p701_p0) target bundleno = 337 (0x151), region = 170 }
 0x1f7   : >> { %v798_v50 = vpop.f32.mrf.mxu3  ;;  %v749_v51 = vadd.f32 %v1492_v43, %v748_v49 }
 0x1f8   : >> { %v799_v52 = vadd.f32 %v1493_v44, %v798_v50 }
 0x1f9   : >> { %755 = vst.msk [vmem:[%s752_s21 + $0x8] sm:$0xff] %vm753_vm13, %v749_v51 }
 0x1fa   : >> { %803 = vst.msk [vmem:[%s801_s19 + $0x8] sm:$0xff] %vm753_vm13, %v799_v52 }
 0x1fb PF: > { %s1335_s24 = sshll.u32 %s1604_s30, 3  ;;  %v1635_v54 = vmov 128.0   ;;  %s2186_s22 = sld [smem:[#allocation19_spill]]  ;;  %v1636_v8 = vmov 0   ;;  %v1637_v13 = vmov 0.0   ;;  %v850_v26 = vperm.slane %v1809_v0, 0 }
 0x1fc   : > { %s805_s25 = scalar_lea.vmem %s1831_s20, %s1335_s24  ;;  %1494 = vrcp.f32 %v1635_v54  ;;  %863 = vst [vmem:[#allocation4] sm:$0xff] %v1637_v13  ;;  %v855_v32 = vperm.slane %v1814_v1, 0 }
 0x1fd   : > { %v1919_v53 = vld [vmem:[%s805_s25] sm:$0xff] }
 0x1fe   : > { %807 = vadd.xlane.f32.xlu0 %v1919_v53 }
 0x201   : > { %s2187_s23 = scalar_lea.vmem %s2186_s22, %s1821_s18  ;;  %s1940_s18 = smov 0  }
 0x202   : > { %v1495_v55 = vpop.eup %1494  ;;  %v858_v5 = vld [vmem:[%s2187_s23] sm:$0x1] }
 0x203   : > { %v810_v56 = vmul.f32 128.0, %v1495_v55  ;;  %vm814_vm14 = vweird.f32 %v1495_v55  ;;  %vm859_vm15 = vcmp.eq.f32.partialorder %v858_v5, 0.0 }
 0x204   : > { %v860_v9 = vsel %vm859_vm15, 1, %v1636_v8 }
 0x205   : > { %v811_v57 = vsub.f32 1.0, %v810_v56  ;;  %v861_v10 = vperm.slane %v860_v9, 0 }
 0x207   : > { %v812_v58 = vmul.f32 %v1495_v55, %v811_v57  ;;  %vm1931_vm0 = vcmp.eq.s32.totalorder %v861_v10, 1 }
 0x209   : > { %v813_v59 = vadd.f32 %v1495_v55, %v812_v58 }
 0x20b   : > { %v1922_v60 = vsel %vm814_vm14, %v1495_v55, %v813_v59 }
 0x271   : > { %v808_v61 = vpop.xlane.xlu0 %807 }
 0x272   : > { %v816_v62 = vmul.f32 %v1922_v60, %v808_v61 }
 0x274   : > { %v817_v63 = vsub.f32 %v1919_v53, %v816_v62 }
 0x276   : > { %v818_v2 = vmul.f32 %v817_v63, %v817_v63  ;;  %v852_v31 = vmul.f32 %v850_v26, %v817_v63 }
 0x278   : > { %819 = vadd.xlane.f32.xlu0 %v818_v2 }
 0x2eb   : > { %v820_v3 = vpop.xlane.xlu0 %819 }
 0x2ec   : > { %v821_v4 = vmul.f32 0.007874016, %v820_v3 }
 0x2ee   : > { %1496 = vrsqrt.f32 %v821_v4  ;;  %vm829_vm1 = vcmp.eq.f32.partialorder %v821_v4, inf  ;;  %v832_v18 = vand.u32 2147483648, %v821_v4  ;;  %vm831_vm2 = vcmp.eq.f32.partialorder %v821_v4, 0.0 }
 0x2f4   : > { %v1497_v6 = vpop.eup %1496 }
 0x2f5   : > { %v823_v7 = vmul.f32 %v1497_v6, %v821_v4 }
 0x2f7   : > { %v824_v11 = vmul.f32 %v1497_v6, %v823_v7 }
 0x2f9   : > { %v825_v14 = vmul.f32 0.5, %v824_v11 }
 0x2fb   : > { %v826_v15 = vsub.f32 1.5, %v825_v14 }
 0x2fd   : > { %v827_v16 = vmul.f32 %v1497_v6, %v826_v15 }
 0x2ff   : > { %v828_v17 = vmul.f32 %v827_v16, %v821_v4 }
 0x301   : > { %v830_v19 = vsel %vm829_vm1, %v821_v4, %v828_v17 }
 0x302   : > { %v833_v20 = vsel %vm831_vm2, %v832_v18, %v830_v19 }
 0x303   : > { %v834_v21 = vadd.f32 1e-06, %v833_v20 }
 0x305   : > { %1498 = vrcp.f32 %v834_v21  ;;  %v846_v25 = vand.u32 2147483648, %v834_v21  ;;  %v844_v28 = vand.u32 2147483647, %v834_v21  ;;  %vm840_vm4 = vweird.f32 %v834_v21 }
 0x307   : > { %v847_v30 = vor.u32 1.1754944e-38, %v846_v25  ;;  %vm845_vm6 = vcmp.eq.f32.partialorder %v844_v28, 8.507059e+37 }
 0x30b   : > { %v1499_v22 = vpop.eup %1498 }
 0x30c   : > { %v836_v23 = vmul.f32 %v1499_v22, %v834_v21  ;;  %vm841_vm3 = vweird.f32 %v1499_v22 }
 0x30d   : > { %vm842_vm5 = vmor %vm840_vm4, %vm841_vm3 }
 0x30e   : > { %v837_v24 = vsub.f32 1.0, %v836_v23 }
 0x310   : > { %v838_v27 = vmul.f32 %v1499_v22, %v837_v24 }
 0x312   : > { %v839_v29 = vadd.f32 %v1499_v22, %v838_v27 }
 0x314   : > { %v843_v33 = vsel %vm842_vm5, %v1499_v22, %v839_v29 }
 0x315   : > { %v848_v34 = vsel %vm845_vm6, %v847_v30, %v843_v33 }
 0x316   : > { %v853_v35 = vmul.f32 %v852_v31, %v848_v34 }
 0x318   : > { %v1938_v36 = vadd.f32 %v855_v32, %v853_v35 }
 0x319 LB: >> { %s1336_s27 = sshll.u32 %s1628_s18, 7  ;;  %s2190_s4 = sld [smem:[#allocation22_spill]]  ;;  %vm917_vm7 = vcmask 261120   ;;  %vm949_vm8 = vcmask 130048   ;;  %v1000_v26 = vld [vmem:[#allocation4] sm:$0xff]  ;;  %s1628_s18 = sphi %s1940_s18, %s869_s18  }
 0x31a   : >> { %s1337_s21 = sshll.u32 %s1628_s18, 4  ;;  %s2191_s5 = sld [smem:[#allocation23_spill]] }
 0x31b   : >> { %s914_s20 = scalar_lea.vmem [#allocation2], %s1337_s21  ;;  %s974_s23 = scalar_lea.vmem [#allocation3], %s1337_s21 }
 0x31c   : >> { %v916_v39 = vld [vmem:[%s914_s20 + $0x8] sm:$0xff]  ;;  %v915_v52 = vld [vmem:[%s914_s20] sm:$0xff] }
 0x31d   : >> { %1338 = vmatpush.xpose.msk.msra.mxu1 %vm917_vm7, %v916_v39  ;;  %v976_v5 = vld [vmem:[%s974_s23 + $0x8] sm:$0xff]  ;;  %v975_v6 = vld [vmem:[%s974_s23] sm:$0xff] }
 0x31e   : >> { %994 = vmatpush.msra.mxu2 %v976_v5 }
 0x31f   : >> { %s1949_s26 = scalar_lea.vmem %s2190_s4, %s1336_s27  ;;  %s1342_s27 = sshll.u32 %s1628_s18, 5 }
 0x320   : >> { %v887_v0 = vld [vmem:[%s1949_s26 + $0x78] sm:$0xff]  ;;  %v886_v1 = vld [vmem:[%s1949_s26 + $0x70] sm:$0xff]  ;;  %v885_v37 = vld [vmem:[%s1949_s26 + $0x68] sm:$0xff]  ;;  %s888_s25 = scalar_lea.vmem %s2191_s5, %s1628_s18  ;;  %995 = vmatpush.msra.mxu2 %v975_v6  ;;  %s869_s18 = sadd.s32 1, %s1628_s18  }
 0x321   : >> { %893 = vmatpush.msra.mxu0 %v887_v0  ;;  %v884_v38 = vld [vmem:[%s1949_s26 + $0x60] sm:$0xff]  ;;  %v883_v40 = vld [vmem:[%s1949_s26 + $0x58] sm:$0xff]  ;;  %v882_v41 = vld [vmem:[%s1949_s26 + $0x50] sm:$0xff]  ;;  %1339 = vmatpush.xpose.msk.msra.mxu1 %vm917_vm7, %v915_v52  ;;  %p866_p1 = scmp.ge.s32.totalorder %s869_s18, 4  }
 0x322   : >> { %v881_v42 = vld [vmem:[%s1949_s26 + $0x48] sm:$0xff]  ;;  %v880_v43 = vld [vmem:[%s1949_s26 + $0x40] sm:$0xff]  ;;  %v879_v44 = vld [vmem:[%s1949_s26 + $0x38] sm:$0xff]  ;;  %s2016_s29 = smov (%p866_p1), 0  }
 0x323   : >> { %894 = vmatpush.msra.mxu0 %v886_v1  ;;  %v878_v45 = vld [vmem:[%s1949_s26 + $0x30] sm:$0xff]  ;;  %v877_v46 = vld [vmem:[%s1949_s26 + $0x28] sm:$0xff]  ;;  %v876_v47 = vld [vmem:[%s1949_s26 + $0x20] sm:$0xff] }
 0x324   : >> { %v875_v48 = vld [vmem:[%s1949_s26 + $0x18] sm:$0xff]  ;;  %v874_v49 = vld [vmem:[%s1949_s26 + $0x10] sm:$0xff]  ;;  %v873_v50 = vld [vmem:[%s1949_s26 + $0x8] sm:$0xff] }
 0x325   : >> { %895 = vmatpush.msra.mxu0 %v885_v37  ;;  %v872_v51 = vld [vmem:[%s1949_s26] sm:$0xff]  ;;  %s1002_s26 = scalar_lea.vmem %s2140_s10, %s1342_s27 }
 0x326   : >> { %v1500_v54 = vld [vmem:[%s888_s25] ss:$0 sm:$0xff]  ;;  %v1006_v7 = vld [vmem:[%s1002_s26 + $0x18] sm:$0xff]  ;;  %v1005_v8 = vld [vmem:[%s1002_s26 + $0x10] sm:$0xff] }
 0x327   : >> { %896 = vmatpush.msra.mxu0 %v884_v38  ;;  %1022 = vmatpush.msra.mxu3 %v1006_v7  ;;  %v1004_v9 = vld [vmem:[%s1002_s26 + $0x8] sm:$0xff]  ;;  %v1003_v24 = vld [vmem:[%s1002_s26] sm:$0xff] }
 0x328   : > { %v1505_v30 = vld [vmem:[%s2141_s11] ss:$0 sm:$0xff] (%p866_p1) }
 0x329   : >> { %897 = vmatpush.msra.mxu0 %v883_v40  ;;  %1023 = vmatpush.msra.mxu3 %v1005_v8 }
 0x32b   : >> { %898 = vmatpush.msra.mxu0 %v882_v41  ;;  %1024 = vmatpush.msra.mxu3 %v1004_v9 }
 0x32d   : >> { %899 = vmatpush.msra.mxu0 %v881_v42  ;;  %1025 = vmatpush.msra.mxu3 %v1003_v24 }
 0x32f   : >> { %900 = vmatpush.msra.mxu0 %v880_v43 }
 0x331   : >> { %901 = vmatpush.msra.mxu0 %v879_v44 }
 0x333   : >> { %902 = vmatpush.msra.mxu0 %v878_v45 }
 0x335   : >> { %903 = vmatpush.msra.mxu0 %v877_v46 }
 0x337   : >> { %904 = vmatpush.msra.mxu0 %v876_v47 }
 0x339   : >> { %905 = vmatpush.msra.mxu0 %v875_v48  ;;  %v1506_v48 = vld [vmem:[%s2142_s12] ss:$0 sm:$0xff] (%p866_p1) }
 0x33b   : >> { %906 = vmatpush.msra.mxu0 %v874_v49 }
 0x33d   : >> { %907 = vmatpush.msra.mxu0 %v873_v50 }
 0x33f   : >> { %908 = vmatpush.msra.mxu0 %v872_v51 }
 0x340   : >> { %909 = vmatmul.f32.vlgmr.msra.gmra.mxu0 %v1938_v36 }
 0x3bd   : >> { %v910_v55 = vpop.f32.mrf.mxu0 }
 0x3be   : >> { %v911_v56 = vadd.f32 %v1500_v54, %v910_v55  ;;  %v1507_v55 = vld [vmem:[%s2143_s13] ss:$0 sm:$0xff] (%p866_p1) }
 0x3c0   : >> { %1340 = vmatmul.msk.f32.vlgmr.msra.gmra.mxu1 %vm917_vm7, %v911_v56 }
 0x43d   : >> { %v944_v57 = vpop.f32.mrf.mxu1 }
 0x43e   : >> { %v947_v58 = vmul.f32 0.17677669, %v944_v57 }
 0x440   : >> { %v948_v59 = vsel %vm1931_vm0, -1e+09, %v947_v58 }
 0x441   : >> { %v950_v61 = vsel %vm949_vm8, %v948_v59, -inf }
 0x442   : >> { %951 = vmax.xlane.f32.xlu0 %v950_v61 }
 0x4b5   : >> { %v952_v62 = vpop.xlane.xlu0 %951 }
 0x4b6   : >> { %v953_v63 = vsub.f32 %v948_v59, %v952_v62 }
 0x4b8   : >> { %v954_v2 = vmul.f32 1.442695, %v953_v63 }
 0x4ba   : >> { %1501 = vpow2.f32 %v954_v2 }
 0x4c0   : >> { %v1502_v3 = vpop.eup %1501 }
 0x4c1   : >> { %v956_v4 = vsel %vm949_vm8, %v1502_v3, 0.0 }
 0x4c2   : >> { %957 = vadd.xlane.f32.xlu0 %v956_v4 }
 0x535   : >> { %v958_v10 = vpop.xlane.xlu0 %957 }
 0x536   : >> { %1503 = vrcp.f32 %v958_v10  ;;  %v970_v16 = vand.u32 2147483648, %v958_v10  ;;  %v968_v18 = vand.u32 2147483647, %v958_v10  ;;  %vm964_vm10 = vweird.f32 %v958_v10 }
 0x538   : >> { %v971_v20 = vor.u32 1.1754944e-38, %v970_v16  ;;  %vm969_vm12 = vcmp.eq.f32.partialorder %v968_v18, 8.507059e+37 }
 0x53c   : >> { %v1504_v11 = vpop.eup %1503 }
 0x53d   : >> { %v960_v14 = vmul.f32 %v1504_v11, %v958_v10  ;;  %vm965_vm9 = vweird.f32 %v1504_v11 }
 0x53e   : >> { %vm966_vm11 = vmor %vm964_vm10, %vm965_vm9 }
 0x53f   : >> { %v961_v15 = vsub.f32 1.0, %v960_v14 }
 0x541   : >> { %v962_v17 = vmul.f32 %v1504_v11, %v961_v15 }
 0x543   : >> { %v963_v19 = vadd.f32 %v1504_v11, %v962_v17 }
 0x545   : >> { %v967_v21 = vsel %vm966_vm11, %v1504_v11, %v963_v19 }
 0x546   : >> { %v972_v22 = vsel %vm969_vm12, %v971_v20, %v967_v21 }
 0x547   : >> { %v973_v23 = vmul.f32 %v1502_v3, %v972_v22 }
 0x549   : >> { %1341 = vmatmul.msk.f32.vlgmr.msra.gmra.mxu2 %vm949_vm8, %v973_v23 }
 0x5cc   : >> { %v997_v25 = vpop.f32.mrf.mxu2 }
 0x5cd   : >> { %1343 = vmatmul.msk.f32.vlgmr.msra.gmra.mxu3 %vm917_vm7, %v997_v25 }
 0x64f   : > { %868 = sbr.rel (!%p866_p1) target bundleno = 793 (0x319), region = 181 }
 0x650   : >> { %v1027_v27 = vpop.f32.mrf.mxu3 }
 0x651   : >> { %v1030_v28 = vadd.f32 %v1027_v27, %v1000_v26 }
 0x653   : >> { %1031 = vst [vmem:[#allocation4] sm:$0xff] %v1030_v28 }
 0x65a   : > { %v1032_v29 = vld [vmem:[#allocation4] sm:$0xff] }
 0x65b   : > { %v1033_v31 = vadd.f32 %v1032_v29, %v1919_v53  ;;  %1085 = vst [vmem:[#allocation4] sm:$0xff] %v1637_v13 }
 0x65d   : > { %v2003_v32 = vadd.f32 %v1505_v30, %v1033_v31 }
 0x65f   : > { %1041 = vadd.xlane.f32.xlu0 %v2003_v32 }
 0x6d2   : > { %v1042_v33 = vpop.xlane.xlu0 %1041 }
 0x6d3   : > { %v1043_v34 = vmul.f32 %v1042_v33, %v1922_v60 }
 0x6d5   : > { %v1044_v35 = vsub.f32 %v2003_v32, %v1043_v34 }
 0x6d7   : > { %v1045_v0 = vmul.f32 %v1044_v35, %v1044_v35  ;;  %v1079_v54 = vmul.f32 %v1506_v48, %v1044_v35 }
 0x6d9   : > { %1046 = vadd.xlane.f32.xlu0 %v1045_v0 }
 0x74c   : > { %v1047_v12 = vpop.xlane.xlu0 %1046 }
 0x74d   : > { %v1048_v36 = vmul.f32 0.007874016, %v1047_v12 }
 0x74f   : > { %1508 = vrsqrt.f32 %v1048_v36  ;;  %vm1056_vm13 = vcmp.eq.f32.partialorder %v1048_v36, inf  ;;  %v1059_v41 = vand.u32 2147483648, %v1048_v36  ;;  %vm1058_vm14 = vcmp.eq.f32.partialorder %v1048_v36, 0.0 }
 0x755   : > { %v1509_v1 = vpop.eup %1508 }
 0x756   : > { %v1050_v37 = vmul.f32 %v1509_v1, %v1048_v36 }
 0x758   : > { %v1051_v38 = vmul.f32 %v1509_v1, %v1050_v37 }
 0x75a   : > { %v1052_v53 = vmul.f32 0.5, %v1051_v38 }
 0x75c   : > { %v1053_v39 = vsub.f32 1.5, %v1052_v53 }
 0x75e   : > { %v1054_v13 = vmul.f32 %v1509_v1, %v1053_v39 }
 0x760   : > { %v1055_v40 = vmul.f32 %v1054_v13, %v1048_v36 }
 0x762   : > { %v1057_v42 = vsel %vm1056_vm13, %v1048_v36, %v1055_v40 }
 0x763   : > { %v1060_v43 = vsel %vm1058_vm14, %v1059_v41, %v1057_v42 }
 0x764   : > { %v1061_v60 = vadd.f32 1e-06, %v1060_v43 }
 0x766   : > { %1510 = vrcp.f32 %v1061_v60  ;;  %v1073_v47 = vand.u32 2147483648, %v1061_v60  ;;  %v1071_v50 = vand.u32 2147483647, %v1061_v60  ;;  %vm1067_vm0 = vweird.f32 %v1061_v60 }
 0x768   : > { %v1074_v52 = vor.u32 1.1754944e-38, %v1073_v47  ;;  %vm1072_vm2 = vcmp.eq.f32.partialorder %v1071_v50, 8.507059e+37 }
 0x76c   : > { %v1511_v44 = vpop.eup %1510 }
 0x76d   : > { %v1063_v45 = vmul.f32 %v1511_v44, %v1061_v60  ;;  %vm1068_vm15 = vweird.f32 %v1511_v44 }
 0x76e   : > { %vm1069_vm1 = vmor %vm1067_vm0, %vm1068_vm15 }
 0x76f   : > { %v1064_v46 = vsub.f32 1.0, %v1063_v45 }
 0x771   : > { %v1065_v49 = vmul.f32 %v1511_v44, %v1064_v46 }
 0x773   : > { %v1066_v51 = vadd.f32 %v1511_v44, %v1065_v49 }
 0x775   : > { %v1070_v56 = vsel %vm1069_vm1, %v1511_v44, %v1066_v51 }
 0x776   : > { %v1075_v57 = vsel %vm1072_vm2, %v1074_v52, %v1070_v56 }
 0x777   : > { %v1080_v58 = vmul.f32 %v1079_v54, %v1075_v57 }
 0x779   : > { %v2014_v59 = vadd.f32 %v1507_v55, %v1080_v58 }
 0x77a LB: >> { %s1344_s22 = sshll.u32 %s1632_s29, 7  ;;  %s1110_s1 = scalar_lea.vmem %s2145_s15, %s1632_s29  ;;  %v1136_v36 = vld [vmem:[#allocation4] sm:$0xff]  ;;  %s1632_s29 = sphi %s2016_s29, %s1091_s29  }
 0x77b   : >> { %s2029_s21 = scalar_lea.vmem %s2144_s14, %s1344_s22  ;;  %s2037_s24 = scalar_lea.vmem %s2146_s16, %s1344_s22  ;;  %v1512_v34 = vld [vmem:[%s1110_s1] ss:$0 sm:$0xff] }
 0x77c   : >> { %v1109_v61 = vld [vmem:[%s2029_s21 + $0x78] sm:$0xff]  ;;  %v1108_v62 = vld [vmem:[%s2029_s21 + $0x70] sm:$0xff]  ;;  %v1107_v63 = vld [vmem:[%s2029_s21 + $0x68] sm:$0xff]  ;;  %s1091_s29 = sadd.s32 1, %s1632_s29  }
 0x77d   : >> { %1115 = vmatpush.msra.mxu0 %v1109_v61  ;;  %v1106_v2 = vld [vmem:[%s2029_s21 + $0x60] sm:$0xff]  ;;  %v1153_v3 = vld [vmem:[%s2037_s24 + $0x78] sm:$0xff]  ;;  %v1152_v4 = vld [vmem:[%s2037_s24 + $0x70] sm:$0xff]  ;;  %p1088_p2 = scmp.ge.s32.totalorder %s1091_s29, 2  }
 0x77e   : >> { %v1105_v5 = vld [vmem:[%s2029_s21 + $0x58] sm:$0xff]  ;;  %1154 = vmatpush.msra.mxu1 %v1153_v3  ;;  %v1151_v6 = vld [vmem:[%s2037_s24 + $0x68] sm:$0xff]  ;;  %v1104_v7 = vld [vmem:[%s2029_s21 + $0x50] sm:$0xff]  ;;  %s2192_s27 = sld [smem:[#allocation24_spill]] (%p1088_p2)  ;;  %s1346_s2 = sshll.u32 (%p1088_p2), %s1608_s0, 1 }
 0x77f   : >> { %1116 = vmatpush.msra.mxu0 %v1108_v62  ;;  %v1150_v8 = vld [vmem:[%s2037_s24 + $0x60] sm:$0xff]  ;;  %v1103_v9 = vld [vmem:[%s2029_s21 + $0x48] sm:$0xff]  ;;  %v1149_v10 = vld [vmem:[%s2037_s24 + $0x58] sm:$0xff]  ;;  %s2194_s26 = scalar_lea.vmem (%p1088_p2), [#allocation5], %s1818_s17  ;;  %s1195_s19 = sadd.s32 (%p1088_p2), %s1604_s30, %s1346_s2 }
 0x780   : >> { %1155 = vmatpush.msra.mxu1 %v1152_v4  ;;  %v1102_v11 = vld [vmem:[%s2029_s21 + $0x40] sm:$0xff]  ;;  %v1148_v14 = vld [vmem:[%s2037_s24 + $0x50] sm:$0xff]  ;;  %v1101_v15 = vld [vmem:[%s2029_s21 + $0x38] sm:$0xff]  ;;  %s1347_s29 = sshll.u32 (%p1088_p2), %s1195_s19, 3  ;;  %s2195_s25 = sld [smem:[#allocation25_spill]] (%p1088_p2) }
 0x781   : >> { %1117 = vmatpush.msra.mxu0 %v1107_v63  ;;  %v1147_v16 = vld [vmem:[%s2037_s24 + $0x48] sm:$0xff]  ;;  %v1100_v17 = vld [vmem:[%s2029_s21 + $0x30] sm:$0xff]  ;;  %v1146_v18 = vld [vmem:[%s2037_s24 + $0x40] sm:$0xff]  ;;  %s2196_s22 = smov (%p1088_p2), %s2194_s26  ;;  %s2197_s3 = sand.u32 (%p1088_p2), 1, %s1596_s28  }
 0x782   : >> { %1156 = vmatpush.msra.mxu1 %v1151_v6  ;;  %v1099_v19 = vld [vmem:[%s2029_s21 + $0x28] sm:$0xff]  ;;  %v1145_v20 = vld [vmem:[%s2037_s24 + $0x38] sm:$0xff]  ;;  %v1098_v21 = vld [vmem:[%s2029_s21 + $0x20] sm:$0xff] }
 0x783   : >> { %1118 = vmatpush.msra.mxu0 %v1106_v2  ;;  %v1144_v22 = vld [vmem:[%s2037_s24 + $0x30] sm:$0xff]  ;;  %v1097_v23 = vld [vmem:[%s2029_s21 + $0x18] sm:$0xff]  ;;  %v1143_v24 = vld [vmem:[%s2037_s24 + $0x28] sm:$0xff] }
 0x784   : >> { %1157 = vmatpush.msra.mxu1 %v1150_v8  ;;  %v1096_v25 = vld [vmem:[%s2029_s21 + $0x10] sm:$0xff]  ;;  %v1142_v26 = vld [vmem:[%s2037_s24 + $0x20] sm:$0xff]  ;;  %v1095_v27 = vld [vmem:[%s2029_s21 + $0x8] sm:$0xff] }
 0x785   : >> { %1119 = vmatpush.msra.mxu0 %v1105_v5  ;;  %v1141_v28 = vld [vmem:[%s2037_s24 + $0x18] sm:$0xff]  ;;  %v1094_v29 = vld [vmem:[%s2029_s21] sm:$0xff]  ;;  %v1140_v30 = vld [vmem:[%s2037_s24 + $0x10] sm:$0xff]  ;;  %s1199_s21 = sshll.u32 (%p1088_p2), %s2194_s26, 4  ;;  %s1200_s21 = int_to_ptr.vmem [resolvable:$true] %s1199_s21 }
 0x786   : >> { %1158 = vmatpush.msra.mxu1 %v1149_v10  ;;  %v1139_v31 = vld [vmem:[%s2037_s24 + $0x8] sm:$0xff]  ;;  %v1138_v33 = vld [vmem:[%s2037_s24] sm:$0xff]  ;;  %s1197_s20 = scalar_lea.hbm (%p1088_p2), %s2195_s25, %s1347_s29  ;;  %s1534_s2 = scalar_lea.hbm (%p1088_p2), %s2195_s25, 32 }
 0x787   : >> { %1120 = vmatpush.msra.mxu0 %v1104_v7  ;;  %v1513_v53 = vld [vmem:[%s2192_s27] ss:$0 sm:$0xff] (%p1088_p2)  ;;  %s1201_s23 = sshll.u32 (%p1088_p2), %s1197_s20, 4  ;;  %s1185_s27 = scalar_lea.sflag (%p1088_p2), [#allocation6], %s2197_s3  ;;  %s1202_s23 = int_to_ptr.hbm [resolvable:$true] %s1201_s23 }
 0x788   : >> { %1159 = vmatpush.msra.mxu1 %v1148_v14  ;;  %s1528_s4 = sshra.s32 (%p1088_p2), %s1202_s23, 4  ;;  %s1529_s4 = int_to_ptr.hbm [resolvable:$true] %s1528_s4 }
 0x789   : >> { %1121 = vmatpush.msra.mxu0 %v1103_v9  ;;  %s1530_s5 = scalar_lea.hbm (%p1088_p2), %s1529_s4, 8  ;;  %p1535_p7 = scmp.lt.s32.totalorder (%p1088_p2), %s1529_s4, %s2195_s25 }
 0x78a   : >> { %1160 = vmatpush.msra.mxu1 %v1147_v16  ;;  %p1531_p4 = scmp.ne.s32.totalorder (%p1088_p2), %s1529_s4, %s1530_s5  ;;  %p1536_p9 = scmp.lt.s32.totalorder (%p1088_p2), %s1534_s2, %s1530_s5 }
 0x78b   : >> { %1122 = vmatpush.msra.mxu0 %v1102_v11 }
 0x78c   : >> { %1161 = vmatpush.msra.mxu1 %v1146_v18  ;;  %p1532_p5 = pnand (%p1088_p2), %p1531_p4, %p1784_p3  ;;  %p1537_p10 = por (%p1088_p2), %p1536_p9, %p1535_p7 }
 0x78d   : >> { %1123 = vmatpush.msra.mxu0 %v1101_v15 }
 0x78e   : >> { %1162 = vmatpush.msra.mxu1 %v1145_v20  ;;  %p1533_p6 = pneg (%p1088_p2), %p1532_p5 }
 0x78f   : >> { %1124 = vmatpush.msra.mxu0 %v1100_v17 }
 0x790   : >> { %1163 = vmatpush.msra.mxu1 %v1144_v22  ;;  %p1538_p11 = pnand (%p1088_p2), %p1537_p10, %p1533_p6 }
 0x791   : >> { %1125 = vmatpush.msra.mxu0 %v1099_v19 }
 0x792   : >> { %1164 = vmatpush.msra.mxu1 %v1143_v24 }
 0x793   : >> { %1126 = vmatpush.msra.mxu0 %v1098_v21 }
 0x794   : >> { %1165 = vmatpush.msra.mxu1 %v1142_v26 }
 0x795   : >> { %1127 = vmatpush.msra.mxu0 %v1097_v23 }
 0x796   : >> { %1166 = vmatpush.msra.mxu1 %v1141_v28 }
 0x797   : >> { %1128 = vmatpush.msra.mxu0 %v1096_v25 }
 0x798   : >> { %1167 = vmatpush.msra.mxu1 %v1140_v30 }
 0x799   : >> { %1129 = vmatpush.msra.mxu0 %v1095_v27 }
 0x79a   : >> { %1168 = vmatpush.msra.mxu1 %v1139_v31 }
 0x79b   : >> { %1130 = vmatpush.msra.mxu0 %v1094_v29 }
 0x79c   : >> { %1131 = vmatmul.f32.vlgmr.msra.gmra.mxu0 %v2014_v59  ;;  %1169 = vmatpush.msra.mxu1 %v1138_v33 }
 0x819   : >> { %v1132_v35 = vpop.f32.mrf.mxu0 }
 0x81a   : >> { %v1133_v0 = vadd.f32 %v1512_v34, %v1132_v35 }
 0x81c   : >> { %v1135_v12 = vmax.f32 %v1133_v0, 0.0 }
 0x81e   : >> { %1170 = vmatmul.f32.vlgmr.msra.gmra.mxu1 %v1135_v12 }
 0x89a   : > { %1090 = sbr.rel (!%p1088_p2) target bundleno = 1914 (0x77a), region = 192 }
 0x89b   : >> { %v1171_v1 = vpop.f32.mrf.mxu1 }
 0x89c   : >> { %v1174_v37 = vadd.f32 %v1171_v1, %v1136_v36 }
 0x89e   : >> { %1175 = vst [vmem:[#allocation4] sm:$0xff] %v1174_v37 }
 0x8a5   : > { %v1176_v38 = vld [vmem:[#allocation4] sm:$0xff] }
 0x8a6   : > { %v1177_v39 = vadd.f32 %v1176_v38, %v2003_v32 }
 0x8a8   : > { %v1182_v13 = vadd.f32 %v1513_v53, %v1177_v39 }
 0x8aa   : > { %1183 = vst [vmem:[%s2196_s22] sm:$0xff] %v1182_v13 }
 0x8ab   : > { %1541 = shalt.err (!%p1538_p11)
}
 0x8ac   : > { %1383 = dma.vmem_to_hbm [thread:$0]  (%p1784_p3), %s1200_s21, 128, %s1202_s23, %s1185_s27  }
 0x8ad PF: > { %s2198_s3 = sld [smem:[#allocation12_spill]] }
 0x8ae   : > { %s2199_s17 = sld [smem:[#allocation8_spill]] }
 0x8b3   : > { %p1389_p12 = scmp.ge.s32.totalorder %s2198_s3, 2 }
 0x8b4   : > { %s1213_s18 = sand.u32 1, %s2199_s17  }
 0x8b5   : > { %p1386_p13 = pnand %p1389_p12, %p1793_p8  ;;  %s1214_s24 = scalar_lea.sflag [#allocation6], %s1213_s18 }
 0x8b7   : > { %p1387_p0 = pneg %p1386_p13 }
 0x8b9   : > { %1587 = dma.done.wait (%p1387_p0), %s1214_s24, 128  }
 0x8ba   : > { %1589 = vsyncadd (%p1387_p0), %s1214_s24, 4294967168  ;;  %s31_s20 = sadd.s32 1, %s2198_s3   ;;  %s2201_s4 = sld [smem:[#allocation9_spill]] }
 0x8bb   : > { %p28_p1 = scmp.ge.s32.totalorder %s31_s20, 6   ;;  %s2202_s29 = sld [smem:[#allocation17_spill]] }
 0x8bc   : > { %s2203_s30 = sld [smem:[#allocation10_spill]]  ;;  %s2207_s27 = smov %s1596_s28 }
 0x8bd   : > { %s2204_s0 = sld [smem:[#allocation11_spill]]  ;;  %30 = sbr.rel (!%p28_p1) target bundleno = 14 (0xe), region = 203 }
 0x8be   : > { %s2205_s19 = sld [smem:[#allocation13_spill]] }
 0x8bf   : > { %s2206_s1 = sld [smem:[#allocation15_spill]] }
 0x8c0   : > { %s2208_s28 = smov %s2201_s4 }
 0x8c2   :  { %1220 = vsyncpa [#allocation6], 1 }
 0x8c3   :  { %1222 = vsyncpa [#allocation6 + $0x1], 1 }

</bundles_post_ra>
